<compile_context>
chip_gen: v5e
topology: v5e:2x2
jax: 0.10.0
libtpu: 0.0.40
codegen_flags: <defaults>
</compile_context>

<pallas_src>
import numpy as np
import jax
import jax.numpy as jnp
from jax import lax
from jax.experimental import pallas as pl
from jax.experimental.pallas import tpu as pltpu


def _round_up(x, m):
    return (x + m - 1) // m * m


def _full_spec(shape):
    n = len(shape)
    return pl.BlockSpec(shape, lambda i, _n=n: (0,) * _n)


def packed_indices(lengths, batch_size):
    # pack_padded_sequence(batch_first=True, enforce_sorted=True) ordering:
    # time-major over valid (t, b) positions, lengths sorted descending.
    maxlen = int(max(lengths))
    order = [(t, b) for t in range(maxlen) for b in range(batch_size)
             if lengths[b] > t]
    t_idx = np.array([t for t, _ in order], dtype=np.int32)
    b_idx = np.array([b for _, b in order], dtype=np.int32)
    return t_idx, b_idx


# ----------------------------- Fused forward -----------------------------

def decoder_forward(params, images, captions, lengths):
    B, IMG = images.shape
    T = captions.shape[1]
    T1 = T + 1
    E = params["img_w"].shape[1]
    H = params["w_hh0"].shape[0]
    V = params["out_w"].shape[1]

    Bp = _round_up(B, 8)          # 8-sublane alignment
    Vp = _round_up(V, 128)        # lane-dense head output (full-width vst)
    G = 4 * H                     # 4H = 128 -> exactly one vreg lane width
    NR = T1 * Bp                  # rows in (time, padded-batch) layout

    # ---- XLA-side glue: embedding gather, padding, bias/weight reshapes ----
    word_emb = jnp.take(params["emb"], captions, axis=0)        # (B, T, E)
    word_emb = jnp.transpose(word_emb, (1, 0, 2))               # (T, B, E)
    word_emb = jnp.pad(word_emb, ((0, 0), (0, Bp - B), (0, 0)))
    wemb_flat = word_emb.reshape(T * Bp, E)                     # (T*Bp, E)

    images_p = jnp.pad(images, ((0, Bp - B), (0, 0)))           # (Bp, 2048)

    out_w_p = jnp.pad(params["out_w"], ((0, 0), (0, Vp - V)))   # (H, Vp)
    out_b_p = jnp.pad(params["out_b"], (0, Vp - V)).reshape(1, Vp)

    img_b = params["img_b"].reshape(1, E)
    b0 = params["b0"].reshape(1, G)
    b1 = params["b1"].reshape(1, G)
    # Fused layer-1 weight: g1 = [h0_new | h1_prev] @ w1 + b1  (review item #1)
    w1 = jnp.concatenate([params["w_ih1"], params["w_hh1"]], axis=0)  # (2H, 4H)

    def kernel(images_ref, img_w_hbm, img_b_ref, wemb_ref,
               w_ih0_ref, w_hh0_ref, b0_ref,
               w1_ref, b1_ref,
               out_w_ref, out_b_ref,
               logp_ref, p_ref,
               img_w_vmem, img_w_sem):
        f32 = jnp.float32

        # (0) overlap the only nontrivial HBM read (img_w, 256 KB) with the
        #     word-embedding-side hoisted matmul, which does not need it.
        cp = pltpu.make_async_copy(img_w_hbm, img_w_vmem, img_w_sem)
        cp.start()

        b0_v = b0_ref[...]
        # (1) hoisted layer-0 input-gate matmul over all word-embedding rows.
        gxw = (jnp.dot(wemb_ref[...], w_ih0_ref[...],
                       preferred_element_type=f32) + b0_v)        # (T*Bp, G)

        cp.wait()
        img_feat = (jnp.dot(images_ref[...], img_w_vmem[...],
                            preferred_element_type=f32) + img_b_ref[...])
        gx0 = (jnp.dot(img_feat, w_ih0_ref[...],
                       preferred_element_type=f32) + b0_v)        # (Bp, G)

        w_hh0 = w_hh0_ref[...]
        w1_v = w1_ref[...]
        b1_v = b1_ref[...]

        zeros = jnp.zeros((Bp, H), f32)
        h0, c0, h1, c1 = zeros, zeros, zeros, zeros

        def lstm_cell(gates, c_prev):
            # One full (Bp, 4H) = (8, 128) sigmoid pass; tanh only on g lanes.
            sg = jax.nn.sigmoid(gates)
            g_g = jnp.tanh(gates[:, 2 * H:3 * H])
            i_g = sg[:, 0 * H:1 * H]
            f_g = sg[:, 1 * H:2 * H]
            o_g = sg[:, 3 * H:4 * H]
            c = f_g * c_prev + i_g * g_g
            h = o_g * jnp.tanh(c)
            return h, c

        # (2) fused 2-layer recurrence, statically unrolled (T1 = 9 steps);
        #     2 MXU pushes per step: h0 @ w_hh0 and [h0|h1] @ w1.
        ys = []
        for t in range(T1):
            gx_t = gx0 if t == 0 else gxw[(t - 1) * Bp:t * Bp, :]
            g0 = gx_t + jnp.dot(h0, w_hh0, preferred_element_type=f32)
            h0, c0 = lstm_cell(g0, c0)
            g1 = (jnp.dot(jnp.concatenate([h0, h1], axis=1), w1_v,
                          preferred_element_type=f32) + b1_v)
            h1, c1 = lstm_cell(g1, c1)
            ys.append(h1)                                         # stays in vregs

        # (3) head: one batched matmul + masked log_softmax / softmax.
        y = jnp.concatenate(ys, axis=0)                           # (NR, H)
        logits = (jnp.dot(y, out_w_ref[...],
                          preferred_element_type=f32) + out_b_ref[...])
        col = lax.broadcasted_iota(jnp.int32, logits.shape, 1)
        logits = jnp.where(col < V, logits, jnp.float32(-1e30))   # mask pad lanes
        m = jnp.max(logits, axis=1, keepdims=True)
        e = jnp.exp(logits - m)
        s = jnp.sum(e, axis=1, keepdims=True)
        # approx=False on purpose: approximate vrcp error can breach the
        # p atol=1e-5 / rtol=1e-4 tolerance.
        inv = pl.reciprocal(s, approx=False)
        p_ref[...] = (e * inv).astype(p_ref.dtype)
        logp_ref[...] = (logits - m - jnp.log(s)).astype(logp_ref.dtype)

    logp_full, p_full = pl.pallas_call(
        kernel,
        out_shape=(jax.ShapeDtypeStruct((NR, Vp), jnp.float32),
                   jax.ShapeDtypeStruct((NR, Vp), jnp.float32)),
        grid=(1,),
        in_specs=[_full_spec((Bp, IMG)),
                  pl.BlockSpec(memory_space=pl.ANY),   # img_w: manual DMA overlap
                  _full_spec((1, E)),
                  _full_spec((T * Bp, E)),
                  _full_spec((E, G)),
                  _full_spec((H, G)),
                  _full_spec((1, G)),
                  _full_spec((2 * H, G)),
                  _full_spec((1, G)),
                  _full_spec((H, Vp)),
                  _full_spec((1, Vp))],
        out_specs=(_full_spec((NR, Vp)), _full_spec((NR, Vp))),
        scratch_shapes=[pltpu.VMEM((IMG, E), jnp.float32),
                        pltpu.SemaphoreType.DMA(())],
        compiler_params=pltpu.CompilerParams(
            dimension_semantics=("arbitrary",)),
    )(images_p, params["img_w"], img_b, wemb_flat,
      params["w_ih0"], params["w_hh0"], b0,
      w1, b1,
      out_w_p, out_b_p)

    # pack_padded_sequence gather (valid (t, b) positions, packed ordering),
    # then strip vocab padding.  Softmax is per-row, so computing it on all
    # rows and gathering valid ones afterwards is semantically identical.
    t_idx, b_idx = packed_indices(lengths, B)
    flat_idx = t_idx * Bp + b_idx
    logp = logp_full[flat_idx, :V]
    p = p_full[flat_idx, :V]
    return logp, p


# ----------------------------- Pure-JAX reference -----------------------------

def _ref_lstm_layer(x_tbe, w_ih, w_hh, b):
    T, B, _ = x_tbe.shape
    H = w_hh.shape[0]
    h = jnp.zeros((B, H), jnp.float32)
    c = jnp.zeros((B, H), jnp.float32)
    ys = []
    for t in range(T):
        gates = x_tbe[t] @ w_ih + h @ w_hh + b
        i = jax.nn.sigmoid(gates[:, 0 * H:1 * H])
        f = jax.nn.sigmoid(gates[:, 1 * H:2 * H])
        g = jnp.tanh(gates[:, 2 * H:3 * H])
        o = jax.nn.sigmoid(gates[:, 3 * H:4 * H])
        c = f * c + i * g
        h = o * jnp.tanh(c)
        ys.append(h)
    return jnp.stack(ys, axis=0)


def ref_forward(params, images, captions, lengths):
    B = images.shape[0]
    img_feat = images @ params["img_w"] + params["img_b"]
    word_emb = jnp.take(params["emb"], captions, axis=0)
    emb = jnp.concatenate([img_feat[:, None, :], word_emb], axis=1)
    x = jnp.transpose(emb, (1, 0, 2))
    y1 = _ref_lstm_layer(x, params["w_ih0"], params["w_hh0"], params["b0"])
    y2 = _ref_lstm_layer(y1, params["w_ih1"], params["w_hh1"], params["b1"])
    t_idx, b_idx = packed_indices(lengths, B)
    packed = y2[t_idx, b_idx]
    logits = packed @ params["out_w"] + params["out_b"]
    return jax.nn.log_softmax(logits, axis=1), jax.nn.softmax(logits, axis=1)


# ----------------------------- Main -----------------------------

if __name__ == "__main__":
    # Model sizes (small, consistent with the module's constructor)
    E, H, V, B, T = 32, 32, 64, 4, 8       # embedding, hidden, vocab, batch, T
    IMG_FEAT = 2048

    key = jax.random.PRNGKey(0)
    ks = jax.random.split(key, 12)
    params = {
        "emb":   jax.random.normal(ks[0], (V, E), jnp.float32) * 0.1,
        "img_w": jax.random.normal(ks[1], (IMG_FEAT, E), jnp.float32) * 0.02,
        "img_b": jax.random.normal(ks[2], (E,), jnp.float32) * 0.1,
        # LSTM layer 0 (PyTorch stores b_ih and b_hh; we pass their sum)
        "w_ih0": jax.random.normal(ks[3], (E, 4 * H), jnp.float32) * 0.1,
        "w_hh0": jax.random.normal(ks[4], (H, 4 * H), jnp.float32) * 0.1,
        "b0":    jax.random.normal(ks[5], (4 * H,), jnp.float32) * 0.1,
        # LSTM layer 1
        "w_ih1": jax.random.normal(ks[6], (H, 4 * H), jnp.float32) * 0.1,
        "w_hh1": jax.random.normal(ks[7], (H, 4 * H), jnp.float32) * 0.1,
        "b1":    jax.random.normal(ks[8], (4 * H,), jnp.float32) * 0.1,
        # hidden2word
        "out_w": jax.random.normal(ks[9], (H, V), jnp.float32) * 0.1,
        "out_b": jax.random.normal(ks[10], (V,), jnp.float32) * 0.1,
    }

    images = jax.random.normal(ks[11], (B, IMG_FEAT), jnp.float32)
    captions = jax.random.randint(jax.random.PRNGKey(1), (B, T), 0, V,
                                  dtype=jnp.int32)
    lengths = [9, 7, 5, 3]   # sorted descending, <= T+1 (pack_padded_sequence)

    logp, p = decoder_forward(params, images, captions, lengths)
    jax.block_until_ready((logp, p))

    # Correctness check against a pure-JAX reference of the same forward pass.
    logp_ref, p_ref = ref_forward(params, images, captions, lengths)
    assert logp.shape == (sum(lengths), V) and p.shape == (sum(lengths), V)
    assert jnp.allclose(logp, logp_ref, atol=1e-4, rtol=1e-4)
    assert jnp.allclose(p, p_ref, atol=1e-5, rtol=1e-4)

    print("KERNEL_OK")
</pallas_src>

<mosaic_0001>
module attributes {stable_mosaic.version = 11 : i64} {
  func.func @kernel(%arg0: i32, %arg1: memref<8x2048xf32, #tpu.memory_space<vmem>>, %arg2: memref<2048x32xf32, #tpu.memory_space<any>>, %arg3: memref<1x32xf32, #tpu.memory_space<vmem>>, %arg4: memref<64x32xf32, #tpu.memory_space<vmem>>, %arg5: memref<32x128xf32, #tpu.memory_space<vmem>>, %arg6: memref<32x128xf32, #tpu.memory_space<vmem>>, %arg7: memref<1x128xf32, #tpu.memory_space<vmem>>, %arg8: memref<64x128xf32, #tpu.memory_space<vmem>>, %arg9: memref<1x128xf32, #tpu.memory_space<vmem>>, %arg10: memref<32x128xf32, #tpu.memory_space<vmem>>, %arg11: memref<1x128xf32, #tpu.memory_space<vmem>>, %arg12: memref<72x128xf32, #tpu.memory_space<vmem>>, %arg13: memref<72x128xf32, #tpu.memory_space<vmem>>, %arg14: memref<2048x32xf32, #tpu.memory_space<vmem>>, %arg15: memref<!tpu.dma_semaphore, #tpu.memory_space<semaphore_mem>>) attributes {dimension_semantics = [#tpu.dimension_semantics<arbitrary>], iteration_bounds = array<i64: 1>, scalar_prefetch = 0 : i64, scratch_operands = 2 : i64, tpu.core_type = #tpu.core_type<tc>, window_params = [{pipeline_mode = #tpu.pipeline_mode<synchronous>, transform_indices = @transform_0, window_bounds = array<i64: 8, 2048>}, {}, {pipeline_mode = #tpu.pipeline_mode<synchronous>, transform_indices = @transform_2, window_bounds = array<i64: 1, 32>}, {pipeline_mode = #tpu.pipeline_mode<synchronous>, transform_indices = @transform_3, window_bounds = array<i64: 64, 32>}, {pipeline_mode = #tpu.pipeline_mode<synchronous>, transform_indices = @transform_4, window_bounds = array<i64: 32, 128>}, {pipeline_mode = #tpu.pipeline_mode<synchronous>, transform_indices = @transform_5, window_bounds = array<i64: 32, 128>}, {pipeline_mode = #tpu.pipeline_mode<synchronous>, transform_indices = @transform_6, window_bounds = array<i64: 1, 128>}, {pipeline_mode = #tpu.pipeline_mode<synchronous>, transform_indices = @transform_7, window_bounds = array<i64: 64, 128>}, {pipeline_mode = #tpu.pipeline_mode<synchronous>, transform_indices = @transform_8, window_bounds = array<i64: 1, 128>}, {pipeline_mode = #tpu.pipeline_mode<synchronous>, transform_indices = @transform_9, window_bounds = array<i64: 32, 128>}, {pipeline_mode = #tpu.pipeline_mode<synchronous>, transform_indices = @transform_10, window_bounds = array<i64: 1, 128>}, {pipeline_mode = #tpu.pipeline_mode<synchronous>, transform_indices = @transform_11, window_bounds = array<i64: 72, 128>}, {pipeline_mode = #tpu.pipeline_mode<synchronous>, transform_indices = @transform_12, window_bounds = array<i64: 72, 128>}]} {
    tpu.enqueue_dma source(%arg2 : memref<2048x32xf32, #tpu.memory_space<any>>) target(%arg14 : memref<2048x32xf32, #tpu.memory_space<vmem>>) target_semaphore(%arg15 : memref<!tpu.dma_semaphore, #tpu.memory_space<semaphore_mem>>)
    %c0 = arith.constant 0 : index
    %c0_0 = arith.constant 0 : index
    %0 = vector.load %arg7[%c0, %c0_0] : memref<1x128xf32, #tpu.memory_space<vmem>>, vector<1x128xf32>
    %c0_1 = arith.constant 0 : index
    %c0_2 = arith.constant 0 : index
    %1 = vector.load %arg4[%c0_1, %c0_2] : memref<64x32xf32, #tpu.memory_space<vmem>>, vector<64x32xf32>
    %c0_3 = arith.constant 0 : index
    %c0_4 = arith.constant 0 : index
    %2 = vector.load %arg5[%c0_3, %c0_4] : memref<32x128xf32, #tpu.memory_space<vmem>>, vector<32x128xf32>
    %cst = arith.constant dense<0.000000e+00> : vector<64x128xf32>
    %3 = tpu.matmul %1, %2, %cst {dimension_numbers = #tpu.dot_dimension_numbers<[1], [0], [0], [1], [0, 0, 1, 1], [], []>} : vector<64x32xf32>, vector<32x128xf32>, vector<64x128xf32> -> vector<64x128xf32>
    %4 = vector.broadcast %0 : vector<1x128xf32> to vector<64x128xf32>
    %5 = arith.addf %3, %4 : vector<64x128xf32>
    tpu.wait_dma2 semaphore(%arg15 : memref<!tpu.dma_semaphore, #tpu.memory_space<semaphore_mem>>) src(%arg2 : memref<2048x32xf32, #tpu.memory_space<any>>) dst(%arg14 : memref<2048x32xf32, #tpu.memory_space<vmem>>)
    %c0_5 = arith.constant 0 : index
    %c0_6 = arith.constant 0 : index
    %6 = vector.load %arg1[%c0_5, %c0_6] : memref<8x2048xf32, #tpu.memory_space<vmem>>, vector<8x2048xf32>
    %c0_7 = arith.constant 0 : index
    %c0_8 = arith.constant 0 : index
    %7 = vector.load %arg14[%c0_7, %c0_8] : memref<2048x32xf32, #tpu.memory_space<vmem>>, vector<2048x32xf32>
    %cst_9 = arith.constant dense<0.000000e+00> : vector<8x32xf32>
    %8 = tpu.matmul %6, %7, %cst_9 {dimension_numbers = #tpu.dot_dimension_numbers<[1], [0], [0], [1], [0, 0, 1, 1], [], []>} : vector<8x2048xf32>, vector<2048x32xf32>, vector<8x32xf32> -> vector<8x32xf32>
    %c0_10 = arith.constant 0 : index
    %c0_11 = arith.constant 0 : index
    %9 = vector.load %arg3[%c0_10, %c0_11] : memref<1x32xf32, #tpu.memory_space<vmem>>, vector<1x32xf32>
    %10 = vector.broadcast %9 : vector<1x32xf32> to vector<8x32xf32>
    %11 = arith.addf %8, %10 : vector<8x32xf32>
    %c0_12 = arith.constant 0 : index
    %c0_13 = arith.constant 0 : index
    %12 = vector.load %arg5[%c0_12, %c0_13] : memref<32x128xf32, #tpu.memory_space<vmem>>, vector<32x128xf32>
    %cst_14 = arith.constant dense<0.000000e+00> : vector<8x128xf32>
    %13 = tpu.matmul %11, %12, %cst_14 {dimension_numbers = #tpu.dot_dimension_numbers<[1], [0], [0], [1], [0, 0, 1, 1], [], []>} : vector<8x32xf32>, vector<32x128xf32>, vector<8x128xf32> -> vector<8x128xf32>
    %14 = vector.broadcast %0 : vector<1x128xf32> to vector<8x128xf32>
    %15 = arith.addf %13, %14 : vector<8x128xf32>
    %c0_15 = arith.constant 0 : index
    %c0_16 = arith.constant 0 : index
    %16 = vector.load %arg6[%c0_15, %c0_16] : memref<32x128xf32, #tpu.memory_space<vmem>>, vector<32x128xf32>
    %c0_17 = arith.constant 0 : index
    %c0_18 = arith.constant 0 : index
    %17 = vector.load %arg8[%c0_17, %c0_18] : memref<64x128xf32, #tpu.memory_space<vmem>>, vector<64x128xf32>
    %c0_19 = arith.constant 0 : index
    %c0_20 = arith.constant 0 : index
    %18 = vector.load %arg9[%c0_19, %c0_20] : memref<1x128xf32, #tpu.memory_space<vmem>>, vector<1x128xf32>
    %cst_21 = arith.constant 0.000000e+00 : f32
    %19 = vector.broadcast %cst_21 : f32 to vector<8x32xf32>
    %cst_22 = arith.constant dense<0.000000e+00> : vector<8x128xf32>
    %20 = tpu.matmul %19, %16, %cst_22 {dimension_numbers = #tpu.dot_dimension_numbers<[1], [0], [0], [1], [0, 0, 1, 1], [], []>} : vector<8x32xf32>, vector<32x128xf32>, vector<8x128xf32> -> vector<8x128xf32>
    %21 = arith.addf %15, %20 : vector<8x128xf32>
    %22 = arith.negf %21 : vector<8x128xf32>
    %23 = math.exp %22 : vector<8x128xf32>
    %cst_23 = arith.constant 1.000000e+00 : f32
    %24 = vector.broadcast %cst_23 : f32 to vector<8x128xf32>
    %25 = arith.addf %24, %23 : vector<8x128xf32>
    %26 = arith.divf %24, %25 : vector<8x128xf32>
    %27 = vector.extract_strided_slice %21 {offsets = [0, 64], sizes = [8, 32], strides = [1, 1]} : vector<8x128xf32> to vector<8x32xf32>
    %28 = math.tanh %27 : vector<8x32xf32>
    %29 = vector.extract_strided_slice %26 {offsets = [0, 0], sizes = [8, 32], strides = [1, 1]} : vector<8x128xf32> to vector<8x32xf32>
    %30 = vector.extract_strided_slice %26 {offsets = [0, 32], sizes = [8, 32], strides = [1, 1]} : vector<8x128xf32> to vector<8x32xf32>
    %31 = vector.extract_strided_slice %26 {offsets = [0, 96], sizes = [8, 32], strides = [1, 1]} : vector<8x128xf32> to vector<8x32xf32>
    %32 = arith.mulf %30, %19 : vector<8x32xf32>
    %33 = arith.mulf %29, %28 : vector<8x32xf32>
    %34 = arith.addf %32, %33 : vector<8x32xf32>
    %35 = math.tanh %34 : vector<8x32xf32>
    %36 = arith.mulf %31, %35 : vector<8x32xf32>
    %37 = tpu.concatenate %36, %19 in 1 : vector<8x32xf32>, vector<8x32xf32> -> vector<8x64xf32>
    %cst_24 = arith.constant dense<0.000000e+00> : vector<8x128xf32>
    %38 = tpu.matmul %37, %17, %cst_24 {dimension_numbers = #tpu.dot_dimension_numbers<[1], [0], [0], [1], [0, 0, 1, 1], [], []>} : vector<8x64xf32>, vector<64x128xf32>, vector<8x128xf32> -> vector<8x128xf32>
    %39 = vector.broadcast %18 : vector<1x128xf32> to vector<8x128xf32>
    %40 = arith.addf %38, %39 : vector<8x128xf32>
    %41 = arith.negf %40 : vector<8x128xf32>
    %42 = math.exp %41 : vector<8x128xf32>
    %cst_25 = arith.constant 1.000000e+00 : f32
    %43 = vector.broadcast %cst_25 : f32 to vector<8x128xf32>
    %44 = arith.addf %43, %42 : vector<8x128xf32>
    %45 = arith.divf %43, %44 : vector<8x128xf32>
    %46 = vector.extract_strided_slice %40 {offsets = [0, 64], sizes = [8, 32], strides = [1, 1]} : vector<8x128xf32> to vector<8x32xf32>
    %47 = math.tanh %46 : vector<8x32xf32>
    %48 = vector.extract_strided_slice %45 {offsets = [0, 0], sizes = [8, 32], strides = [1, 1]} : vector<8x128xf32> to vector<8x32xf32>
    %49 = vector.extract_strided_slice %45 {offsets = [0, 32], sizes = [8, 32], strides = [1, 1]} : vector<8x128xf32> to vector<8x32xf32>
    %50 = vector.extract_strided_slice %45 {offsets = [0, 96], sizes = [8, 32], strides = [1, 1]} : vector<8x128xf32> to vector<8x32xf32>
    %51 = arith.mulf %49, %19 : vector<8x32xf32>
    %52 = arith.mulf %48, %47 : vector<8x32xf32>
    %53 = arith.addf %51, %52 : vector<8x32xf32>
    %54 = math.tanh %53 : vector<8x32xf32>
    %55 = arith.mulf %50, %54 : vector<8x32xf32>
    %56 = vector.extract_strided_slice %5 {offsets = [0, 0], sizes = [8, 128], strides = [1, 1]} : vector<64x128xf32> to vector<8x128xf32>
    %cst_26 = arith.constant dense<0.000000e+00> : vector<8x128xf32>
    %57 = tpu.matmul %36, %16, %cst_26 {dimension_numbers = #tpu.dot_dimension_numbers<[1], [0], [0], [1], [0, 0, 1, 1], [], []>} : vector<8x32xf32>, vector<32x128xf32>, vector<8x128xf32> -> vector<8x128xf32>
    %58 = arith.addf %56, %57 : vector<8x128xf32>
    %59 = arith.negf %58 : vector<8x128xf32>
    %60 = math.exp %59 : vector<8x128xf32>
    %cst_27 = arith.constant 1.000000e+00 : f32
    %61 = vector.broadcast %cst_27 : f32 to vector<8x128xf32>
    %62 = arith.addf %61, %60 : vector<8x128xf32>
    %63 = arith.divf %61, %62 : vector<8x128xf32>
    %64 = vector.extract_strided_slice %58 {offsets = [0, 64], sizes = [8, 32], strides = [1, 1]} : vector<8x128xf32> to vector<8x32xf32>
    %65 = math.tanh %64 : vector<8x32xf32>
    %66 = vector.extract_strided_slice %63 {offsets = [0, 0], sizes = [8, 32], strides = [1, 1]} : vector<8x128xf32> to vector<8x32xf32>
    %67 = vector.extract_strided_slice %63 {offsets = [0, 32], sizes = [8, 32], strides = [1, 1]} : vector<8x128xf32> to vector<8x32xf32>
    %68 = vector.extract_strided_slice %63 {offsets = [0, 96], sizes = [8, 32], strides = [1, 1]} : vector<8x128xf32> to vector<8x32xf32>
    %69 = arith.mulf %67, %34 : vector<8x32xf32>
    %70 = arith.mulf %66, %65 : vector<8x32xf32>
    %71 = arith.addf %69, %70 : vector<8x32xf32>
    %72 = math.tanh %71 : vector<8x32xf32>
    %73 = arith.mulf %68, %72 : vector<8x32xf32>
    %74 = tpu.concatenate %73, %55 in 1 : vector<8x32xf32>, vector<8x32xf32> -> vector<8x64xf32>
    %cst_28 = arith.constant dense<0.000000e+00> : vector<8x128xf32>
    %75 = tpu.matmul %74, %17, %cst_28 {dimension_numbers = #tpu.dot_dimension_numbers<[1], [0], [0], [1], [0, 0, 1, 1], [], []>} : vector<8x64xf32>, vector<64x128xf32>, vector<8x128xf32> -> vector<8x128xf32>
    %76 = vector.broadcast %18 : vector<1x128xf32> to vector<8x128xf32>
    %77 = arith.addf %75, %76 : vector<8x128xf32>
    %78 = arith.negf %77 : vector<8x128xf32>
    %79 = math.exp %78 : vector<8x128xf32>
    %cst_29 = arith.constant 1.000000e+00 : f32
    %80 = vector.broadcast %cst_29 : f32 to vector<8x128xf32>
    %81 = arith.addf %80, %79 : vector<8x128xf32>
    %82 = arith.divf %80, %81 : vector<8x128xf32>
    %83 = vector.extract_strided_slice %77 {offsets = [0, 64], sizes = [8, 32], strides = [1, 1]} : vector<8x128xf32> to vector<8x32xf32>
    %84 = math.tanh %83 : vector<8x32xf32>
    %85 = vector.extract_strided_slice %82 {offsets = [0, 0], sizes = [8, 32], strides = [1, 1]} : vector<8x128xf32> to vector<8x32xf32>
    %86 = vector.extract_strided_slice %82 {offsets = [0, 32], sizes = [8, 32], strides = [1, 1]} : vector<8x128xf32> to vector<8x32xf32>
    %87 = vector.extract_strided_slice %82 {offsets = [0, 96], sizes = [8, 32], strides = [1, 1]} : vector<8x128xf32> to vector<8x32xf32>
    %88 = arith.mulf %86, %53 : vector<8x32xf32>
    %89 = arith.mulf %85, %84 : vector<8x32xf32>
    %90 = arith.addf %88, %89 : vector<8x32xf32>
    %91 = math.tanh %90 : vector<8x32xf32>
    %92 = arith.mulf %87, %91 : vector<8x32xf32>
    %93 = vector.extract_strided_slice %5 {offsets = [8, 0], sizes = [8, 128], strides = [1, 1]} : vector<64x128xf32> to vector<8x128xf32>
    %cst_30 = arith.constant dense<0.000000e+00> : vector<8x128xf32>
    %94 = tpu.matmul %73, %16, %cst_30 {dimension_numbers = #tpu.dot_dimension_numbers<[1], [0], [0], [1], [0, 0, 1, 1], [], []>} : vector<8x32xf32>, vector<32x128xf32>, vector<8x128xf32> -> vector<8x128xf32>
    %95 = arith.addf %93, %94 : vector<8x128xf32>
    %96 = arith.negf %95 : vector<8x128xf32>
    %97 = math.exp %96 : vector<8x128xf32>
    %cst_31 = arith.constant 1.000000e+00 : f32
    %98 = vector.broadcast %cst_31 : f32 to vector<8x128xf32>
    %99 = arith.addf %98, %97 : vector<8x128xf32>
    %100 = arith.divf %98, %99 : vector<8x128xf32>
    %101 = vector.extract_strided_slice %95 {offsets = [0, 64], sizes = [8, 32], strides = [1, 1]} : vector<8x128xf32> to vector<8x32xf32>
    %102 = math.tanh %101 : vector<8x32xf32>
    %103 = vector.extract_strided_slice %100 {offsets = [0, 0], sizes = [8, 32], strides = [1, 1]} : vector<8x128xf32> to vector<8x32xf32>
    %104 = vector.extract_strided_slice %100 {offsets = [0, 32], sizes = [8, 32], strides = [1, 1]} : vector<8x128xf32> to vector<8x32xf32>
    %105 = vector.extract_strided_slice %100 {offsets = [0, 96], sizes = [8, 32], strides = [1, 1]} : vector<8x128xf32> to vector<8x32xf32>
    %106 = arith.mulf %104, %71 : vector<8x32xf32>
    %107 = arith.mulf %103, %102 : vector<8x32xf32>
    %108 = arith.addf %106, %107 : vector<8x32xf32>
    %109 = math.tanh %108 : vector<8x32xf32>
    %110 = arith.mulf %105, %109 : vector<8x32xf32>
    %111 = tpu.concatenate %110, %92 in 1 : vector<8x32xf32>, vector<8x32xf32> -> vector<8x64xf32>
    %cst_32 = arith.constant dense<0.000000e+00> : vector<8x128xf32>
    %112 = tpu.matmul %111, %17, %cst_32 {dimension_numbers = #tpu.dot_dimension_numbers<[1], [0], [0], [1], [0, 0, 1, 1], [], []>} : vector<8x64xf32>, vector<64x128xf32>, vector<8x128xf32> -> vector<8x128xf32>
    %113 = vector.broadcast %18 : vector<1x128xf32> to vector<8x128xf32>
    %114 = arith.addf %112, %113 : vector<8x128xf32>
    %115 = arith.negf %114 : vector<8x128xf32>
    %116 = math.exp %115 : vector<8x128xf32>
    %cst_33 = arith.constant 1.000000e+00 : f32
    %117 = vector.broadcast %cst_33 : f32 to vector<8x128xf32>
    %118 = arith.addf %117, %116 : vector<8x128xf32>
    %119 = arith.divf %117, %118 : vector<8x128xf32>
    %120 = vector.extract_strided_slice %114 {offsets = [0, 64], sizes = [8, 32], strides = [1, 1]} : vector<8x128xf32> to vector<8x32xf32>
    %121 = math.tanh %120 : vector<8x32xf32>
    %122 = vector.extract_strided_slice %119 {offsets = [0, 0], sizes = [8, 32], strides = [1, 1]} : vector<8x128xf32> to vector<8x32xf32>
    %123 = vector.extract_strided_slice %119 {offsets = [0, 32], sizes = [8, 32], strides = [1, 1]} : vector<8x128xf32> to vector<8x32xf32>
    %124 = vector.extract_strided_slice %119 {offsets = [0, 96], sizes = [8, 32], strides = [1, 1]} : vector<8x128xf32> to vector<8x32xf32>
    %125 = arith.mulf %123, %90 : vector<8x32xf32>
    %126 = arith.mulf %122, %121 : vector<8x32xf32>
    %127 = arith.addf %125, %126 : vector<8x32xf32>
    %128 = math.tanh %127 : vector<8x32xf32>
    %129 = arith.mulf %124, %128 : vector<8x32xf32>
    %130 = vector.extract_strided_slice %5 {offsets = [16, 0], sizes = [8, 128], strides = [1, 1]} : vector<64x128xf32> to vector<8x128xf32>
    %cst_34 = arith.constant dense<0.000000e+00> : vector<8x128xf32>
    %131 = tpu.matmul %110, %16, %cst_34 {dimension_numbers = #tpu.dot_dimension_numbers<[1], [0], [0], [1], [0, 0, 1, 1], [], []>} : vector<8x32xf32>, vector<32x128xf32>, vector<8x128xf32> -> vector<8x128xf32>
    %132 = arith.addf %130, %131 : vector<8x128xf32>
    %133 = arith.negf %132 : vector<8x128xf32>
    %134 = math.exp %133 : vector<8x128xf32>
    %cst_35 = arith.constant 1.000000e+00 : f32
    %135 = vector.broadcast %cst_35 : f32 to vector<8x128xf32>
    %136 = arith.addf %135, %134 : vector<8x128xf32>
    %137 = arith.divf %135, %136 : vector<8x128xf32>
    %138 = vector.extract_strided_slice %132 {offsets = [0, 64], sizes = [8, 32], strides = [1, 1]} : vector<8x128xf32> to vector<8x32xf32>
    %139 = math.tanh %138 : vector<8x32xf32>
    %140 = vector.extract_strided_slice %137 {offsets = [0, 0], sizes = [8, 32], strides = [1, 1]} : vector<8x128xf32> to vector<8x32xf32>
    %141 = vector.extract_strided_slice %137 {offsets = [0, 32], sizes = [8, 32], strides = [1, 1]} : vector<8x128xf32> to vector<8x32xf32>
    %142 = vector.extract_strided_slice %137 {offsets = [0, 96], sizes = [8, 32], strides = [1, 1]} : vector<8x128xf32> to vector<8x32xf32>
    %143 = arith.mulf %141, %108 : vector<8x32xf32>
    %144 = arith.mulf %140, %139 : vector<8x32xf32>
    %145 = arith.addf %143, %144 : vector<8x32xf32>
    %146 = math.tanh %145 : vector<8x32xf32>
    %147 = arith.mulf %142, %146 : vector<8x32xf32>
    %148 = tpu.concatenate %147, %129 in 1 : vector<8x32xf32>, vector<8x32xf32> -> vector<8x64xf32>
    %cst_36 = arith.constant dense<0.000000e+00> : vector<8x128xf32>
    %149 = tpu.matmul %148, %17, %cst_36 {dimension_numbers = #tpu.dot_dimension_numbers<[1], [0], [0], [1], [0, 0, 1, 1], [], []>} : vector<8x64xf32>, vector<64x128xf32>, vector<8x128xf32> -> vector<8x128xf32>
    %150 = vector.broadcast %18 : vector<1x128xf32> to vector<8x128xf32>
    %151 = arith.addf %149, %150 : vector<8x128xf32>
    %152 = arith.negf %151 : vector<8x128xf32>
    %153 = math.exp %152 : vector<8x128xf32>
    %cst_37 = arith.constant 1.000000e+00 : f32
    %154 = vector.broadcast %cst_37 : f32 to vector<8x128xf32>
    %155 = arith.addf %154, %153 : vector<8x128xf32>
    %156 = arith.divf %154, %155 : vector<8x128xf32>
    %157 = vector.extract_strided_slice %151 {offsets = [0, 64], sizes = [8, 32], strides = [1, 1]} : vector<8x128xf32> to vector<8x32xf32>
    %158 = math.tanh %157 : vector<8x32xf32>
    %159 = vector.extract_strided_slice %156 {offsets = [0, 0], sizes = [8, 32], strides = [1, 1]} : vector<8x128xf32> to vector<8x32xf32>
    %160 = vector.extract_strided_slice %156 {offsets = [0, 32], sizes = [8, 32], strides = [1, 1]} : vector<8x128xf32> to vector<8x32xf32>
    %161 = vector.extract_strided_slice %156 {offsets = [0, 96], sizes = [8, 32], strides = [1, 1]} : vector<8x128xf32> to vector<8x32xf32>
    %162 = arith.mulf %160, %127 : vector<8x32xf32>
    %163 = arith.mulf %159, %158 : vector<8x32xf32>
    %164 = arith.addf %162, %163 : vector<8x32xf32>
    %165 = math.tanh %164 : vector<8x32xf32>
    %166 = arith.mulf %161, %165 : vector<8x32xf32>
    %167 = vector.extract_strided_slice %5 {offsets = [24, 0], sizes = [8, 128], strides = [1, 1]} : vector<64x128xf32> to vector<8x128xf32>
    %cst_38 = arith.constant dense<0.000000e+00> : vector<8x128xf32>
    %168 = tpu.matmul %147, %16, %cst_38 {dimension_numbers = #tpu.dot_dimension_numbers<[1], [0], [0], [1], [0, 0, 1, 1], [], []>} : vector<8x32xf32>, vector<32x128xf32>, vector<8x128xf32> -> vector<8x128xf32>
    %169 = arith.addf %167, %168 : vector<8x128xf32>
    %170 = arith.negf %169 : vector<8x128xf32>
    %171 = math.exp %170 : vector<8x128xf32>
    %cst_39 = arith.constant 1.000000e+00 : f32
    %172 = vector.broadcast %cst_39 : f32 to vector<8x128xf32>
    %173 = arith.addf %172, %171 : vector<8x128xf32>
    %174 = arith.divf %172, %173 : vector<8x128xf32>
    %175 = vector.extract_strided_slice %169 {offsets = [0, 64], sizes = [8, 32], strides = [1, 1]} : vector<8x128xf32> to vector<8x32xf32>
    %176 = math.tanh %175 : vector<8x32xf32>
    %177 = vector.extract_strided_slice %174 {offsets = [0, 0], sizes = [8, 32], strides = [1, 1]} : vector<8x128xf32> to vector<8x32xf32>
    %178 = vector.extract_strided_slice %174 {offsets = [0, 32], sizes = [8, 32], strides = [1, 1]} : vector<8x128xf32> to vector<8x32xf32>
    %179 = vector.extract_strided_slice %174 {offsets = [0, 96], sizes = [8, 32], strides = [1, 1]} : vector<8x128xf32> to vector<8x32xf32>
    %180 = arith.mulf %178, %145 : vector<8x32xf32>
    %181 = arith.mulf %177, %176 : vector<8x32xf32>
    %182 = arith.addf %180, %181 : vector<8x32xf32>
    %183 = math.tanh %182 : vector<8x32xf32>
    %184 = arith.mulf %179, %183 : vector<8x32xf32>
    %185 = tpu.concatenate %184, %166 in 1 : vector<8x32xf32>, vector<8x32xf32> -> vector<8x64xf32>
    %cst_40 = arith.constant dense<0.000000e+00> : vector<8x128xf32>
    %186 = tpu.matmul %185, %17, %cst_40 {dimension_numbers = #tpu.dot_dimension_numbers<[1], [0], [0], [1], [0, 0, 1, 1], [], []>} : vector<8x64xf32>, vector<64x128xf32>, vector<8x128xf32> -> vector<8x128xf32>
    %187 = vector.broadcast %18 : vector<1x128xf32> to vector<8x128xf32>
    %188 = arith.addf %186, %187 : vector<8x128xf32>
    %189 = arith.negf %188 : vector<8x128xf32>
    %190 = math.exp %189 : vector<8x128xf32>
    %cst_41 = arith.constant 1.000000e+00 : f32
    %191 = vector.broadcast %cst_41 : f32 to vector<8x128xf32>
    %192 = arith.addf %191, %190 : vector<8x128xf32>
    %193 = arith.divf %191, %192 : vector<8x128xf32>
    %194 = vector.extract_strided_slice %188 {offsets = [0, 64], sizes = [8, 32], strides = [1, 1]} : vector<8x128xf32> to vector<8x32xf32>
    %195 = math.tanh %194 : vector<8x32xf32>
    %196 = vector.extract_strided_slice %193 {offsets = [0, 0], sizes = [8, 32], strides = [1, 1]} : vector<8x128xf32> to vector<8x32xf32>
    %197 = vector.extract_strided_slice %193 {offsets = [0, 32], sizes = [8, 32], strides = [1, 1]} : vector<8x128xf32> to vector<8x32xf32>
    %198 = vector.extract_strided_slice %193 {offsets = [0, 96], sizes = [8, 32], strides = [1, 1]} : vector<8x128xf32> to vector<8x32xf32>
    %199 = arith.mulf %197, %164 : vector<8x32xf32>
    %200 = arith.mulf %196, %195 : vector<8x32xf32>
    %201 = arith.addf %199, %200 : vector<8x32xf32>
    %202 = math.tanh %201 : vector<8x32xf32>
    %203 = arith.mulf %198, %202 : vector<8x32xf32>
    %204 = vector.extract_strided_slice %5 {offsets = [32, 0], sizes = [8, 128], strides = [1, 1]} : vector<64x128xf32> to vector<8x128xf32>
    %cst_42 = arith.constant dense<0.000000e+00> : vector<8x128xf32>
    %205 = tpu.matmul %184, %16, %cst_42 {dimension_numbers = #tpu.dot_dimension_numbers<[1], [0], [0], [1], [0, 0, 1, 1], [], []>} : vector<8x32xf32>, vector<32x128xf32>, vector<8x128xf32> -> vector<8x128xf32>
    %206 = arith.addf %204, %205 : vector<8x128xf32>
    %207 = arith.negf %206 : vector<8x128xf32>
    %208 = math.exp %207 : vector<8x128xf32>
    %cst_43 = arith.constant 1.000000e+00 : f32
    %209 = vector.broadcast %cst_43 : f32 to vector<8x128xf32>
    %210 = arith.addf %209, %208 : vector<8x128xf32>
    %211 = arith.divf %209, %210 : vector<8x128xf32>
    %212 = vector.extract_strided_slice %206 {offsets = [0, 64], sizes = [8, 32], strides = [1, 1]} : vector<8x128xf32> to vector<8x32xf32>
    %213 = math.tanh %212 : vector<8x32xf32>
    %214 = vector.extract_strided_slice %211 {offsets = [0, 0], sizes = [8, 32], strides = [1, 1]} : vector<8x128xf32> to vector<8x32xf32>
    %215 = vector.extract_strided_slice %211 {offsets = [0, 32], sizes = [8, 32], strides = [1, 1]} : vector<8x128xf32> to vector<8x32xf32>
    %216 = vector.extract_strided_slice %211 {offsets = [0, 96], sizes = [8, 32], strides = [1, 1]} : vector<8x128xf32> to vector<8x32xf32>
    %217 = arith.mulf %215, %182 : vector<8x32xf32>
    %218 = arith.mulf %214, %213 : vector<8x32xf32>
    %219 = arith.addf %217, %218 : vector<8x32xf32>
    %220 = math.tanh %219 : vector<8x32xf32>
    %221 = arith.mulf %216, %220 : vector<8x32xf32>
    %222 = tpu.concatenate %221, %203 in 1 : vector<8x32xf32>, vector<8x32xf32> -> vector<8x64xf32>
    %cst_44 = arith.constant dense<0.000000e+00> : vector<8x128xf32>
    %223 = tpu.matmul %222, %17, %cst_44 {dimension_numbers = #tpu.dot_dimension_numbers<[1], [0], [0], [1], [0, 0, 1, 1], [], []>} : vector<8x64xf32>, vector<64x128xf32>, vector<8x128xf32> -> vector<8x128xf32>
    %224 = vector.broadcast %18 : vector<1x128xf32> to vector<8x128xf32>
    %225 = arith.addf %223, %224 : vector<8x128xf32>
    %226 = arith.negf %225 : vector<8x128xf32>
    %227 = math.exp %226 : vector<8x128xf32>
    %cst_45 = arith.constant 1.000000e+00 : f32
    %228 = vector.broadcast %cst_45 : f32 to vector<8x128xf32>
    %229 = arith.addf %228, %227 : vector<8x128xf32>
    %230 = arith.divf %228, %229 : vector<8x128xf32>
    %231 = vector.extract_strided_slice %225 {offsets = [0, 64], sizes = [8, 32], strides = [1, 1]} : vector<8x128xf32> to vector<8x32xf32>
    %232 = math.tanh %231 : vector<8x32xf32>
    %233 = vector.extract_strided_slice %230 {offsets = [0, 0], sizes = [8, 32], strides = [1, 1]} : vector<8x128xf32> to vector<8x32xf32>
    %234 = vector.extract_strided_slice %230 {offsets = [0, 32], sizes = [8, 32], strides = [1, 1]} : vector<8x128xf32> to vector<8x32xf32>
    %235 = vector.extract_strided_slice %230 {offsets = [0, 96], sizes = [8, 32], strides = [1, 1]} : vector<8x128xf32> to vector<8x32xf32>
    %236 = arith.mulf %234, %201 : vector<8x32xf32>
    %237 = arith.mulf %233, %232 : vector<8x32xf32>
    %238 = arith.addf %236, %237 : vector<8x32xf32>
    %239 = math.tanh %238 : vector<8x32xf32>
    %240 = arith.mulf %235, %239 : vector<8x32xf32>
    %241 = vector.extract_strided_slice %5 {offsets = [40, 0], sizes = [8, 128], strides = [1, 1]} : vector<64x128xf32> to vector<8x128xf32>
    %cst_46 = arith.constant dense<0.000000e+00> : vector<8x128xf32>
    %242 = tpu.matmul %221, %16, %cst_46 {dimension_numbers = #tpu.dot_dimension_numbers<[1], [0], [0], [1], [0, 0, 1, 1], [], []>} : vector<8x32xf32>, vector<32x128xf32>, vector<8x128xf32> -> vector<8x128xf32>
    %243 = arith.addf %241, %242 : vector<8x128xf32>
    %244 = arith.negf %243 : vector<8x128xf32>
    %245 = math.exp %244 : vector<8x128xf32>
    %cst_47 = arith.constant 1.000000e+00 : f32
    %246 = vector.broadcast %cst_47 : f32 to vector<8x128xf32>
    %247 = arith.addf %246, %245 : vector<8x128xf32>
    %248 = arith.divf %246, %247 : vector<8x128xf32>
    %249 = vector.extract_strided_slice %243 {offsets = [0, 64], sizes = [8, 32], strides = [1, 1]} : vector<8x128xf32> to vector<8x32xf32>
    %250 = math.tanh %249 : vector<8x32xf32>
    %251 = vector.extract_strided_slice %248 {offsets = [0, 0], sizes = [8, 32], strides = [1, 1]} : vector<8x128xf32> to vector<8x32xf32>
    %252 = vector.extract_strided_slice %248 {offsets = [0, 32], sizes = [8, 32], strides = [1, 1]} : vector<8x128xf32> to vector<8x32xf32>
    %253 = vector.extract_strided_slice %248 {offsets = [0, 96], sizes = [8, 32], strides = [1, 1]} : vector<8x128xf32> to vector<8x32xf32>
    %254 = arith.mulf %252, %219 : vector<8x32xf32>
    %255 = arith.mulf %251, %250 : vector<8x32xf32>
    %256 = arith.addf %254, %255 : vector<8x32xf32>
    %257 = math.tanh %256 : vector<8x32xf32>
    %258 = arith.mulf %253, %257 : vector<8x32xf32>
    %259 = tpu.concatenate %258, %240 in 1 : vector<8x32xf32>, vector<8x32xf32> -> vector<8x64xf32>
    %cst_48 = arith.constant dense<0.000000e+00> : vector<8x128xf32>
    %260 = tpu.matmul %259, %17, %cst_48 {dimension_numbers = #tpu.dot_dimension_numbers<[1], [0], [0], [1], [0, 0, 1, 1], [], []>} : vector<8x64xf32>, vector<64x128xf32>, vector<8x128xf32> -> vector<8x128xf32>
    %261 = vector.broadcast %18 : vector<1x128xf32> to vector<8x128xf32>
    %262 = arith.addf %260, %261 : vector<8x128xf32>
    %263 = arith.negf %262 : vector<8x128xf32>
    %264 = math.exp %263 : vector<8x128xf32>
    %cst_49 = arith.constant 1.000000e+00 : f32
    %265 = vector.broadcast %cst_49 : f32 to vector<8x128xf32>
    %266 = arith.addf %265, %264 : vector<8x128xf32>
    %267 = arith.divf %265, %266 : vector<8x128xf32>
    %268 = vector.extract_strided_slice %262 {offsets = [0, 64], sizes = [8, 32], strides = [1, 1]} : vector<8x128xf32> to vector<8x32xf32>
    %269 = math.tanh %268 : vector<8x32xf32>
    %270 = vector.extract_strided_slice %267 {offsets = [0, 0], sizes = [8, 32], strides = [1, 1]} : vector<8x128xf32> to vector<8x32xf32>
    %271 = vector.extract_strided_slice %267 {offsets = [0, 32], sizes = [8, 32], strides = [1, 1]} : vector<8x128xf32> to vector<8x32xf32>
    %272 = vector.extract_strided_slice %267 {offsets = [0, 96], sizes = [8, 32], strides = [1, 1]} : vector<8x128xf32> to vector<8x32xf32>
    %273 = arith.mulf %271, %238 : vector<8x32xf32>
    %274 = arith.mulf %270, %269 : vector<8x32xf32>
    %275 = arith.addf %273, %274 : vector<8x32xf32>
    %276 = math.tanh %275 : vector<8x32xf32>
    %277 = arith.mulf %272, %276 : vector<8x32xf32>
    %278 = vector.extract_strided_slice %5 {offsets = [48, 0], sizes = [8, 128], strides = [1, 1]} : vector<64x128xf32> to vector<8x128xf32>
    %cst_50 = arith.constant dense<0.000000e+00> : vector<8x128xf32>
    %279 = tpu.matmul %258, %16, %cst_50 {dimension_numbers = #tpu.dot_dimension_numbers<[1], [0], [0], [1], [0, 0, 1, 1], [], []>} : vector<8x32xf32>, vector<32x128xf32>, vector<8x128xf32> -> vector<8x128xf32>
    %280 = arith.addf %278, %279 : vector<8x128xf32>
    %281 = arith.negf %280 : vector<8x128xf32>
    %282 = math.exp %281 : vector<8x128xf32>
    %cst_51 = arith.constant 1.000000e+00 : f32
    %283 = vector.broadcast %cst_51 : f32 to vector<8x128xf32>
    %284 = arith.addf %283, %282 : vector<8x128xf32>
    %285 = arith.divf %283, %284 : vector<8x128xf32>
    %286 = vector.extract_strided_slice %280 {offsets = [0, 64], sizes = [8, 32], strides = [1, 1]} : vector<8x128xf32> to vector<8x32xf32>
    %287 = math.tanh %286 : vector<8x32xf32>
    %288 = vector.extract_strided_slice %285 {offsets = [0, 0], sizes = [8, 32], strides = [1, 1]} : vector<8x128xf32> to vector<8x32xf32>
    %289 = vector.extract_strided_slice %285 {offsets = [0, 32], sizes = [8, 32], strides = [1, 1]} : vector<8x128xf32> to vector<8x32xf32>
    %290 = vector.extract_strided_slice %285 {offsets = [0, 96], sizes = [8, 32], strides = [1, 1]} : vector<8x128xf32> to vector<8x32xf32>
    %291 = arith.mulf %289, %256 : vector<8x32xf32>
    %292 = arith.mulf %288, %287 : vector<8x32xf32>
    %293 = arith.addf %291, %292 : vector<8x32xf32>
    %294 = math.tanh %293 : vector<8x32xf32>
    %295 = arith.mulf %290, %294 : vector<8x32xf32>
    %296 = tpu.concatenate %295, %277 in 1 : vector<8x32xf32>, vector<8x32xf32> -> vector<8x64xf32>
    %cst_52 = arith.constant dense<0.000000e+00> : vector<8x128xf32>
    %297 = tpu.matmul %296, %17, %cst_52 {dimension_numbers = #tpu.dot_dimension_numbers<[1], [0], [0], [1], [0, 0, 1, 1], [], []>} : vector<8x64xf32>, vector<64x128xf32>, vector<8x128xf32> -> vector<8x128xf32>
    %298 = vector.broadcast %18 : vector<1x128xf32> to vector<8x128xf32>
    %299 = arith.addf %297, %298 : vector<8x128xf32>
    %300 = arith.negf %299 : vector<8x128xf32>
    %301 = math.exp %300 : vector<8x128xf32>
    %cst_53 = arith.constant 1.000000e+00 : f32
    %302 = vector.broadcast %cst_53 : f32 to vector<8x128xf32>
    %303 = arith.addf %302, %301 : vector<8x128xf32>
    %304 = arith.divf %302, %303 : vector<8x128xf32>
    %305 = vector.extract_strided_slice %299 {offsets = [0, 64], sizes = [8, 32], strides = [1, 1]} : vector<8x128xf32> to vector<8x32xf32>
    %306 = math.tanh %305 : vector<8x32xf32>
    %307 = vector.extract_strided_slice %304 {offsets = [0, 0], sizes = [8, 32], strides = [1, 1]} : vector<8x128xf32> to vector<8x32xf32>
    %308 = vector.extract_strided_slice %304 {offsets = [0, 32], sizes = [8, 32], strides = [1, 1]} : vector<8x128xf32> to vector<8x32xf32>
    %309 = vector.extract_strided_slice %304 {offsets = [0, 96], sizes = [8, 32], strides = [1, 1]} : vector<8x128xf32> to vector<8x32xf32>
    %310 = arith.mulf %308, %275 : vector<8x32xf32>
    %311 = arith.mulf %307, %306 : vector<8x32xf32>
    %312 = arith.addf %310, %311 : vector<8x32xf32>
    %313 = math.tanh %312 : vector<8x32xf32>
    %314 = arith.mulf %309, %313 : vector<8x32xf32>
    %315 = vector.extract_strided_slice %5 {offsets = [56, 0], sizes = [8, 128], strides = [1, 1]} : vector<64x128xf32> to vector<8x128xf32>
    %cst_54 = arith.constant dense<0.000000e+00> : vector<8x128xf32>
    %316 = tpu.matmul %295, %16, %cst_54 {dimension_numbers = #tpu.dot_dimension_numbers<[1], [0], [0], [1], [0, 0, 1, 1], [], []>} : vector<8x32xf32>, vector<32x128xf32>, vector<8x128xf32> -> vector<8x128xf32>
    %317 = arith.addf %315, %316 : vector<8x128xf32>
    %318 = arith.negf %317 : vector<8x128xf32>
    %319 = math.exp %318 : vector<8x128xf32>
    %cst_55 = arith.constant 1.000000e+00 : f32
    %320 = vector.broadcast %cst_55 : f32 to vector<8x128xf32>
    %321 = arith.addf %320, %319 : vector<8x128xf32>
    %322 = arith.divf %320, %321 : vector<8x128xf32>
    %323 = vector.extract_strided_slice %317 {offsets = [0, 64], sizes = [8, 32], strides = [1, 1]} : vector<8x128xf32> to vector<8x32xf32>
    %324 = math.tanh %323 : vector<8x32xf32>
    %325 = vector.extract_strided_slice %322 {offsets = [0, 0], sizes = [8, 32], strides = [1, 1]} : vector<8x128xf32> to vector<8x32xf32>
    %326 = vector.extract_strided_slice %322 {offsets = [0, 32], sizes = [8, 32], strides = [1, 1]} : vector<8x128xf32> to vector<8x32xf32>
    %327 = vector.extract_strided_slice %322 {offsets = [0, 96], sizes = [8, 32], strides = [1, 1]} : vector<8x128xf32> to vector<8x32xf32>
    %328 = arith.mulf %326, %293 : vector<8x32xf32>
    %329 = arith.mulf %325, %324 : vector<8x32xf32>
    %330 = arith.addf %328, %329 : vector<8x32xf32>
    %331 = math.tanh %330 : vector<8x32xf32>
    %332 = arith.mulf %327, %331 : vector<8x32xf32>
    %333 = tpu.concatenate %332, %314 in 1 : vector<8x32xf32>, vector<8x32xf32> -> vector<8x64xf32>
    %cst_56 = arith.constant dense<0.000000e+00> : vector<8x128xf32>
    %334 = tpu.matmul %333, %17, %cst_56 {dimension_numbers = #tpu.dot_dimension_numbers<[1], [0], [0], [1], [0, 0, 1, 1], [], []>} : vector<8x64xf32>, vector<64x128xf32>, vector<8x128xf32> -> vector<8x128xf32>
    %335 = vector.broadcast %18 : vector<1x128xf32> to vector<8x128xf32>
    %336 = arith.addf %334, %335 : vector<8x128xf32>
    %337 = arith.negf %336 : vector<8x128xf32>
    %338 = math.exp %337 : vector<8x128xf32>
    %cst_57 = arith.constant 1.000000e+00 : f32
    %339 = vector.broadcast %cst_57 : f32 to vector<8x128xf32>
    %340 = arith.addf %339, %338 : vector<8x128xf32>
    %341 = arith.divf %339, %340 : vector<8x128xf32>
    %342 = vector.extract_strided_slice %336 {offsets = [0, 64], sizes = [8, 32], strides = [1, 1]} : vector<8x128xf32> to vector<8x32xf32>
    %343 = math.tanh %342 : vector<8x32xf32>
    %344 = vector.extract_strided_slice %341 {offsets = [0, 0], sizes = [8, 32], strides = [1, 1]} : vector<8x128xf32> to vector<8x32xf32>
    %345 = vector.extract_strided_slice %341 {offsets = [0, 32], sizes = [8, 32], strides = [1, 1]} : vector<8x128xf32> to vector<8x32xf32>
    %346 = vector.extract_strided_slice %341 {offsets = [0, 96], sizes = [8, 32], strides = [1, 1]} : vector<8x128xf32> to vector<8x32xf32>
    %347 = arith.mulf %345, %312 : vector<8x32xf32>
    %348 = arith.mulf %344, %343 : vector<8x32xf32>
    %349 = arith.addf %347, %348 : vector<8x32xf32>
    %350 = math.tanh %349 : vector<8x32xf32>
    %351 = arith.mulf %346, %350 : vector<8x32xf32>
    %352 = tpu.concatenate %55, %92, %129, %166, %203, %240, %277, %314, %351 in 0 : vector<8x32xf32>, vector<8x32xf32>, vector<8x32xf32>, vector<8x32xf32>, vector<8x32xf32>, vector<8x32xf32>, vector<8x32xf32>, vector<8x32xf32>, vector<8x32xf32> -> vector<72x32xf32>
    %c0_58 = arith.constant 0 : index
    %c0_59 = arith.constant 0 : index
    %353 = vector.load %arg10[%c0_58, %c0_59] : memref<32x128xf32, #tpu.memory_space<vmem>>, vector<32x128xf32>
    %cst_60 = arith.constant dense<0.000000e+00> : vector<72x128xf32>
    %354 = tpu.matmul %352, %353, %cst_60 {dimension_numbers = #tpu.dot_dimension_numbers<[1], [0], [0], [1], [0, 0, 1, 1], [], []>} : vector<72x32xf32>, vector<32x128xf32>, vector<72x128xf32> -> vector<72x128xf32>
    %c0_61 = arith.constant 0 : index
    %c0_62 = arith.constant 0 : index
    %355 = vector.load %arg11[%c0_61, %c0_62] : memref<1x128xf32, #tpu.memory_space<vmem>>, vector<1x128xf32>
    %356 = vector.broadcast %355 : vector<1x128xf32> to vector<72x128xf32>
    %357 = arith.addf %354, %356 : vector<72x128xf32>
    %358 = tpu.iota {dimensions = array<i32: 1>} : vector<72x128xi32>
    %c64_i32 = arith.constant 64 : i32
    %359 = vector.broadcast %c64_i32 : i32 to vector<72x128xi32>
    %360 = arith.cmpi slt, %358, %359 : vector<72x128xi32>
    %cst_63 = arith.constant -1.000000e+30 : f32
    %361 = vector.broadcast %cst_63 : f32 to vector<72x128xf32>
    %362 = arith.select %360, %357, %361 : vector<72x128xi1>, vector<72x128xf32>
    %cst_64 = arith.constant dense<0xFF800000> : vector<72xf32>
    %363 = vector.multi_reduction <maximumf>, %362, %cst_64 [1] : vector<72x128xf32> to vector<72xf32>
    %364 = vector.shape_cast %363 : vector<72xf32> to vector<72x1xf32>
    %365 = vector.broadcast %364 : vector<72x1xf32> to vector<72x128xf32>
    %366 = arith.subf %362, %365 : vector<72x128xf32>
    %367 = math.exp %366 : vector<72x128xf32>
    %cst_65 = arith.constant dense<0.000000e+00> : vector<72xf32>
    %368 = vector.multi_reduction <add>, %367, %cst_65 [1] : vector<72x128xf32> to vector<72xf32>
    %369 = vector.shape_cast %368 : vector<72xf32> to vector<72x1xf32>
    %370 = tpu.reciprocal %369 : vector<72x1xf32> -> vector<72x1xf32>
    %371 = vector.broadcast %370 : vector<72x1xf32> to vector<72x128xf32>
    %372 = arith.mulf %367, %371 : vector<72x128xf32>
    %c0_66 = arith.constant 0 : index
    %c0_67 = arith.constant 0 : index
    %373 = vector.load %arg13[%c0_66, %c0_67] : memref<72x128xf32, #tpu.memory_space<vmem>>, vector<72x128xf32>
    tpu.vector_store %arg13[%c0_66, %c0_67], %372 {strides = array<i32>} : memref<72x128xf32, #tpu.memory_space<vmem>>, vector<72x128xf32>,
    %374 = vector.broadcast %364 : vector<72x1xf32> to vector<72x128xf32>
    %375 = arith.subf %362, %374 : vector<72x128xf32>
    %376 = math.log %369 : vector<72x1xf32>
    %377 = vector.broadcast %376 : vector<72x1xf32> to vector<72x128xf32>
    %378 = arith.subf %375, %377 : vector<72x128xf32>
    %c0_68 = arith.constant 0 : index
    %c0_69 = arith.constant 0 : index
    %379 = vector.load %arg12[%c0_68, %c0_69] : memref<72x128xf32, #tpu.memory_space<vmem>>, vector<72x128xf32>
    tpu.vector_store %arg12[%c0_68, %c0_69], %378 {strides = array<i32>} : memref<72x128xf32, #tpu.memory_space<vmem>>, vector<72x128xf32>,
    return
  }
  func.func @transform_0(%arg0: i32) -> (i32, i32) {
    %c0_i32 = arith.constant 0 : i32
    %c0_i32_0 = arith.constant 0 : i32
    %c0_i32_1 = arith.constant 0 : i32
    return %c0_i32, %c0_i32_0 : i32, i32
  }
  func.func @transform_2(%arg0: i32) -> (i32, i32) {
    %c0_i32 = arith.constant 0 : i32
    %c0_i32_0 = arith.constant 0 : i32
    %c0_i32_1 = arith.constant 0 : i32
    return %c0_i32, %c0_i32_0 : i32, i32
  }
  func.func @transform_3(%arg0: i32) -> (i32, i32) {
    %c0_i32 = arith.constant 0 : i32
    %c0_i32_0 = arith.constant 0 : i32
    %c0_i32_1 = arith.constant 0 : i32
    return %c0_i32, %c0_i32_0 : i32, i32
  }
  func.func @transform_4(%arg0: i32) -> (i32, i32) {
    %c0_i32 = arith.constant 0 : i32
    %c0_i32_0 = arith.constant 0 : i32
    %c0_i32_1 = arith.constant 0 : i32
    return %c0_i32, %c0_i32_0 : i32, i32
  }
  func.func @transform_5(%arg0: i32) -> (i32, i32) {
    %c0_i32 = arith.constant 0 : i32
    %c0_i32_0 = arith.constant 0 : i32
    %c0_i32_1 = arith.constant 0 : i32
    return %c0_i32, %c0_i32_0 : i32, i32
  }
  func.func @transform_6(%arg0: i32) -> (i32, i32) {
    %c0_i32 = arith.constant 0 : i32
    %c0_i32_0 = arith.constant 0 : i32
    %c0_i32_1 = arith.constant 0 : i32
    return %c0_i32, %c0_i32_0 : i32, i32
  }
  func.func @transform_7(%arg0: i32) -> (i32, i32) {
    %c0_i32 = arith.constant 0 : i32
    %c0_i32_0 = arith.constant 0 : i32
    %c0_i32_1 = arith.constant 0 : i32
    return %c0_i32, %c0_i32_0 : i32, i32
  }
  func.func @transform_8(%arg0: i32) -> (i32, i32) {
    %c0_i32 = arith.constant 0 : i32
    %c0_i32_0 = arith.constant 0 : i32
    %c0_i32_1 = arith.constant 0 : i32
    return %c0_i32, %c0_i32_0 : i32, i32
  }
  func.func @transform_9(%arg0: i32) -> (i32, i32) {
    %c0_i32 = arith.constant 0 : i32
    %c0_i32_0 = arith.constant 0 : i32
    %c0_i32_1 = arith.constant 0 : i32
    return %c0_i32, %c0_i32_0 : i32, i32
  }
  func.func @transform_10(%arg0: i32) -> (i32, i32) {
    %c0_i32 = arith.constant 0 : i32
    %c0_i32_0 = arith.constant 0 : i32
    %c0_i32_1 = arith.constant 0 : i32
    return %c0_i32, %c0_i32_0 : i32, i32
  }
  func.func @transform_11(%arg0: i32) -> (i32, i32) {
    %c0_i32 = arith.constant 0 : i32
    %c0_i32_0 = arith.constant 0 : i32
    %c0_i32_1 = arith.constant 0 : i32
    return %c0_i32, %c0_i32_0 : i32, i32
  }
  func.func @transform_12(%arg0: i32) -> (i32, i32) {
    %c0_i32 = arith.constant 0 : i32
    %c0_i32_0 = arith.constant 0 : i32
    %c0_i32_1 = arith.constant 0 : i32
    return %c0_i32, %c0_i32_0 : i32, i32
  }
}

</mosaic_0001>

<bundles_post_ra>
// kernel: tpu_custom_call.1
= control target key start
LH: loop header
LB: loop body
LE: loop exit
PB: predicated region body
PF: predicated region fallthrough
CT: control target
= control target key end

     0   :  { %18 = vsyncpa [#allocation5], 0  ;;  %s5452_s0 = inlined_call_operand.vmem [shape: f32[8,2048], index: 0, kind: input, shape index: {}]   ;;  %s5453_s1 = inlined_call_operand.vmem [shape: f32[2048,32], index: 1, kind: input, shape index: {}]   ;;  %s5454_s2 = inlined_call_operand.vmem [shape: f32[1,32], index: 2, kind: input, shape index: {}]   ;;  %s5455_s3 = inlined_call_operand.vmem [shape: f32[64,32], index: 3, kind: input, shape index: {}]   ;;  %s5456_s4 = inlined_call_operand.vmem [shape: f32[32,128], index: 4, kind: input, shape index: {}]   ;;  %s5457_s5 = inlined_call_operand.vmem [shape: f32[32,128], index: 5, kind: input, shape index: {}]   ;;  %s5458_s6 = inlined_call_operand.vmem [shape: f32[1,128], index: 6, kind: input, shape index: {}]   ;;  %s5459_s7 = inlined_call_operand.vmem [shape: f32[64,128], index: 7, kind: input, shape index: {}]   ;;  %s5460_s8 = inlined_call_operand.vmem [shape: f32[1,128], index: 8, kind: input, shape index: {}]   ;;  %s5461_s9 = inlined_call_operand.vmem [shape: f32[32,128], index: 9, kind: input, shape index: {}]   ;;  %s5462_s10 = inlined_call_operand.vmem [shape: f32[1,128], index: 10, kind: input, shape index: {}]   ;;  %s5463_s11 = inlined_call_operand.hbm [shape: f32[72,128], index: 11, kind: output, shape index: {0}]   ;;  %s5464_s12 = inlined_call_operand.hbm [shape: f32[72,128], index: 12, kind: output, shape index: {1}]  }
   0x1   :  { %19 = vsyncpa [#allocation7], 0  ;;  %v3238_v0 = vld [vmem:[%s5453_s1] sm:$0xff]  ;;  %v3243_v1 = vld [vmem:[%s5453_s1 + $0x8] sm:$0xff] }
   0x2   :  { %5465 = vst [vmem:[#allocation12_spill] sm:$0xff] %v3238_v0  ;;  %v3248_v2 = vld [vmem:[%s5453_s1 + $0x10] sm:$0xff]  ;;  %v3253_v3 = vld [vmem:[%s5453_s1 + $0x18] sm:$0xff]  ;;  %v3258_v4 = vld [vmem:[%s5453_s1 + $0x20] sm:$0xff] }
   0x3   :  { %5466 = vst [vmem:[#allocation13_spill] sm:$0xff] %v3243_v1  ;;  %v3263_v5 = vld [vmem:[%s5453_s1 + $0x28] sm:$0xff]  ;;  %v3268_v6 = vld [vmem:[%s5453_s1 + $0x30] sm:$0xff]  ;;  %v3273_v7 = vld [vmem:[%s5453_s1 + $0x38] sm:$0xff] }
   0x4   :  { %5467 = vst [vmem:[#allocation14_spill] sm:$0xff] %v3248_v2  ;;  %v3278_v8 = vld [vmem:[%s5453_s1 + $0x40] sm:$0xff]  ;;  %v3283_v9 = vld [vmem:[%s5453_s1 + $0x48] sm:$0xff]  ;;  %v3288_v10 = vld [vmem:[%s5453_s1 + $0x50] sm:$0xff] }
   0x5   :  { %v3293_v11 = vld [vmem:[%s5453_s1 + $0x58] sm:$0xff]  ;;  %v3298_v12 = vld [vmem:[%s5453_s1 + $0x60] sm:$0xff]  ;;  %v3303_v13 = vld [vmem:[%s5453_s1 + $0x68] sm:$0xff] }
   0x6   :  { %v3308_v14 = vld [vmem:[%s5453_s1 + $0x70] sm:$0xff]  ;;  %v3313_v15 = vld [vmem:[%s5453_s1 + $0x78] sm:$0xff]  ;;  %v3318_v16 = vld [vmem:[%s5453_s1 + $0x80] sm:$0xff] }
   0x7   :  { %5468 = vst [vmem:[#allocation15_spill] sm:$0xff] %v3318_v16  ;;  %v3323_v17 = vld [vmem:[%s5453_s1 + $0x88] sm:$0xff]  ;;  %v3328_v18 = vld [vmem:[%s5453_s1 + $0x90] sm:$0xff]  ;;  %v3333_v19 = vld [vmem:[%s5453_s1 + $0x98] sm:$0xff] }
   0x8   :  { %5469 = vst [vmem:[#allocation16_spill] sm:$0xff] %v3323_v17  ;;  %v3338_v20 = vld [vmem:[%s5453_s1 + $0xa0] sm:$0xff]  ;;  %v3343_v21 = vld [vmem:[%s5453_s1 + $0xa8] sm:$0xff]  ;;  %v3348_v22 = vld [vmem:[%s5453_s1 + $0xb0] sm:$0xff] }
   0x9   :  { %5470 = vst [vmem:[#allocation17_spill] sm:$0xff] %v3328_v18  ;;  %v3353_v23 = vld [vmem:[%s5453_s1 + $0xb8] sm:$0xff]  ;;  %v3358_v24 = vld [vmem:[%s5453_s1 + $0xc0] sm:$0xff]  ;;  %v3363_v25 = vld [vmem:[%s5453_s1 + $0xc8] sm:$0xff] }
   0xa   :  { %v3368_v26 = vld [vmem:[%s5453_s1 + $0xd0] sm:$0xff]  ;;  %v3373_v27 = vld [vmem:[%s5453_s1 + $0xd8] sm:$0xff]  ;;  %v3378_v28 = vld [vmem:[%s5453_s1 + $0xe0] sm:$0xff] }
   0xb   :  { %v3383_v29 = vld [vmem:[%s5453_s1 + $0xe8] sm:$0xff]  ;;  %v3388_v30 = vld [vmem:[%s5453_s1 + $0xf0] sm:$0xff]  ;;  %v3393_v31 = vld [vmem:[%s5453_s1 + $0xf8] sm:$0xff] }
   0xc   :  { %v3398_v32 = vld [vmem:[%s5453_s1 + $0x100] sm:$0xff]  ;;  %v3403_v33 = vld [vmem:[%s5453_s1 + $0x108] sm:$0xff]  ;;  %v3408_v34 = vld [vmem:[%s5453_s1 + $0x110] sm:$0xff] }
   0xd   :  { %5471 = vst [vmem:[#allocation18_spill] sm:$0xff] %v3398_v32  ;;  %v3413_v35 = vld [vmem:[%s5453_s1 + $0x118] sm:$0xff]  ;;  %v3418_v36 = vld [vmem:[%s5453_s1 + $0x120] sm:$0xff]  ;;  %v3423_v37 = vld [vmem:[%s5453_s1 + $0x128] sm:$0xff] }
   0xe   :  { %5472 = vst [vmem:[#allocation19_spill] sm:$0xff] %v3403_v33  ;;  %v3428_v38 = vld [vmem:[%s5453_s1 + $0x130] sm:$0xff]  ;;  %v3433_v39 = vld [vmem:[%s5453_s1 + $0x138] sm:$0xff]  ;;  %v3438_v40 = vld [vmem:[%s5453_s1 + $0x140] sm:$0xff] }
   0xf   :  { %5473 = vst [vmem:[#allocation20_spill] sm:$0xff] %v3408_v34  ;;  %v3443_v41 = vld [vmem:[%s5453_s1 + $0x148] sm:$0xff]  ;;  %v3448_v42 = vld [vmem:[%s5453_s1 + $0x150] sm:$0xff]  ;;  %v3453_v43 = vld [vmem:[%s5453_s1 + $0x158] sm:$0xff] }
  0x10   :  { %v3458_v44 = vld [vmem:[%s5453_s1 + $0x160] sm:$0xff]  ;;  %v3463_v45 = vld [vmem:[%s5453_s1 + $0x168] sm:$0xff]  ;;  %v3468_v46 = vld [vmem:[%s5453_s1 + $0x170] sm:$0xff] }
  0x11   :  { %v3473_v47 = vld [vmem:[%s5453_s1 + $0x178] sm:$0xff]  ;;  %v3478_v48 = vld [vmem:[%s5453_s1 + $0x180] sm:$0xff]  ;;  %v3483_v49 = vld [vmem:[%s5453_s1 + $0x188] sm:$0xff] }
  0x12   :  { %5474 = vst [vmem:[#allocation21_spill] sm:$0xff] %v3478_v48  ;;  %v3488_v50 = vld [vmem:[%s5453_s1 + $0x190] sm:$0xff]  ;;  %v3493_v51 = vld [vmem:[%s5453_s1 + $0x198] sm:$0xff]  ;;  %v3498_v52 = vld [vmem:[%s5453_s1 + $0x1a0] sm:$0xff] }
  0x13   :  { %5475 = vst [vmem:[#allocation22_spill] sm:$0xff] %v3483_v49  ;;  %v3503_v53 = vld [vmem:[%s5453_s1 + $0x1a8] sm:$0xff]  ;;  %v3508_v54 = vld [vmem:[%s5453_s1 + $0x1b0] sm:$0xff]  ;;  %v3513_v55 = vld [vmem:[%s5453_s1 + $0x1b8] sm:$0xff] }
  0x14   :  { %5476 = vst [vmem:[#allocation23_spill] sm:$0xff] %v3488_v50  ;;  %v3518_v56 = vld [vmem:[%s5453_s1 + $0x1c0] sm:$0xff]  ;;  %v3523_v57 = vld [vmem:[%s5453_s1 + $0x1c8] sm:$0xff]  ;;  %v3528_v58 = vld [vmem:[%s5453_s1 + $0x1d0] sm:$0xff] }
  0x15   :  { %5477 = vst [vmem:[#allocation24_spill] sm:$0xff] %v3493_v51  ;;  %v3533_v59 = vld [vmem:[%s5453_s1 + $0x1d8] sm:$0xff]  ;;  %v3538_v60 = vld [vmem:[%s5453_s1 + $0x1e0] sm:$0xff]  ;;  %v3543_v61 = vld [vmem:[%s5453_s1 + $0x1e8] sm:$0xff] }
  0x16   :  { %5478 = vst [vmem:[#allocation25_spill] sm:$0xff] %v3498_v52  ;;  %v3548_v62 = vld [vmem:[%s5453_s1 + $0x1f0] sm:$0xff]  ;;  %v3553_v63 = vld [vmem:[%s5453_s1 + $0x1f8] sm:$0xff]  ;;  %v3558_v48 = vld [vmem:[%s5453_s1 + $0x200] sm:$0xff] }
  0x17   :  { %5479 = vst [vmem:[#allocation26_spill] sm:$0xff] %v3503_v53  ;;  %v3563_v49 = vld [vmem:[%s5453_s1 + $0x208] sm:$0xff]  ;;  %v3568_v50 = vld [vmem:[%s5453_s1 + $0x210] sm:$0xff]  ;;  %v3573_v51 = vld [vmem:[%s5453_s1 + $0x218] sm:$0xff] }
  0x18   :  { %5480 = vst [vmem:[#allocation27_spill] sm:$0xff] %v3508_v54  ;;  %v3578_v52 = vld [vmem:[%s5453_s1 + $0x220] sm:$0xff]  ;;  %v3613_v53 = vld [vmem:[%s5453_s1 + $0x258] sm:$0xff]  ;;  %v3623_v54 = vld [vmem:[%s5453_s1 + $0x268] sm:$0xff] }
  0x19   :  { %5481 = vst [vmem:[#allocation28_spill] sm:$0xff] %v3513_v55  ;;  %v3633_v55 = vld [vmem:[%s5453_s1 + $0x278] sm:$0xff]  ;;  %v3808_v16 = vld [vmem:[%s5453_s1 + $0x390] sm:$0xff] }
  0x1a   :  { %5482 = vst [vmem:[#allocation29_spill] sm:$0xff] %v3518_v56  ;;  %v3643_v56 = vld [vmem:[%s5453_s1 + $0x288] sm:$0xff]  ;;  %v3793_v32 = vld [vmem:[%s5453_s1 + $0x378] sm:$0xff] }
  0x1b   :  { %5483 = vst [vmem:[#allocation30_spill] sm:$0xff] %v3523_v57  ;;  %v3653_v57 = vld [vmem:[%s5453_s1 + $0x298] sm:$0xff] }
  0x1c   :  { %5484 = vst [vmem:[#allocation31_spill] sm:$0xff] %v3528_v58  ;;  %v3723_v58 = vld [vmem:[%s5453_s1 + $0x308] sm:$0xff]  ;;  %v3813_v0 = vld [vmem:[%s5453_s1 + $0x398] sm:$0xff] }
  0x1d   :  { %5485 = vst [vmem:[#allocation32_spill] sm:$0xff] %v3533_v59  ;;  %v3738_v59 = vld [vmem:[%s5453_s1 + $0x320] sm:$0xff] }
  0x1e   :  { %5486 = vst [vmem:[#allocation33_spill] sm:$0xff] %v3538_v60  ;;  %v3753_v60 = vld [vmem:[%s5453_s1 + $0x338] sm:$0xff] }
  0x1f   :  { %5487 = vst [vmem:[#allocation34_spill] sm:$0xff] %v3543_v61  ;;  %v3773_v61 = vld [vmem:[%s5453_s1 + $0x358] sm:$0xff] }
  0x20   :  { %5488 = vst [vmem:[#allocation35_spill] sm:$0xff] %v3548_v62  ;;  %v3788_v62 = vld [vmem:[%s5453_s1 + $0x370] sm:$0xff] }
  0x21   :  { %5489 = vst [vmem:[#allocation36_spill] sm:$0xff] %v3553_v63  ;;  %v3803_v63 = vld [vmem:[%s5453_s1 + $0x388] sm:$0xff] }
  0x22   :  { %5490 = vst [vmem:[#allocation37_spill] sm:$0xff] %v3558_v48  ;;  %v3583_v48 = vld [vmem:[%s5453_s1 + $0x228] sm:$0xff] }
  0x23   :  { %5491 = vst [vmem:[#allocation38_spill] sm:$0xff] %v3563_v49  ;;  %v3588_v49 = vld [vmem:[%s5453_s1 + $0x230] sm:$0xff] }
  0x24   :  { %5492 = vst [vmem:[#allocation39_spill] sm:$0xff] %v3568_v50  ;;  %v3593_v50 = vld [vmem:[%s5453_s1 + $0x238] sm:$0xff] }
  0x25   :  { %5493 = vst [vmem:[#allocation40_spill] sm:$0xff] %v3573_v51  ;;  %v3598_v51 = vld [vmem:[%s5453_s1 + $0x240] sm:$0xff] }
  0x26   :  { %5494 = vst [vmem:[#allocation41_spill] sm:$0xff] %v3578_v52  ;;  %v3603_v52 = vld [vmem:[%s5453_s1 + $0x248] sm:$0xff] }
  0x27   :  { %5495 = vst [vmem:[#allocation42_spill] sm:$0xff] %v3583_v48  ;;  %v3608_v48 = vld [vmem:[%s5453_s1 + $0x250] sm:$0xff] }
  0x28   :  { %5496 = vst [vmem:[#allocation43_spill] sm:$0xff] %v3588_v49  ;;  %v3618_v49 = vld [vmem:[%s5453_s1 + $0x260] sm:$0xff] }
  0x29   :  { %5497 = vst [vmem:[#allocation44_spill] sm:$0xff] %v3593_v50  ;;  %v3628_v50 = vld [vmem:[%s5453_s1 + $0x270] sm:$0xff] }
  0x2a   :  { %5498 = vst [vmem:[#allocation45_spill] sm:$0xff] %v3598_v51  ;;  %v3638_v51 = vld [vmem:[%s5453_s1 + $0x280] sm:$0xff] }
  0x2b   :  { %5499 = vst [vmem:[#allocation46_spill] sm:$0xff] %v3603_v52  ;;  %v3648_v52 = vld [vmem:[%s5453_s1 + $0x290] sm:$0xff] }
  0x2c   :  { %5500 = vst [vmem:[#allocation47_spill] sm:$0xff] %v3608_v48  ;;  %v3658_v48 = vld [vmem:[%s5453_s1 + $0x2a0] sm:$0xff] }
  0x2d   :  { %5501 = vst [vmem:[#allocation48_spill] sm:$0xff] %v3613_v53  ;;  %v3733_v53 = vld [vmem:[%s5453_s1 + $0x318] sm:$0xff] }
  0x2e   :  { %5502 = vst [vmem:[#allocation49_spill] sm:$0xff] %v3618_v49  ;;  %v3748_v49 = vld [vmem:[%s5453_s1 + $0x330] sm:$0xff] }
  0x2f   :  { %5503 = vst [vmem:[#allocation50_spill] sm:$0xff] %v3623_v54  ;;  %v3768_v54 = vld [vmem:[%s5453_s1 + $0x350] sm:$0xff] }
  0x30   :  { %5504 = vst [vmem:[#allocation51_spill] sm:$0xff] %v3628_v50  ;;  %v3783_v50 = vld [vmem:[%s5453_s1 + $0x368] sm:$0xff] }
  0x31   :  { %5505 = vst [vmem:[#allocation52_spill] sm:$0xff] %v3633_v55  ;;  %v3798_v55 = vld [vmem:[%s5453_s1 + $0x380] sm:$0xff] }
  0x32   :  { %5506 = vst [vmem:[#allocation53_spill] sm:$0xff] %v3638_v51  ;;  %v3663_v51 = vld [vmem:[%s5453_s1 + $0x2a8] sm:$0xff] }
  0x33   :  { %5507 = vst [vmem:[#allocation54_spill] sm:$0xff] %v3643_v56  ;;  %v3668_v56 = vld [vmem:[%s5453_s1 + $0x2b0] sm:$0xff] }
  0x34   :  { %5508 = vst [vmem:[#allocation55_spill] sm:$0xff] %v3648_v52  ;;  %v3673_v52 = vld [vmem:[%s5453_s1 + $0x2b8] sm:$0xff] }
  0x35   :  { %5509 = vst [vmem:[#allocation56_spill] sm:$0xff] %v3653_v57  ;;  %v3678_v57 = vld [vmem:[%s5453_s1 + $0x2c0] sm:$0xff] }
  0x36   :  { %5510 = vst [vmem:[#allocation57_spill] sm:$0xff] %v3658_v48  ;;  %v3683_v48 = vld [vmem:[%s5453_s1 + $0x2c8] sm:$0xff] }
  0x37   :  { %5511 = vst [vmem:[#allocation58_spill] sm:$0xff] %v3663_v51  ;;  %v3688_v51 = vld [vmem:[%s5453_s1 + $0x2d0] sm:$0xff] }
  0x38   :  { %5512 = vst [vmem:[#allocation59_spill] sm:$0xff] %v3668_v56  ;;  %v3693_v56 = vld [vmem:[%s5453_s1 + $0x2d8] sm:$0xff] }
  0x39   :  { %5513 = vst [vmem:[#allocation60_spill] sm:$0xff] %v3673_v52  ;;  %v3698_v52 = vld [vmem:[%s5453_s1 + $0x2e0] sm:$0xff] }
  0x3a   :  { %5514 = vst [vmem:[#allocation61_spill] sm:$0xff] %v3678_v57  ;;  %v3703_v57 = vld [vmem:[%s5453_s1 + $0x2e8] sm:$0xff] }
  0x3b   :  { %5515 = vst [vmem:[#allocation62_spill] sm:$0xff] %v3683_v48  ;;  %v3708_v48 = vld [vmem:[%s5453_s1 + $0x2f0] sm:$0xff] }
  0x3c   :  { %5516 = vst [vmem:[#allocation63_spill] sm:$0xff] %v3688_v51  ;;  %v3713_v51 = vld [vmem:[%s5453_s1 + $0x2f8] sm:$0xff] }
  0x3d   :  { %5517 = vst [vmem:[#allocation64_spill] sm:$0xff] %v3693_v56  ;;  %v3718_v56 = vld [vmem:[%s5453_s1 + $0x300] sm:$0xff] }
  0x3e   :  { %5518 = vst [vmem:[#allocation65_spill] sm:$0xff] %v3698_v52  ;;  %v3728_v52 = vld [vmem:[%s5453_s1 + $0x310] sm:$0xff] }
  0x3f   :  { %5519 = vst [vmem:[#allocation66_spill] sm:$0xff] %v3703_v57  ;;  %v3743_v57 = vld [vmem:[%s5453_s1 + $0x328] sm:$0xff] }
  0x40   :  { %5520 = vst [vmem:[#allocation67_spill] sm:$0xff] %v3708_v48  ;;  %v3763_v48 = vld [vmem:[%s5453_s1 + $0x348] sm:$0xff] }
  0x41   :  { %5521 = vst [vmem:[#allocation68_spill] sm:$0xff] %v3713_v51  ;;  %v3778_v51 = vld [vmem:[%s5453_s1 + $0x360] sm:$0xff] }
  0x42   :  { %5522 = vst [vmem:[#allocation69_spill] sm:$0xff] %v3718_v56  ;;  %v3758_v56 = vld [vmem:[%s5453_s1 + $0x340] sm:$0xff] }
  0x43   :  { %5523 = vst [vmem:[#allocation70_spill] sm:$0xff] %v3723_v58  ;;  %v3818_v58 = vld [vmem:[%s5453_s1 + $0x3a0] sm:$0xff] }
  0x44   :  { %5524 = vst [vmem:[#allocation71_spill] sm:$0xff] %v3728_v52 }
  0x45   :  { %5525 = vst [vmem:[#allocation72_spill] sm:$0xff] %v3733_v53 }
  0x46   :  { %5526 = vst [vmem:[#allocation73_spill] sm:$0xff] %v3798_v55  ;;  %v3823_v55 = vld [vmem:[%s5453_s1 + $0x3a8] sm:$0xff] }
  0x47   :  { %5527 = vst [vmem:[#allocation74_spill] sm:$0xff] %v3803_v63  ;;  %v3828_v63 = vld [vmem:[%s5453_s1 + $0x3b0] sm:$0xff] }
  0x48   :  { %5528 = vst [vmem:[#allocation75_spill] sm:$0xff] %v3808_v16  ;;  %v3833_v16 = vld [vmem:[%s5453_s1 + $0x3b8] sm:$0xff] }
  0x49   :  { %5529 = vst [vmem:[#allocation76_spill] sm:$0xff] %v3813_v0  ;;  %v3838_v0 = vld [vmem:[%s5453_s1 + $0x3c0] sm:$0xff] }
  0x4a   :  { %5530 = vst [vmem:[#allocation77_spill] sm:$0xff] %v3818_v58  ;;  %v3843_v58 = vld [vmem:[%s5453_s1 + $0x3c8] sm:$0xff] }
  0x4b   :  { %5531 = vst [vmem:[#allocation78_spill] sm:$0xff] %v3823_v55  ;;  %v3848_v55 = vld [vmem:[%s5453_s1 + $0x3d0] sm:$0xff] }
  0x4c   :  { %5532 = vst [vmem:[#allocation79_spill] sm:$0xff] %v3828_v63  ;;  %v3853_v63 = vld [vmem:[%s5453_s1 + $0x3d8] sm:$0xff] }
  0x4d   :  { %5533 = vst [vmem:[#allocation80_spill] sm:$0xff] %v3833_v16  ;;  %v3858_v16 = vld [vmem:[%s5453_s1 + $0x3e0] sm:$0xff] }
  0x4e   :  { %5534 = vst [vmem:[#allocation81_spill] sm:$0xff] %v3838_v0  ;;  %v3863_v0 = vld [vmem:[%s5453_s1 + $0x3e8] sm:$0xff] }
  0x4f   :  { %5535 = vst [vmem:[#allocation82_spill] sm:$0xff] %v3843_v58  ;;  %v3868_v58 = vld [vmem:[%s5453_s1 + $0x3f0] sm:$0xff] }
  0x50   :  { %5536 = vst [vmem:[#allocation83_spill] sm:$0xff] %v3848_v55  ;;  %v3873_v55 = vld [vmem:[%s5453_s1 + $0x3f8] sm:$0xff] }
  0x51   :  { %5537 = vst [vmem:[#allocation84_spill] sm:$0xff] %v3853_v63  ;;  %v3878_v63 = vld [vmem:[%s5453_s1 + $0x400] sm:$0xff] }
  0x52   :  { %5538 = vst [vmem:[#allocation85_spill] sm:$0xff] %v3858_v16  ;;  %v3883_v16 = vld [vmem:[%s5453_s1 + $0x408] sm:$0xff] }
  0x53   :  { %5539 = vst [vmem:[#allocation86_spill] sm:$0xff] %v3863_v0  ;;  %v3888_v0 = vld [vmem:[%s5453_s1 + $0x410] sm:$0xff] }
  0x54   :  { %5540 = vst [vmem:[#allocation87_spill] sm:$0xff] %v3868_v58  ;;  %v3893_v58 = vld [vmem:[%s5453_s1 + $0x418] sm:$0xff] }
  0x55   :  { %5541 = vst [vmem:[#allocation88_spill] sm:$0xff] %v3873_v55  ;;  %v3898_v55 = vld [vmem:[%s5453_s1 + $0x420] sm:$0xff] }
  0x56   :  { %5542 = vst [vmem:[#allocation89_spill] sm:$0xff] %v3878_v63  ;;  %v3903_v63 = vld [vmem:[%s5453_s1 + $0x428] sm:$0xff] }
  0x57   :  { %5543 = vst [vmem:[#allocation90_spill] sm:$0xff] %v3883_v16  ;;  %v3908_v16 = vld [vmem:[%s5453_s1 + $0x430] sm:$0xff] }
  0x58   :  { %5544 = vst [vmem:[#allocation91_spill] sm:$0xff] %v3888_v0  ;;  %v3913_v0 = vld [vmem:[%s5453_s1 + $0x438] sm:$0xff] }
  0x59   :  { %5545 = vst [vmem:[#allocation92_spill] sm:$0xff] %v3893_v58  ;;  %v3918_v58 = vld [vmem:[%s5453_s1 + $0x440] sm:$0xff] }
  0x5a   :  { %5546 = vst [vmem:[#allocation93_spill] sm:$0xff] %v3898_v55  ;;  %v3923_v55 = vld [vmem:[%s5453_s1 + $0x448] sm:$0xff] }
  0x5b   :  { %5547 = vst [vmem:[#allocation94_spill] sm:$0xff] %v3903_v63  ;;  %v3928_v63 = vld [vmem:[%s5453_s1 + $0x450] sm:$0xff] }
  0x5c   :  { %5548 = vst [vmem:[#allocation95_spill] sm:$0xff] %v3908_v16  ;;  %v3933_v16 = vld [vmem:[%s5453_s1 + $0x458] sm:$0xff] }
  0x5d   :  { %5549 = vst [vmem:[#allocation96_spill] sm:$0xff] %v3913_v0  ;;  %v3938_v0 = vld [vmem:[%s5453_s1 + $0x460] sm:$0xff] }
  0x5e   :  { %5550 = vst [vmem:[#allocation97_spill] sm:$0xff] %v3918_v58  ;;  %v3943_v58 = vld [vmem:[%s5453_s1 + $0x468] sm:$0xff] }
  0x5f   :  { %5551 = vst [vmem:[#allocation98_spill] sm:$0xff] %v3923_v55  ;;  %v3948_v55 = vld [vmem:[%s5453_s1 + $0x470] sm:$0xff] }
  0x60   :  { %5552 = vst [vmem:[#allocation99_spill] sm:$0xff] %v3928_v63  ;;  %v3953_v63 = vld [vmem:[%s5453_s1 + $0x478] sm:$0xff] }
  0x61   :  { %5553 = vst [vmem:[#allocation100_spill] sm:$0xff] %v3933_v16  ;;  %v3958_v16 = vld [vmem:[%s5453_s1 + $0x480] sm:$0xff] }
  0x62   :  { %5554 = vst [vmem:[#allocation101_spill] sm:$0xff] %v3938_v0  ;;  %v3963_v0 = vld [vmem:[%s5453_s1 + $0x488] sm:$0xff] }
  0x63   :  { %5555 = vst [vmem:[#allocation102_spill] sm:$0xff] %v3943_v58  ;;  %v3968_v58 = vld [vmem:[%s5453_s1 + $0x490] sm:$0xff] }
  0x64   :  { %5556 = vst [vmem:[#allocation103_spill] sm:$0xff] %v3948_v55  ;;  %v3973_v55 = vld [vmem:[%s5453_s1 + $0x498] sm:$0xff] }
  0x65   :  { %5557 = vst [vmem:[#allocation104_spill] sm:$0xff] %v3953_v63  ;;  %v3978_v63 = vld [vmem:[%s5453_s1 + $0x4a0] sm:$0xff] }
  0x66   :  { %5558 = vst [vmem:[#allocation105_spill] sm:$0xff] %v3958_v16  ;;  %v3983_v16 = vld [vmem:[%s5453_s1 + $0x4a8] sm:$0xff] }
  0x67   :  { %5559 = vst [vmem:[#allocation106_spill] sm:$0xff] %v3963_v0  ;;  %v3988_v0 = vld [vmem:[%s5453_s1 + $0x4b0] sm:$0xff] }
  0x68   :  { %5560 = vst [vmem:[#allocation107_spill] sm:$0xff] %v3968_v58  ;;  %v3993_v58 = vld [vmem:[%s5453_s1 + $0x4b8] sm:$0xff] }
  0x69   :  { %5561 = vst [vmem:[#allocation108_spill] sm:$0xff] %v3973_v55  ;;  %v3998_v55 = vld [vmem:[%s5453_s1 + $0x4c0] sm:$0xff] }
  0x6a   :  { %5562 = vst [vmem:[#allocation109_spill] sm:$0xff] %v3978_v63  ;;  %v4003_v63 = vld [vmem:[%s5453_s1 + $0x4c8] sm:$0xff] }
  0x6b   :  { %5563 = vst [vmem:[#allocation110_spill] sm:$0xff] %v3983_v16  ;;  %v4008_v16 = vld [vmem:[%s5453_s1 + $0x4d0] sm:$0xff] }
  0x6c   :  { %5564 = vst [vmem:[#allocation111_spill] sm:$0xff] %v3988_v0  ;;  %v4013_v0 = vld [vmem:[%s5453_s1 + $0x4d8] sm:$0xff] }
  0x6d   :  { %5565 = vst [vmem:[#allocation112_spill] sm:$0xff] %v3993_v58  ;;  %v4018_v58 = vld [vmem:[%s5453_s1 + $0x4e0] sm:$0xff] }
  0x6e   :  { %5566 = vst [vmem:[#allocation113_spill] sm:$0xff] %v3998_v55  ;;  %v4023_v55 = vld [vmem:[%s5453_s1 + $0x4e8] sm:$0xff] }
  0x6f   :  { %5567 = vst [vmem:[#allocation114_spill] sm:$0xff] %v4003_v63  ;;  %v4028_v63 = vld [vmem:[%s5453_s1 + $0x4f0] sm:$0xff] }
  0x70   :  { %5568 = vst [vmem:[#allocation115_spill] sm:$0xff] %v4008_v16  ;;  %v4033_v16 = vld [vmem:[%s5453_s1 + $0x4f8] sm:$0xff] }
  0x71   :  { %5569 = vst [vmem:[#allocation116_spill] sm:$0xff] %v4013_v0  ;;  %v4038_v0 = vld [vmem:[%s5453_s1 + $0x500] sm:$0xff] }
  0x72   :  { %5570 = vst [vmem:[#allocation117_spill] sm:$0xff] %v4018_v58  ;;  %v4043_v58 = vld [vmem:[%s5453_s1 + $0x508] sm:$0xff] }
  0x73   :  { %5571 = vst [vmem:[#allocation118_spill] sm:$0xff] %v4023_v55  ;;  %v4048_v55 = vld [vmem:[%s5453_s1 + $0x510] sm:$0xff] }
  0x74   :  { %5572 = vst [vmem:[#allocation119_spill] sm:$0xff] %v4028_v63  ;;  %v4053_v63 = vld [vmem:[%s5453_s1 + $0x518] sm:$0xff] }
  0x75   :  { %5573 = vst [vmem:[#allocation120_spill] sm:$0xff] %v4033_v16  ;;  %v4058_v16 = vld [vmem:[%s5453_s1 + $0x520] sm:$0xff] }
  0x76   :  { %5574 = vst [vmem:[#allocation121_spill] sm:$0xff] %v4038_v0  ;;  %v4063_v0 = vld [vmem:[%s5453_s1 + $0x528] sm:$0xff] }
  0x77   :  { %5575 = vst [vmem:[#allocation122_spill] sm:$0xff] %v4043_v58  ;;  %v4068_v58 = vld [vmem:[%s5453_s1 + $0x530] sm:$0xff] }
  0x78   :  { %5576 = vst [vmem:[#allocation123_spill] sm:$0xff] %v4048_v55  ;;  %v4073_v55 = vld [vmem:[%s5453_s1 + $0x538] sm:$0xff] }
  0x79   :  { %5577 = vst [vmem:[#allocation124_spill] sm:$0xff] %v4053_v63  ;;  %v4078_v63 = vld [vmem:[%s5453_s1 + $0x540] sm:$0xff] }
  0x7a   :  { %5578 = vst [vmem:[#allocation125_spill] sm:$0xff] %v4058_v16  ;;  %v4083_v16 = vld [vmem:[%s5453_s1 + $0x548] sm:$0xff] }
  0x7b   :  { %5579 = vst [vmem:[#allocation126_spill] sm:$0xff] %v4063_v0  ;;  %v4088_v0 = vld [vmem:[%s5453_s1 + $0x550] sm:$0xff] }
  0x7c   :  { %5580 = vst [vmem:[#allocation127_spill] sm:$0xff] %v4068_v58  ;;  %v4093_v58 = vld [vmem:[%s5453_s1 + $0x558] sm:$0xff] }
  0x7d   :  { %5581 = vst [vmem:[#allocation128_spill] sm:$0xff] %v4073_v55  ;;  %v4098_v55 = vld [vmem:[%s5453_s1 + $0x560] sm:$0xff] }
  0x7e   :  { %5582 = vst [vmem:[#allocation129_spill] sm:$0xff] %v4078_v63  ;;  %v4103_v63 = vld [vmem:[%s5453_s1 + $0x568] sm:$0xff] }
  0x7f   :  { %5583 = vst [vmem:[#allocation130_spill] sm:$0xff] %v4083_v16  ;;  %v4108_v16 = vld [vmem:[%s5453_s1 + $0x570] sm:$0xff] }
  0x80   :  { %5584 = vst [vmem:[#allocation131_spill] sm:$0xff] %v4088_v0  ;;  %v4113_v0 = vld [vmem:[%s5453_s1 + $0x578] sm:$0xff] }
  0x81   :  { %5585 = vst [vmem:[#allocation132_spill] sm:$0xff] %v4093_v58  ;;  %v4118_v58 = vld [vmem:[%s5453_s1 + $0x580] sm:$0xff] }
  0x82   :  { %5586 = vst [vmem:[#allocation133_spill] sm:$0xff] %v4098_v55  ;;  %v4123_v55 = vld [vmem:[%s5453_s1 + $0x588] sm:$0xff] }
  0x83   :  { %5587 = vst [vmem:[#allocation134_spill] sm:$0xff] %v4103_v63  ;;  %v4128_v63 = vld [vmem:[%s5453_s1 + $0x590] sm:$0xff] }
  0x84   :  { %5588 = vst [vmem:[#allocation135_spill] sm:$0xff] %v4108_v16  ;;  %v4133_v16 = vld [vmem:[%s5453_s1 + $0x598] sm:$0xff] }
  0x85   :  { %5589 = vst [vmem:[#allocation136_spill] sm:$0xff] %v4113_v0  ;;  %v4138_v0 = vld [vmem:[%s5453_s1 + $0x5a0] sm:$0xff] }
  0x86   :  { %5590 = vst [vmem:[#allocation137_spill] sm:$0xff] %v4118_v58  ;;  %v4143_v58 = vld [vmem:[%s5453_s1 + $0x5a8] sm:$0xff] }
  0x87   :  { %5591 = vst [vmem:[#allocation138_spill] sm:$0xff] %v4123_v55  ;;  %v4148_v55 = vld [vmem:[%s5453_s1 + $0x5b0] sm:$0xff] }
  0x88   :  { %5592 = vst [vmem:[#allocation139_spill] sm:$0xff] %v4128_v63  ;;  %v4153_v63 = vld [vmem:[%s5453_s1 + $0x5b8] sm:$0xff] }
  0x89   :  { %5593 = vst [vmem:[#allocation140_spill] sm:$0xff] %v4133_v16  ;;  %v4158_v16 = vld [vmem:[%s5453_s1 + $0x5c0] sm:$0xff] }
  0x8a   :  { %5594 = vst [vmem:[#allocation141_spill] sm:$0xff] %v4138_v0  ;;  %v4163_v0 = vld [vmem:[%s5453_s1 + $0x5c8] sm:$0xff] }
  0x8b   :  { %5595 = vst [vmem:[#allocation142_spill] sm:$0xff] %v4143_v58  ;;  %v4168_v58 = vld [vmem:[%s5453_s1 + $0x5d0] sm:$0xff] }
  0x8c   :  { %5596 = vst [vmem:[#allocation143_spill] sm:$0xff] %v4148_v55  ;;  %v4173_v55 = vld [vmem:[%s5453_s1 + $0x5d8] sm:$0xff] }
  0x8d   :  { %5597 = vst [vmem:[#allocation144_spill] sm:$0xff] %v4153_v63  ;;  %v4178_v63 = vld [vmem:[%s5453_s1 + $0x5e0] sm:$0xff] }
  0x8e   :  { %5598 = vst [vmem:[#allocation145_spill] sm:$0xff] %v4158_v16  ;;  %v4183_v16 = vld [vmem:[%s5453_s1 + $0x5e8] sm:$0xff] }
  0x8f   :  { %5599 = vst [vmem:[#allocation146_spill] sm:$0xff] %v4163_v0  ;;  %v4188_v0 = vld [vmem:[%s5453_s1 + $0x5f0] sm:$0xff] }
  0x90   :  { %5600 = vst [vmem:[#allocation147_spill] sm:$0xff] %v4168_v58  ;;  %v4193_v58 = vld [vmem:[%s5453_s1 + $0x5f8] sm:$0xff] }
  0x91   :  { %5601 = vst [vmem:[#allocation148_spill] sm:$0xff] %v4173_v55  ;;  %v4198_v55 = vld [vmem:[%s5453_s1 + $0x600] sm:$0xff] }
  0x92   :  { %5602 = vst [vmem:[#allocation149_spill] sm:$0xff] %v4178_v63  ;;  %v4203_v63 = vld [vmem:[%s5453_s1 + $0x608] sm:$0xff] }
  0x93   :  { %5603 = vst [vmem:[#allocation150_spill] sm:$0xff] %v4183_v16  ;;  %v4208_v16 = vld [vmem:[%s5453_s1 + $0x610] sm:$0xff] }
  0x94   :  { %5604 = vst [vmem:[#allocation151_spill] sm:$0xff] %v4188_v0  ;;  %v4213_v0 = vld [vmem:[%s5453_s1 + $0x618] sm:$0xff] }
  0x95   :  { %5605 = vst [vmem:[#allocation152_spill] sm:$0xff] %v4193_v58  ;;  %v4218_v58 = vld [vmem:[%s5453_s1 + $0x620] sm:$0xff] }
  0x96   :  { %5606 = vst [vmem:[#allocation153_spill] sm:$0xff] %v4198_v55  ;;  %v4223_v55 = vld [vmem:[%s5453_s1 + $0x628] sm:$0xff] }
  0x97   :  { %5607 = vst [vmem:[#allocation154_spill] sm:$0xff] %v4203_v63  ;;  %v4228_v63 = vld [vmem:[%s5453_s1 + $0x630] sm:$0xff] }
  0x98   :  { %5608 = vst [vmem:[#allocation155_spill] sm:$0xff] %v4208_v16  ;;  %v4233_v16 = vld [vmem:[%s5453_s1 + $0x638] sm:$0xff] }
  0x99   :  { %5609 = vst [vmem:[#allocation156_spill] sm:$0xff] %v4213_v0  ;;  %v4238_v0 = vld [vmem:[%s5453_s1 + $0x640] sm:$0xff] }
  0x9a   :  { %5610 = vst [vmem:[#allocation157_spill] sm:$0xff] %v4218_v58  ;;  %v4243_v58 = vld [vmem:[%s5453_s1 + $0x648] sm:$0xff] }
  0x9b   :  { %5611 = vst [vmem:[#allocation158_spill] sm:$0xff] %v4223_v55  ;;  %v4248_v55 = vld [vmem:[%s5453_s1 + $0x650] sm:$0xff] }
  0x9c   :  { %5612 = vst [vmem:[#allocation159_spill] sm:$0xff] %v4228_v63  ;;  %v4253_v63 = vld [vmem:[%s5453_s1 + $0x658] sm:$0xff] }
  0x9d   :  { %5613 = vst [vmem:[#allocation160_spill] sm:$0xff] %v4233_v16  ;;  %v4258_v16 = vld [vmem:[%s5453_s1 + $0x660] sm:$0xff] }
  0x9e   :  { %5614 = vst [vmem:[#allocation161_spill] sm:$0xff] %v4238_v0  ;;  %v4263_v0 = vld [vmem:[%s5453_s1 + $0x668] sm:$0xff] }
  0x9f   :  { %5615 = vst [vmem:[#allocation162_spill] sm:$0xff] %v4243_v58  ;;  %v4268_v58 = vld [vmem:[%s5453_s1 + $0x670] sm:$0xff] }
  0xa0   :  { %5616 = vst [vmem:[#allocation163_spill] sm:$0xff] %v4248_v55  ;;  %v4273_v55 = vld [vmem:[%s5453_s1 + $0x678] sm:$0xff] }
  0xa1   :  { %5617 = vst [vmem:[#allocation164_spill] sm:$0xff] %v4253_v63  ;;  %v4278_v63 = vld [vmem:[%s5453_s1 + $0x680] sm:$0xff] }
  0xa2   :  { %5618 = vst [vmem:[#allocation165_spill] sm:$0xff] %v4258_v16  ;;  %v4283_v16 = vld [vmem:[%s5453_s1 + $0x688] sm:$0xff] }
  0xa3   :  { %5619 = vst [vmem:[#allocation166_spill] sm:$0xff] %v4263_v0  ;;  %v4288_v0 = vld [vmem:[%s5453_s1 + $0x690] sm:$0xff] }
  0xa4   :  { %5620 = vst [vmem:[#allocation167_spill] sm:$0xff] %v4268_v58  ;;  %v4293_v58 = vld [vmem:[%s5453_s1 + $0x698] sm:$0xff] }
  0xa5   :  { %5621 = vst [vmem:[#allocation168_spill] sm:$0xff] %v4273_v55  ;;  %v4298_v55 = vld [vmem:[%s5453_s1 + $0x6a0] sm:$0xff] }
  0xa6   :  { %5622 = vst [vmem:[#allocation169_spill] sm:$0xff] %v4278_v63  ;;  %v4303_v63 = vld [vmem:[%s5453_s1 + $0x6a8] sm:$0xff] }
  0xa7   :  { %5623 = vst [vmem:[#allocation170_spill] sm:$0xff] %v4283_v16  ;;  %v4308_v16 = vld [vmem:[%s5453_s1 + $0x6b0] sm:$0xff] }
  0xa8   :  { %5624 = vst [vmem:[#allocation171_spill] sm:$0xff] %v4288_v0  ;;  %v4313_v0 = vld [vmem:[%s5453_s1 + $0x6b8] sm:$0xff] }
  0xa9   :  { %5625 = vst [vmem:[#allocation172_spill] sm:$0xff] %v4293_v58  ;;  %v4318_v58 = vld [vmem:[%s5453_s1 + $0x6c0] sm:$0xff] }
  0xaa   :  { %5626 = vst [vmem:[#allocation173_spill] sm:$0xff] %v4298_v55  ;;  %v4323_v55 = vld [vmem:[%s5453_s1 + $0x6c8] sm:$0xff] }
  0xab   :  { %5627 = vst [vmem:[#allocation174_spill] sm:$0xff] %v4303_v63  ;;  %v4328_v63 = vld [vmem:[%s5453_s1 + $0x6d0] sm:$0xff] }
  0xac   :  { %5628 = vst [vmem:[#allocation175_spill] sm:$0xff] %v4308_v16  ;;  %v4333_v16 = vld [vmem:[%s5453_s1 + $0x6d8] sm:$0xff] }
  0xad   :  { %5629 = vst [vmem:[#allocation176_spill] sm:$0xff] %v4313_v0  ;;  %v4338_v0 = vld [vmem:[%s5453_s1 + $0x6e0] sm:$0xff] }
  0xae   :  { %5630 = vst [vmem:[#allocation177_spill] sm:$0xff] %v4318_v58  ;;  %v4343_v58 = vld [vmem:[%s5453_s1 + $0x6e8] sm:$0xff] }
  0xaf   :  { %5631 = vst [vmem:[#allocation178_spill] sm:$0xff] %v4323_v55  ;;  %v4348_v55 = vld [vmem:[%s5453_s1 + $0x6f0] sm:$0xff] }
  0xb0   :  { %5632 = vst [vmem:[#allocation179_spill] sm:$0xff] %v4328_v63  ;;  %v4353_v63 = vld [vmem:[%s5453_s1 + $0x6f8] sm:$0xff] }
  0xb1   :  { %5633 = vst [vmem:[#allocation180_spill] sm:$0xff] %v4333_v16  ;;  %v4358_v16 = vld [vmem:[%s5453_s1 + $0x700] sm:$0xff] }
  0xb2   :  { %5634 = vst [vmem:[#allocation181_spill] sm:$0xff] %v4338_v0  ;;  %v4363_v0 = vld [vmem:[%s5453_s1 + $0x708] sm:$0xff] }
  0xb3   :  { %5635 = vst [vmem:[#allocation182_spill] sm:$0xff] %v4343_v58  ;;  %v4368_v58 = vld [vmem:[%s5453_s1 + $0x710] sm:$0xff] }
  0xb4   :  { %5636 = vst [vmem:[#allocation183_spill] sm:$0xff] %v4348_v55  ;;  %v4373_v55 = vld [vmem:[%s5453_s1 + $0x718] sm:$0xff] }
  0xb5   :  { %5637 = vst [vmem:[#allocation184_spill] sm:$0xff] %v4353_v63  ;;  %v4378_v63 = vld [vmem:[%s5453_s1 + $0x720] sm:$0xff] }
  0xb6   :  { %5638 = vst [vmem:[#allocation185_spill] sm:$0xff] %v4358_v16  ;;  %v4383_v16 = vld [vmem:[%s5453_s1 + $0x728] sm:$0xff] }
  0xb7   :  { %5639 = vst [vmem:[#allocation186_spill] sm:$0xff] %v4363_v0  ;;  %v4388_v0 = vld [vmem:[%s5453_s1 + $0x730] sm:$0xff] }
  0xb8   :  { %5640 = vst [vmem:[#allocation187_spill] sm:$0xff] %v4368_v58  ;;  %v4393_v58 = vld [vmem:[%s5453_s1 + $0x738] sm:$0xff] }
  0xb9   :  { %5641 = vst [vmem:[#allocation188_spill] sm:$0xff] %v4373_v55  ;;  %v4398_v55 = vld [vmem:[%s5453_s1 + $0x740] sm:$0xff] }
  0xba   :  { %5642 = vst [vmem:[#allocation189_spill] sm:$0xff] %v4378_v63  ;;  %v4403_v63 = vld [vmem:[%s5453_s1 + $0x748] sm:$0xff] }
  0xbb   :  { %5643 = vst [vmem:[#allocation190_spill] sm:$0xff] %v4383_v16  ;;  %v4408_v16 = vld [vmem:[%s5453_s1 + $0x750] sm:$0xff] }
  0xbc   :  { %5644 = vst [vmem:[#allocation191_spill] sm:$0xff] %v4388_v0  ;;  %v4413_v0 = vld [vmem:[%s5453_s1 + $0x758] sm:$0xff] }
  0xbd   :  { %5645 = vst [vmem:[#allocation192_spill] sm:$0xff] %v4393_v58  ;;  %v4418_v58 = vld [vmem:[%s5453_s1 + $0x760] sm:$0xff] }
  0xbe   :  { %5646 = vst [vmem:[#allocation193_spill] sm:$0xff] %v4398_v55  ;;  %v4423_v55 = vld [vmem:[%s5453_s1 + $0x768] sm:$0xff] }
  0xbf   :  { %5647 = vst [vmem:[#allocation194_spill] sm:$0xff] %v4403_v63  ;;  %v4428_v63 = vld [vmem:[%s5453_s1 + $0x770] sm:$0xff] }
  0xc0   :  { %5648 = vst [vmem:[#allocation195_spill] sm:$0xff] %v4408_v16  ;;  %v4433_v16 = vld [vmem:[%s5453_s1 + $0x778] sm:$0xff] }
  0xc1   :  { %5649 = vst [vmem:[#allocation196_spill] sm:$0xff] %v4413_v0  ;;  %v4438_v0 = vld [vmem:[%s5453_s1 + $0x780] sm:$0xff] }
  0xc2   :  { %5650 = vst [vmem:[#allocation197_spill] sm:$0xff] %v4418_v58  ;;  %v4443_v58 = vld [vmem:[%s5453_s1 + $0x788] sm:$0xff] }
  0xc3   :  { %5651 = vst [vmem:[#allocation198_spill] sm:$0xff] %v4423_v55  ;;  %v4448_v55 = vld [vmem:[%s5453_s1 + $0x790] sm:$0xff] }
  0xc4   :  { %5652 = vst [vmem:[#allocation199_spill] sm:$0xff] %v4428_v63  ;;  %v4453_v63 = vld [vmem:[%s5453_s1 + $0x798] sm:$0xff] }
  0xc5   :  { %5653 = vst [vmem:[#allocation200_spill] sm:$0xff] %v4433_v16  ;;  %v4458_v16 = vld [vmem:[%s5453_s1 + $0x7a0] sm:$0xff] }
  0xc6   :  { %5654 = vst [vmem:[#allocation201_spill] sm:$0xff] %v4438_v0  ;;  %v4463_v0 = vld [vmem:[%s5453_s1 + $0x7a8] sm:$0xff] }
  0xc7   :  { %5655 = vst [vmem:[#allocation202_spill] sm:$0xff] %v4443_v58  ;;  %v4468_v58 = vld [vmem:[%s5453_s1 + $0x7b0] sm:$0xff] }
  0xc8   :  { %5656 = vst [vmem:[#allocation203_spill] sm:$0xff] %v4448_v55  ;;  %v4473_v55 = vld [vmem:[%s5453_s1 + $0x7b8] sm:$0xff] }
  0xc9   :  { %5657 = vst [vmem:[#allocation204_spill] sm:$0xff] %v4453_v63  ;;  %v4478_v63 = vld [vmem:[%s5453_s1 + $0x7c0] sm:$0xff] }
  0xca   :  { %5658 = vst [vmem:[#allocation205_spill] sm:$0xff] %v4458_v16  ;;  %v4483_v16 = vld [vmem:[%s5453_s1 + $0x7c8] sm:$0xff] }
  0xcb   :  { %5659 = vst [vmem:[#allocation206_spill] sm:$0xff] %v4463_v0  ;;  %v4488_v0 = vld [vmem:[%s5453_s1 + $0x7d0] sm:$0xff] }
  0xcc   :  { %5660 = vst [vmem:[#allocation207_spill] sm:$0xff] %v4468_v58  ;;  %v4493_v58 = vld [vmem:[%s5453_s1 + $0x7d8] sm:$0xff] }
  0xcd   :  { %5661 = vst [vmem:[#allocation208_spill] sm:$0xff] %v4473_v55  ;;  %v4498_v55 = vld [vmem:[%s5453_s1 + $0x7e0] sm:$0xff] }
  0xce   :  { %5662 = vst [vmem:[#allocation209_spill] sm:$0xff] %v4478_v63  ;;  %v4503_v63 = vld [vmem:[%s5453_s1 + $0x7e8] sm:$0xff] }
  0xcf   :  { %5663 = vst [vmem:[#allocation210_spill] sm:$0xff] %v4483_v16  ;;  %v4508_v16 = vld [vmem:[%s5453_s1 + $0x7f0] sm:$0xff] }
  0xd0   :  { %5664 = vst [vmem:[#allocation211_spill] sm:$0xff] %v4488_v0  ;;  %v4513_v0 = vld [vmem:[%s5453_s1 + $0x7f8] sm:$0xff] }
  0xd1   :  { %5665 = vst [vmem:[#allocation212_spill] sm:$0xff] %v4493_v58 }
  0xd2   :  { %5666 = vst [vmem:[#allocation213_spill] sm:$0xff] %v4498_v55 }
  0xd3   :  { %5667 = vst [vmem:[#allocation214_spill] sm:$0xff] %v4503_v63 }
  0xd4   :  { %5668 = vst [vmem:[#allocation215_spill] sm:$0xff] %v4508_v16 }
  0xd5   :  { %5669 = vst [vmem:[#allocation216_spill] sm:$0xff] %v4513_v0 }
  0xd6   :  { %567 = vsyncadd [#allocation3], 32768  ;;  %v580_v58 = vld [vmem:[%s5456_s4 + $0x18] sm:$0xff]  ;;  %v579_v55 = vld [vmem:[%s5456_s4 + $0x10] sm:$0xff]  ;;  %vm584_vm0 = vcmask 261120   ;;  %929 = vmatpush.msra.mxu1 %v3313_v15 }
  0xd7   :  { %621 = vmatpush.msra.mxu2 %v580_v58  ;;  %2895 = vmatpush.msra.mxu3 %v580_v58  ;;  %v578_v63 = vld [vmem:[%s5456_s4 + $0x8] sm:$0xff]  ;;  %v577_v16 = vld [vmem:[%s5456_s4] sm:$0xff] }
  0xd8   :  { %v569_v0 = vld [vmem:[%s5455_s3] sm:$0xff] }
  0xd9   :  { %622 = vmatpush.msra.mxu2 %v579_v55  ;;  %2896 = vmatpush.msra.mxu3 %v579_v55  ;;  %v573_v58 = vld [vmem:[%s5455_s3 + $0x20] sm:$0xff]  ;;  %v570_v55 = vld [vmem:[%s5455_s3 + $0x8] sm:$0xff] }
  0xdb   :  { %623 = vmatpush.msra.mxu2 %v578_v63  ;;  %2897 = vmatpush.msra.mxu3 %v578_v63  ;;  %v574_v63 = vld [vmem:[%s5455_s3 + $0x28] sm:$0xff] }
  0xdd   :  { %624 = vmatpush.msra.mxu2 %v577_v16  ;;  %2898 = vmatpush.msra.mxu3 %v577_v16  ;;  %v571_v16 = vld [vmem:[%s5455_s3 + $0x10] sm:$0xff] }
  0xde   :  { %2841 = vmatmul.msk.f32.vlgmr.msra.gmra.mxu2 %vm584_vm0, %v569_v0  ;;  %2845 = vmatmul.msk.f32.vlgmr.msra.gmra.mxu3 %vm584_vm0, %v573_v58  ;;  %v575_v0 = vld [vmem:[%s5455_s3 + $0x30] sm:$0xff]  ;;  %v572_v58 = vld [vmem:[%s5455_s3 + $0x18] sm:$0xff] }
  0xdf   :  { %949 = vmatpush.msrb.mxu2 %v3393_v31 }
  0xe6   :  { %2842 = vmatmul.msk.f32.gmra.mxu2 %vm584_vm0, %v570_v55  ;;  %2846 = vmatmul.msk.f32.gmra.mxu3 %vm584_vm0, %v574_v63  ;;  %v576_v55 = vld [vmem:[%s5455_s3 + $0x38] sm:$0xff]  ;;  %v4562_v63 = vld [vmem:[%s5458_s6] ss:$0 sm:$0xff] }
  0xee   :  { %2843 = vmatmul.msk.f32.gmra.mxu2 %vm584_vm0, %v571_v16  ;;  %2847 = vmatmul.msk.f32.gmra.mxu3 %vm584_vm0, %v575_v0 }
  0xf6   :  { %2844 = vmatmul.msk.f32.gmra.mxu2 %vm584_vm0, %v572_v58  ;;  %2848 = vmatmul.msk.f32.gmra.mxu3 %vm584_vm0, %v576_v55 }
 0x161   :  { %v626_v16 = vpop.f32.mrf.mxu2  ;;  %v638_v33 = vpop.f32.mrf.mxu3 }
 0x162   :  { %v4565_v0 = vadd.f32 %v4562_v63, %v626_v16  ;;  %v4568_v17 = vadd.f32 %v4562_v63, %v638_v33 }
 0x164   :  { %5670 = vst [vmem:[#allocation217_spill] sm:$0xff] %v4565_v0 }
 0x165   :  { %5671 = vst [vmem:[#allocation218_spill] sm:$0xff] %v4568_v17 }
 0x169   :  { %v629_v1 = vpop.f32.mrf.mxu2  ;;  %v641_v52 = vpop.f32.mrf.mxu3 }
 0x16a   :  { %v4571_v34 = vadd.f32 %v4562_v63, %v629_v1  ;;  %v4574_v58 = vadd.f32 %v4562_v63, %v641_v52 }
 0x171   :  { %v632_v55 = vpop.f32.mrf.mxu2  ;;  %v644_v18 = vpop.f32.mrf.mxu3 }
 0x172   :  { %v4577_v2 = vadd.f32 %v4562_v63, %v632_v55  ;;  %v4580_v53 = vadd.f32 %v4562_v63, %v644_v18 }
 0x179   :  { %v635_v16 = vpop.f32.mrf.mxu2  ;;  %v647_v0 = vpop.f32.mrf.mxu3 }
 0x17a   :  { %v4583_v33 = vadd.f32 %v4562_v63, %v635_v16  ;;  %v4586_v17 = vadd.f32 %v4562_v63, %v647_v0 }
 0x17b   :  { %3157 = dma.done.wait [#allocation3], 32768 }
 0x17c   :  { %3158 = vsyncadd [#allocation3], 4294934528  ;;  %969 = vmatpush.msrb.mxu3 %v3473_v47  ;;  %1049 = vmatpush.msra.mxu0 %v3793_v32  ;;  %v5672_v1 = vld [vmem:[#allocation72_spill] sm:$0xff]  ;;  %v653_v18 = vld [vmem:[%s5452_s0] sm:$0xff]  ;;  %vm1358_vm5 = vcmask 523264   ;;  %s2801_s26 = sshll.u32 %s5463_s11, 4  ;;  %s2802_s26 = int_to_ptr.hbm [resolvable:$true] %s2801_s26 }
 0x17d   :  { %930 = vmatpush.msra.mxu1 %v3308_v14  ;;  %950 = vmatpush.msrb.mxu2 %v3388_v30  ;;  %v5683_v14 = vld [vmem:[#allocation36_spill] sm:$0xff]  ;;  %v5710_v47 = vld [vmem:[#allocation62_spill] sm:$0xff]  ;;  %v5724_v55 = vld [vmem:[#allocation25_spill] sm:$0xff]  ;;  %s3167_s27 = smov 128   ;;  %s3168_s28 = smov 8  }
 0x17e   :  { %970 = vmatpush.msrb.mxu3 %v3468_v46  ;;  %1050 = vmatpush.msra.mxu0 %v3788_v62  ;;  %v5684_v15 = vld [vmem:[#allocation52_spill] sm:$0xff]  ;;  %v5709_v46 = vld [vmem:[#allocation45_spill] sm:$0xff]  ;;  %v5722_v62 = vld [vmem:[#allocation59_spill] sm:$0xff]  ;;  %s3169_s11 = smov [#allocation6]   ;;  %s2814_s14 = sshll.u32 %s5464_s12, 4  ;;  %s2815_s14 = int_to_ptr.hbm [resolvable:$true] %s2814_s14 }
 0x17f   :  { %931 = vmatpush.msra.mxu1 %v3303_v13  ;;  %951 = vmatpush.msrb.mxu2 %v3383_v29  ;;  %v5682_v13 = vld [vmem:[#allocation15_spill] sm:$0xff]  ;;  %v5695_v29 = vld [vmem:[#allocation66_spill] sm:$0xff]  ;;  %v5696_v30 = vld [vmem:[#allocation136_spill] sm:$0xff]  ;;  %s2812_s29 = sshll.u32 %s3169_s11, 4  ;;  %s2813_s29 = int_to_ptr.vmem [resolvable:$true] %s2812_s29 }
 0x180   :  { %971 = vmatpush.msrb.mxu3 %v3463_v45  ;;  %1051 = vmatpush.msra.mxu0 %v3783_v50  ;;  %v5697_v31 = vld [vmem:[#allocation32_spill] sm:$0xff]  ;;  %v5708_v45 = vld [vmem:[#allocation29_spill] sm:$0xff]  ;;  %v5723_v0 = vld [vmem:[#allocation130_spill] sm:$0xff] }
 0x181   :  { %932 = vmatpush.msra.mxu1 %v3298_v12  ;;  %952 = vmatpush.msrb.mxu2 %v3378_v28  ;;  %v5681_v12 = vld [vmem:[#allocation12_spill] sm:$0xff]  ;;  %v5694_v28 = vld [vmem:[#allocation49_spill] sm:$0xff] }
 0x182   :  { %972 = vmatpush.msrb.mxu3 %v3458_v44  ;;  %1052 = vmatpush.msra.mxu0 %v3778_v51  ;;  %v5698_v32 = vld [vmem:[#allocation48_spill] sm:$0xff]  ;;  %v5707_v44 = vld [vmem:[#allocation63_spill] sm:$0xff]  ;;  %v5714_v51 = vld [vmem:[#allocation61_spill] sm:$0xff] }
 0x183   :  { %933 = vmatpush.msra.mxu1 %v3293_v11  ;;  %953 = vmatpush.msrb.mxu2 %v3373_v27  ;;  %v5680_v11 = vld [vmem:[#allocation70_spill] sm:$0xff]  ;;  %v5693_v27 = vld [vmem:[#allocation33_spill] sm:$0xff]  ;;  %v5713_v50 = vld [vmem:[#allocation44_spill] sm:$0xff] }
 0x184   :  { %973 = vmatpush.msrb.mxu3 %v3453_v43  ;;  %1053 = vmatpush.msra.mxu0 %v3773_v61  ;;  %v5706_v43 = vld [vmem:[#allocation46_spill] sm:$0xff]  ;;  %v5715_v52 = vld [vmem:[#allocation132_spill] sm:$0xff]  ;;  %v5725_v16 = vld [vmem:[#allocation41_spill] sm:$0xff] }
 0x185   :  { %934 = vmatpush.msra.mxu1 %v3288_v10  ;;  %954 = vmatpush.msrb.mxu2 %v3368_v26  ;;  %v5679_v10 = vld [vmem:[#allocation19_spill] sm:$0xff]  ;;  %v5692_v26 = vld [vmem:[#allocation69_spill] sm:$0xff]  ;;  %v5721_v61 = vld [vmem:[#allocation42_spill] sm:$0xff] }
 0x186   :  { %974 = vmatpush.msrb.mxu3 %v3448_v42  ;;  %1054 = vmatpush.msra.mxu0 %v3768_v54  ;;  %v5705_v42 = vld [vmem:[#allocation30_spill] sm:$0xff]  ;;  %v5716_v54 = vld [vmem:[#allocation27_spill] sm:$0xff] }
 0x187   :  { %935 = vmatpush.msra.mxu1 %v3283_v9  ;;  %955 = vmatpush.msrb.mxu2 %v3363_v25  ;;  %v5678_v9 = vld [vmem:[#allocation16_spill] sm:$0xff]  ;;  %v5691_v25 = vld [vmem:[#allocation67_spill] sm:$0xff] }
 0x188   :  { %975 = vmatpush.msrb.mxu3 %v3443_v41  ;;  %1055 = vmatpush.msra.mxu0 %v3763_v48  ;;  %v5704_v41 = vld [vmem:[#allocation134_spill] sm:$0xff]  ;;  %v5711_v48 = vld [vmem:[#allocation133_spill] sm:$0xff] }
 0x189   :  { %936 = vmatpush.msra.mxu1 %v3278_v8  ;;  %956 = vmatpush.msrb.mxu2 %v3358_v24  ;;  %v5677_v8 = vld [vmem:[#allocation13_spill] sm:$0xff]  ;;  %v5690_v24 = vld [vmem:[#allocation50_spill] sm:$0xff] }
 0x18a   :  { %976 = vmatpush.msrb.mxu3 %v3438_v40  ;;  %1056 = vmatpush.msra.mxu0 %v3758_v56  ;;  %v659_v40 = vld [vmem:[%s5452_s0 + $0x30] sm:$0xff]  ;;  %v5717_v56 = vld [vmem:[#allocation43_spill] sm:$0xff] }
 0x18b   :  { %937 = vmatpush.msra.mxu1 %v3273_v7  ;;  %957 = vmatpush.msrb.mxu2 %v3353_v23  ;;  %v5675_v7 = vld [vmem:[#allocation20_spill] sm:$0xff]  ;;  %v5689_v23 = vld [vmem:[#allocation34_spill] sm:$0xff] }
 0x18c   :  { %977 = vmatpush.msrb.mxu3 %v3433_v39  ;;  %1057 = vmatpush.msra.mxu0 %v3753_v60  ;;  %v5703_v39 = vld [vmem:[#allocation64_spill] sm:$0xff]  ;;  %v5720_v60 = vld [vmem:[#allocation26_spill] sm:$0xff] }
 0x18d   :  { %938 = vmatpush.msra.mxu1 %v3268_v6  ;;  %958 = vmatpush.msrb.mxu2 %v3348_v22  ;;  %v5674_v6 = vld [vmem:[#allocation17_spill] sm:$0xff]  ;;  %v5688_v22 = vld [vmem:[#allocation68_spill] sm:$0xff] }
 0x18e   :  { %978 = vmatpush.msrb.mxu3 %v3428_v38  ;;  %1058 = vmatpush.msra.mxu0 %v3748_v49  ;;  %v5702_v38 = vld [vmem:[#allocation47_spill] sm:$0xff]  ;;  %v5712_v49 = vld [vmem:[#allocation28_spill] sm:$0xff] }
 0x18f   :  { %939 = vmatpush.msra.mxu1 %v3263_v5  ;;  %959 = vmatpush.msrb.mxu2 %v3343_v21  ;;  %v5673_v5 = vld [vmem:[#allocation14_spill] sm:$0xff]  ;;  %v5687_v21 = vld [vmem:[#allocation51_spill] sm:$0xff] }
 0x190   :  { %979 = vmatpush.msrb.mxu3 %v3423_v37  ;;  %1059 = vmatpush.msra.mxu0 %v3743_v57  ;;  %v5701_v37 = vld [vmem:[#allocation31_spill] sm:$0xff]  ;;  %v5718_v57 = vld [vmem:[#allocation60_spill] sm:$0xff] }
 0x191   :  { %940 = vmatpush.msra.mxu1 %v3258_v4  ;;  %960 = vmatpush.msrb.mxu2 %v3338_v20  ;;  %v5676_v4 = vld [vmem:[#allocation71_spill] sm:$0xff] }
 0x192   :  { %980 = vmatpush.msrb.mxu3 %v3418_v36  ;;  %1060 = vmatpush.msra.mxu0 %v3738_v59  ;;  %v5686_v20 = vld [vmem:[#allocation35_spill] sm:$0xff] }
 0x193   :  { %941 = vmatpush.msra.mxu1 %v3253_v3  ;;  %961 = vmatpush.msrb.mxu2 %v3333_v19  ;;  %v654_v3 = vld [vmem:[%s5452_s0 + $0x8] sm:$0xff]  ;;  %v5685_v19 = vld [vmem:[#allocation18_spill] sm:$0xff] }
 0x194   :  { %981 = vmatpush.msrb.mxu3 %v3413_v35  ;;  %1061 = vmatpush.msra.mxu0 %v5672_v1  ;;  %v5699_v35 = vld [vmem:[#allocation65_spill] sm:$0xff]  ;;  %v5700_v36 = vld [vmem:[#allocation135_spill] sm:$0xff]  ;;  %v5726_v1 = vld [vmem:[#allocation58_spill] sm:$0xff] }
 0x195   :  { %942 = vmatpush.msra.mxu1 %v5673_v5  ;;  %962 = vmatpush.msrb.mxu2 %v5674_v6  ;;  %v5719_v59 = vld [vmem:[#allocation131_spill] sm:$0xff]  ;;  %v5727_v5 = vld [vmem:[#allocation129_spill] sm:$0xff]  ;;  %v5728_v6 = vld [vmem:[#allocation24_spill] sm:$0xff] }
 0x196   :  { %982 = vmatpush.msrb.mxu3 %v5675_v7  ;;  %1062 = vmatpush.msra.mxu0 %v5676_v4  ;;  %v5729_v7 = vld [vmem:[#allocation40_spill] sm:$0xff]  ;;  %v5730_v4 = vld [vmem:[#allocation57_spill] sm:$0xff] }
 0x197   :  { %943 = vmatpush.msra.mxu1 %v5677_v8  ;;  %963 = vmatpush.msrb.mxu2 %v5678_v9  ;;  %v655_v8 = vld [vmem:[%s5452_s0 + $0x10] sm:$0xff] }
 0x198   :  { %983 = vmatpush.msrb.mxu3 %v5679_v10  ;;  %1063 = vmatpush.msra.mxu0 %v5680_v11  ;;  %v5731_v9 = vld [vmem:[#allocation128_spill] sm:$0xff]  ;;  %v5732_v10 = vld [vmem:[#allocation23_spill] sm:$0xff] }
 0x199   :  { %944 = vmatpush.msra.mxu1 %v5681_v12  ;;  %964 = vmatpush.msrb.mxu2 %v5682_v13  ;;  %v5734_v11 = vld [vmem:[#allocation56_spill] sm:$0xff]  ;;  %v5735_v12 = vld [vmem:[#allocation127_spill] sm:$0xff]  ;;  %v5736_v13 = vld [vmem:[#allocation22_spill] sm:$0xff] }
 0x19a   :  { %984 = vmatpush.msrb.mxu3 %v5685_v19  ;;  %965 = vmatmul.f32.vlgmr.msrb.gmra.mxu2 %v654_v3  ;;  %v5733_v3 = vld [vmem:[#allocation39_spill] sm:$0xff]  ;;  %v657_v19 = vld [vmem:[%s5452_s0 + $0x20] sm:$0xff] }
 0x19b   :  { %989 = vmatpush.msrb.mxu1 %v5683_v14  ;;  %1009 = vmatpush.msra.mxu2 %v5684_v15  ;;  %v5737_v14 = vld [vmem:[#allocation38_spill] sm:$0xff]  ;;  %v5738_v15 = vld [vmem:[#allocation55_spill] sm:$0xff] }
 0x19c   :  { %1029 = vmatpush.msra.mxu3 %v5688_v22  ;;  %945 = vmatmul.f32.vlgmr.msra.gmra.mxu1 %v653_v18  ;;  %v5739_v18 = vld [vmem:[#allocation21_spill] sm:$0xff]  ;;  %v5742_v22 = vld [vmem:[#allocation54_spill] sm:$0xff] }
 0x19d   :  { %990 = vmatpush.msrb.mxu1 %v5686_v20  ;;  %1010 = vmatpush.msra.mxu2 %v5687_v21  ;;  %v5740_v20 = vld [vmem:[#allocation126_spill] sm:$0xff]  ;;  %v5741_v21 = vld [vmem:[#allocation37_spill] sm:$0xff] }
 0x19e   :  { %1030 = vmatpush.msra.mxu3 %v5691_v25  ;;  %1064 = vmatpush.msra.mxu0 %v5692_v26  ;;  %v656_v25 = vld [vmem:[%s5452_s0 + $0x18] sm:$0xff] }
 0x19f   :  { %991 = vmatpush.msrb.mxu1 %v5689_v23  ;;  %1011 = vmatpush.msra.mxu2 %v5690_v24  ;;  %v5743_v23 = vld [vmem:[#allocation88_spill] sm:$0xff]  ;;  %v5745_v26 = vld [vmem:[#allocation53_spill] sm:$0xff] }
 0x1a0   :  { %1031 = vmatpush.msra.mxu3 %v5695_v29  ;;  %1129 = vmatpush.msrb.mxu0 %v5696_v30  ;;  %v5744_v24 = vld [vmem:[#allocation104_spill] sm:$0xff]  ;;  %v5747_v29 = vld [vmem:[#allocation103_spill] sm:$0xff] }
 0x1a1   :  { %992 = vmatpush.msrb.mxu1 %v5693_v27  ;;  %1012 = vmatpush.msra.mxu2 %v5694_v28  ;;  %v658_v27 = vld [vmem:[%s5452_s0 + $0x28] sm:$0xff]  ;;  %v5748_v30 = vld [vmem:[#allocation120_spill] sm:$0xff] }
 0x1a2   :  { %1032 = vmatpush.msra.mxu3 %v5699_v35  ;;  %1130 = vmatpush.msrb.mxu0 %v5700_v36  ;;  %v5746_v28 = vld [vmem:[#allocation87_spill] sm:$0xff]  ;;  %v5752_v36 = vld [vmem:[#allocation85_spill] sm:$0xff] }
 0x1a3   :  { %993 = vmatpush.msrb.mxu1 %v5697_v31  ;;  %1013 = vmatpush.msra.mxu2 %v5698_v32  ;;  %v5749_v31 = vld [vmem:[#allocation86_spill] sm:$0xff]  ;;  %v5751_v35 = vld [vmem:[#allocation119_spill] sm:$0xff] }
 0x1a4   :  { %1033 = vmatpush.msra.mxu3 %v5703_v39  ;;  %1131 = vmatpush.msrb.mxu0 %v5704_v41  ;;  %v5750_v32 = vld [vmem:[#allocation102_spill] sm:$0xff]  ;;  %v5757_v41 = vld [vmem:[#allocation124_spill] sm:$0xff] }
 0x1a5   :  { %994 = vmatpush.msrb.mxu1 %v5701_v37  ;;  %1014 = vmatpush.msra.mxu2 %v5702_v38  ;;  %v5753_v37 = vld [vmem:[#allocation125_spill] sm:$0xff]  ;;  %v5755_v39 = vld [vmem:[#allocation118_spill] sm:$0xff] }
 0x1a6   :  { %1034 = vmatpush.msra.mxu3 %v5707_v44  ;;  %1065 = vmatmul.f32.vlgmr.msra.gmra.mxu0 %v659_v40  ;;  %v5754_v38 = vld [vmem:[#allocation101_spill] sm:$0xff]  ;;  %v5756_v40 = vld [vmem:[#allocation84_spill] sm:$0xff]  ;;  %v5760_v44 = vld [vmem:[#allocation83_spill] sm:$0xff] }
 0x1a7   :  { %995 = vmatpush.msrb.mxu1 %v5705_v42  ;;  %1015 = vmatpush.msra.mxu2 %v5706_v43  ;;  %v5758_v42 = vld [vmem:[#allocation100_spill] sm:$0xff]  ;;  %v5759_v43 = vld [vmem:[#allocation117_spill] sm:$0xff] }
 0x1a8   :  { %1035 = vmatpush.msra.mxu3 %v5710_v47  ;;  %1132 = vmatpush.msrb.mxu0 %v5711_v48  ;;  %v5763_v47 = vld [vmem:[#allocation116_spill] sm:$0xff]  ;;  %v5764_v48 = vld [vmem:[#allocation82_spill] sm:$0xff] }
 0x1a9   :  { %996 = vmatpush.msrb.mxu1 %v5708_v45  ;;  %1016 = vmatpush.msra.mxu2 %v5709_v46  ;;  %v5761_v45 = vld [vmem:[#allocation123_spill] sm:$0xff] }
 0x1aa   :  { %1036 = vmatpush.msra.mxu3 %v5714_v51  ;;  %1133 = vmatpush.msrb.mxu0 %v5715_v52  ;;  %v5762_v46 = vld [vmem:[#allocation99_spill] sm:$0xff]  ;;  %v663_v52 = vld [vmem:[%s5452_s0 + $0x50] sm:$0xff] }
 0x1ab   :  { %997 = vmatpush.msrb.mxu1 %v5712_v49  ;;  %1017 = vmatpush.msra.mxu2 %v5713_v50  ;;  %v5765_v49 = vld [vmem:[#allocation122_spill] sm:$0xff]  ;;  %v5767_v51 = vld [vmem:[#allocation115_spill] sm:$0xff] }
 0x1ac   :  { %1037 = vmatpush.msra.mxu3 %v5718_v57  ;;  %1134 = vmatpush.msrb.mxu0 %v5719_v59  ;;  %v5766_v50 = vld [vmem:[#allocation98_spill] sm:$0xff]  ;;  %v5770_v57 = vld [vmem:[#allocation97_spill] sm:$0xff] }
 0x1ad   :  { %998 = vmatpush.msrb.mxu1 %v5716_v54  ;;  %1018 = vmatpush.msra.mxu2 %v5717_v56  ;;  %v5768_v54 = vld [vmem:[#allocation81_spill] sm:$0xff]  ;;  %v5771_v59 = vld [vmem:[#allocation114_spill] sm:$0xff] }
 0x1ae   :  { %1038 = vmatpush.msra.mxu3 %v5722_v62  ;;  %1135 = vmatpush.msrb.mxu0 %v5723_v0  ;;  %v5769_v56 = vld [vmem:[#allocation121_spill] sm:$0xff]  ;;  %v5775_v0 = vld [vmem:[#allocation79_spill] sm:$0xff] }
 0x1af   :  { %999 = vmatpush.msrb.mxu1 %v5720_v60  ;;  %1019 = vmatpush.msra.mxu2 %v5721_v61  ;;  %v5772_v60 = vld [vmem:[#allocation80_spill] sm:$0xff]  ;;  %v5774_v62 = vld [vmem:[#allocation113_spill] sm:$0xff] }
 0x1b0   :  { %1039 = vmatpush.msra.mxu3 %v5726_v1  ;;  %1136 = vmatpush.msrb.mxu0 %v5727_v5  ;;  %v5773_v61 = vld [vmem:[#allocation96_spill] sm:$0xff]  ;;  %v5779_v5 = vld [vmem:[#allocation78_spill] sm:$0xff] }
 0x1b1   :  { %1000 = vmatpush.msrb.mxu1 %v5724_v55  ;;  %1020 = vmatpush.msra.mxu2 %v5725_v16  ;;  %v5776_v55 = vld [vmem:[#allocation200_spill] sm:$0xff]  ;;  %v5777_v16 = vld [vmem:[#allocation95_spill] sm:$0xff] }
 0x1b2   :  { %1040 = vmatpush.msra.mxu3 %v5730_v4  ;;  %1137 = vmatpush.msrb.mxu0 %v5731_v9  ;;  %v5778_v1 = vld [vmem:[#allocation112_spill] sm:$0xff]  ;;  %v5782_v4 = vld [vmem:[#allocation111_spill] sm:$0xff]  ;;  %v5784_v9 = vld [vmem:[#allocation198_spill] sm:$0xff] }
 0x1b3   :  { %1001 = vmatpush.msrb.mxu1 %v5728_v6  ;;  %1021 = vmatpush.msra.mxu2 %v5729_v7  ;;  %v5780_v6 = vld [vmem:[#allocation199_spill] sm:$0xff]  ;;  %v5781_v7 = vld [vmem:[#allocation94_spill] sm:$0xff] }
 0x1b4   :  { %1041 = vmatpush.msra.mxu3 %v5734_v11  ;;  %1138 = vmatpush.msrb.mxu0 %v5735_v12  ;;  %v5787_v11 = vld [vmem:[#allocation76_spill] sm:$0xff]  ;;  %v5788_v12 = vld [vmem:[#allocation197_spill] sm:$0xff] }
 0x1b5   :  { %1002 = vmatpush.msrb.mxu1 %v5732_v10  ;;  %1022 = vmatpush.msra.mxu2 %v5733_v3  ;;  %v5785_v10 = vld [vmem:[#allocation93_spill] sm:$0xff]  ;;  %v5786_v3 = vld [vmem:[#allocation110_spill] sm:$0xff] }
 0x1b6   :  { %985 = vmatmul.f32.vlgmr.msrb.gmra.mxu3 %v655_v8  ;;  %1139 = vmatpush.msrb.mxu0 %v5740_v20  ;;  %v5783_v8 = vld [vmem:[#allocation77_spill] sm:$0xff]  ;;  %v5794_v20 = vld [vmem:[#allocation108_spill] sm:$0xff] }
 0x1b7   :  { %1003 = vmatpush.msrb.mxu1 %v5736_v13  ;;  %1023 = vmatpush.msra.mxu2 %v5737_v14  ;;  %v5789_v13 = vld [vmem:[#allocation92_spill] sm:$0xff]  ;;  %v5790_v14 = vld [vmem:[#allocation109_spill] sm:$0xff] }
 0x1b8   :  { %1042 = vmatpush.msra.mxu3 %v5738_v15  ;;  %1140 = vmatpush.msrb.mxu0 %v5753_v37  ;;  %v5791_v15 = vld [vmem:[#allocation75_spill] sm:$0xff]  ;;  %v5806_v37 = vld [vmem:[#allocation193_spill] sm:$0xff] }
 0x1b9   :  { %1004 = vmatpush.msrb.mxu1 %v5739_v18  ;;  %1024 = vmatpush.msra.mxu2 %v5741_v21  ;;  %v5792_v18 = vld [vmem:[#allocation196_spill] sm:$0xff]  ;;  %v5795_v21 = vld [vmem:[#allocation74_spill] sm:$0xff] }
 0x1ba   :  { %1043 = vmatpush.msra.mxu3 %v5742_v22  ;;  %1025 = vmatmul.f32.vlgmr.msra.gmra.mxu2 %v657_v19  ;;  %v5793_v19 = vld [vmem:[#allocation91_spill] sm:$0xff] }
 0x1bb   :  { %1069 = vmatpush.msra.mxu1 %v5743_v23  ;;  %1089 = vmatpush.msrb.mxu2 %v5744_v24  ;;  %v5796_v22 = vld [vmem:[#allocation195_spill] sm:$0xff]  ;;  %v5797_v23 = vld [vmem:[#allocation90_spill] sm:$0xff] }
 0x1bc   :  { %1044 = vmatpush.msra.mxu3 %v5745_v26  ;;  %1005 = vmatmul.f32.vlgmr.msrb.gmra.mxu1 %v656_v25  ;;  %v5798_v24 = vld [vmem:[#allocation107_spill] sm:$0xff]  ;;  %v660_v25 = vld [vmem:[%s5452_s0 + $0x38] sm:$0xff]  ;;  %v661_v26 = vld [vmem:[%s5452_s0 + $0x40] sm:$0xff] }
 0x1bd   :  { %1070 = vmatpush.msra.mxu1 %v5746_v28  ;;  %1090 = vmatpush.msrb.mxu2 %v5747_v29  ;;  %v5800_v28 = vld [vmem:[#allocation194_spill] sm:$0xff]  ;;  %v5801_v29 = vld [vmem:[#allocation89_spill] sm:$0xff] }
 0x1be   :  { %1109 = vmatpush.msrb.mxu3 %v5748_v30  ;;  %1141 = vmatpush.msrb.mxu0 %v5757_v41  ;;  %v5802_v30 = vld [vmem:[#allocation106_spill] sm:$0xff] }
 0x1bf   :  { %1045 = vmatmul.f32.vlgmr.msra.gmra.mxu3 %v658_v27  ;;  %1071 = vmatpush.msra.mxu1 %v5749_v31  ;;  %v5799_v27 = vld [vmem:[#allocation73_spill] sm:$0xff]  ;;  %v662_v31 = vld [vmem:[%s5452_s0 + $0x48] sm:$0xff]  ;;  %v5810_v41 = vld [vmem:[#allocation150_spill] sm:$0xff] }
 0x1c0   :  { %1091 = vmatpush.msrb.mxu2 %v5750_v32  ;;  %1110 = vmatpush.msrb.mxu3 %v5751_v35  ;;  %v5803_v32 = vld [vmem:[#allocation152_spill] sm:$0xff] }
 0x1c1   :  { %1072 = vmatpush.msra.mxu1 %v5752_v36  ;;  %1142 = vmatpush.msrb.mxu0 %v5761_v45  ;;  %v5804_v35 = vld [vmem:[#allocation168_spill] sm:$0xff]  ;;  %v5805_v36 = vld [vmem:[#allocation105_spill] sm:$0xff] }
 0x1c2   :  { %1092 = vmatpush.msrb.mxu2 %v5754_v38  ;;  %1111 = vmatpush.msrb.mxu3 %v5755_v39  ;;  %v5807_v38 = vld [vmem:[#allocation151_spill] sm:$0xff]  ;;  %v5814_v45 = vld [vmem:[#allocation149_spill] sm:$0xff] }
 0x1c3   :  { %1073 = vmatpush.msra.mxu1 %v5756_v40  ;;  %1143 = vmatpush.msrb.mxu0 %v5765_v49  ;;  %v5808_v39 = vld [vmem:[#allocation167_spill] sm:$0xff]  ;;  %v5809_v40 = vld [vmem:[#allocation184_spill] sm:$0xff] }
 0x1c4   :  { %1093 = vmatpush.msrb.mxu2 %v5758_v42  ;;  %1112 = vmatpush.msrb.mxu3 %v5759_v43  ;;  %v5811_v42 = vld [vmem:[#allocation192_spill] sm:$0xff]  ;;  %v5812_v43 = vld [vmem:[#allocation166_spill] sm:$0xff] }
 0x1c5   :  { %1074 = vmatpush.msra.mxu1 %v5760_v44  ;;  %1144 = vmatpush.msrb.mxu0 %v5769_v56  ;;  %v5813_v44 = vld [vmem:[#allocation183_spill] sm:$0xff]  ;;  %v5818_v49 = vld [vmem:[#allocation148_spill] sm:$0xff]  ;;  %v5823_v56 = vld [vmem:[#allocation189_spill] sm:$0xff] }
 0x1c6   :  { %1094 = vmatpush.msrb.mxu2 %v5762_v46  ;;  %1113 = vmatpush.msrb.mxu3 %v5763_v47  ;;  %v5815_v46 = vld [vmem:[#allocation191_spill] sm:$0xff]  ;;  %v5816_v47 = vld [vmem:[#allocation165_spill] sm:$0xff] }
 0x1c7   :  { %1075 = vmatpush.msra.mxu1 %v5764_v48  ;;  %1145 = vmatmul.f32.vlgmr.msrb.gmra.mxu0 %v663_v52  ;;  %v5817_v48 = vld [vmem:[#allocation182_spill] sm:$0xff]  ;;  %v5821_v52 = vld [vmem:[#allocation181_spill] sm:$0xff] }
 0x1c8   :  { %1095 = vmatpush.msrb.mxu2 %v5766_v50  ;;  %1114 = vmatpush.msrb.mxu3 %v5767_v51  ;;  %v5819_v50 = vld [vmem:[#allocation190_spill] sm:$0xff]  ;;  %v5820_v51 = vld [vmem:[#allocation164_spill] sm:$0xff] }
 0x1c9   :  { %1076 = vmatpush.msra.mxu1 %v5768_v54  ;;  %1209 = vmatpush.msra.mxu0 %v5776_v55  ;;  %v5822_v54 = vld [vmem:[#allocation147_spill] sm:$0xff]  ;;  %v5830_v55 = vld [vmem:[#allocation145_spill] sm:$0xff] }
 0x1ca   :  { %1096 = vmatpush.msrb.mxu2 %v5770_v57  ;;  %1115 = vmatpush.msrb.mxu3 %v5771_v59  ;;  %v5824_v57 = vld [vmem:[#allocation163_spill] sm:$0xff]  ;;  %v5825_v59 = vld [vmem:[#allocation180_spill] sm:$0xff] }
 0x1cb   :  { %1077 = vmatpush.msra.mxu1 %v5772_v60  ;;  %1210 = vmatpush.msra.mxu0 %v5780_v6  ;;  %v5826_v60 = vld [vmem:[#allocation146_spill] sm:$0xff]  ;;  %v5834_v6 = vld [vmem:[#allocation144_spill] sm:$0xff] }
 0x1cc   :  { %1097 = vmatpush.msrb.mxu2 %v5773_v61  ;;  %1116 = vmatpush.msrb.mxu3 %v5774_v62  ;;  %v5827_v61 = vld [vmem:[#allocation188_spill] sm:$0xff]  ;;  %v5828_v62 = vld [vmem:[#allocation162_spill] sm:$0xff] }
 0x1cd   :  { %1078 = vmatpush.msra.mxu1 %v5775_v0  ;;  %1211 = vmatpush.msra.mxu0 %v5784_v9  ;;  %v5829_v0 = vld [vmem:[#allocation179_spill] sm:$0xff]  ;;  %v667_v9 = vld [vmem:[%s5452_s0 + $0x70] sm:$0xff] }
 0x1ce   :  { %1098 = vmatpush.msrb.mxu2 %v5777_v16  ;;  %1117 = vmatpush.msrb.mxu3 %v5778_v1  ;;  %v5831_v16 = vld [vmem:[#allocation187_spill] sm:$0xff]  ;;  %v5832_v1 = vld [vmem:[#allocation161_spill] sm:$0xff] }
 0x1cf   :  { %1079 = vmatpush.msra.mxu1 %v5779_v5  ;;  %1212 = vmatpush.msra.mxu0 %v5788_v12  ;;  %v5833_v5 = vld [vmem:[#allocation178_spill] sm:$0xff]  ;;  %v5841_v12 = vld [vmem:[#allocation176_spill] sm:$0xff] }
 0x1d0   :  { %1099 = vmatpush.msrb.mxu2 %v5781_v7  ;;  %1118 = vmatpush.msrb.mxu3 %v5782_v4  ;;  %v5835_v7 = vld [vmem:[#allocation186_spill] sm:$0xff]  ;;  %v5836_v4 = vld [vmem:[#allocation160_spill] sm:$0xff] }
 0x1d1   :  { %1080 = vmatpush.msra.mxu1 %v5783_v8  ;;  %1213 = vmatpush.msra.mxu0 %v5792_v18  ;;  %v5837_v8 = vld [vmem:[#allocation177_spill] sm:$0xff] }
 0x1d2   :  { %1100 = vmatpush.msrb.mxu2 %v5785_v10  ;;  %1119 = vmatpush.msrb.mxu3 %v5786_v3  ;;  %v5838_v10 = vld [vmem:[#allocation143_spill] sm:$0xff]  ;;  %v5839_v3 = vld [vmem:[#allocation185_spill] sm:$0xff] }
 0x1d3   :  { %1081 = vmatpush.msra.mxu1 %v5787_v11  ;;  %1214 = vmatpush.msra.mxu0 %v5796_v22  ;;  %v5840_v11 = vld [vmem:[#allocation159_spill] sm:$0xff]  ;;  %v5845_v18 = vld [vmem:[#allocation141_spill] sm:$0xff]  ;;  %v5849_v22 = vld [vmem:[#allocation156_spill] sm:$0xff] }
 0x1d4   :  { %1101 = vmatpush.msrb.mxu2 %v5789_v13  ;;  %1120 = vmatpush.msrb.mxu3 %v5790_v14  ;;  %v5842_v13 = vld [vmem:[#allocation142_spill] sm:$0xff] }
 0x1d5   :  { %1082 = vmatpush.msra.mxu1 %v5791_v15  ;;  %1215 = vmatpush.msra.mxu0 %v5800_v28  ;;  %v5843_v14 = vld [vmem:[#allocation158_spill] sm:$0xff]  ;;  %v5844_v15 = vld [vmem:[#allocation175_spill] sm:$0xff] }
 0x1d6   :  { %1102 = vmatpush.msrb.mxu2 %v5793_v19  ;;  %1121 = vmatpush.msrb.mxu3 %v5794_v20  ;;  %v5846_v19 = vld [vmem:[#allocation157_spill] sm:$0xff]  ;;  %v5847_v20 = vld [vmem:[#allocation174_spill] sm:$0xff] }
 0x1d7   :  { %1083 = vmatpush.msra.mxu1 %v5795_v21  ;;  %1216 = vmatpush.msra.mxu0 %v5806_v37  ;;  %v5848_v21 = vld [vmem:[#allocation140_spill] sm:$0xff]  ;;  %v5855_v28 = vld [vmem:[#allocation154_spill] sm:$0xff]  ;;  %v666_v37 = vld [vmem:[%s5452_s0 + $0x68] sm:$0xff] }
 0x1d8   :  { %1103 = vmatpush.msrb.mxu2 %v5797_v23  ;;  %1122 = vmatpush.msrb.mxu3 %v5798_v24  ;;  %v5850_v23 = vld [vmem:[#allocation173_spill] sm:$0xff]  ;;  %v5851_v24 = vld [vmem:[#allocation139_spill] sm:$0xff] }
 0x1d9   :  { %1084 = vmatpush.msra.mxu1 %v5799_v27  ;;  %1217 = vmatpush.msra.mxu0 %v5811_v42  ;;  %v5854_v27 = vld [vmem:[#allocation138_spill] sm:$0xff]  ;;  %v5864_v42 = vld [vmem:[#allocation213_spill] sm:$0xff] }
 0x1da   :  { %1104 = vmatpush.msrb.mxu2 %v5801_v29  ;;  %1123 = vmatpush.msrb.mxu3 %v5802_v30  ;;  %v5856_v29 = vld [vmem:[#allocation171_spill] sm:$0xff]  ;;  %v664_v30 = vld [vmem:[%s5452_s0 + $0x58] sm:$0xff] }
 0x1db   :  { %1085 = vmatmul.f32.vlgmr.msra.gmra.mxu1 %v660_v25  ;;  %1105 = vmatmul.f32.vlgmr.msrb.gmra.mxu2 %v661_v26  ;;  %v5852_v25 = vld [vmem:[#allocation155_spill] sm:$0xff]  ;;  %v5853_v26 = vld [vmem:[#allocation172_spill] sm:$0xff] }
 0x1dc   :  { %1149 = vmatpush.msrb.mxu1 %v5803_v32  ;;  %1169 = vmatpush.msra.mxu2 %v5804_v35  ;;  %v5857_v32 = vld [vmem:[#allocation137_spill] sm:$0xff] }
 0x1dd   :  { %1124 = vmatpush.msrb.mxu3 %v5805_v36  ;;  %1218 = vmatpush.msra.mxu0 %v5815_v46  ;;  %v5858_v35 = vld [vmem:[#allocation153_spill] sm:$0xff]  ;;  %v5859_v36 = vld [vmem:[#allocation170_spill] sm:$0xff] }
 0x1de   :  { %1125 = vmatmul.f32.vlgmr.msrb.gmra.mxu3 %v662_v31  ;;  %1150 = vmatpush.msrb.mxu1 %v5807_v38  ;;  %v665_v31 = vld [vmem:[%s5452_s0 + $0x60] sm:$0xff]  ;;  %v5860_v38 = vld [vmem:[#allocation216_spill] sm:$0xff]  ;;  %v5868_v46 = vld [vmem:[#allocation209_spill] sm:$0xff] }
 0x1df   :  { %1170 = vmatpush.msra.mxu2 %v5808_v39  ;;  %1189 = vmatpush.msra.mxu3 %v5809_v40  ;;  %v5861_v39 = vld [vmem:[#allocation169_spill] sm:$0xff]  ;;  %v5862_v40 = vld [vmem:[#allocation215_spill] sm:$0xff] }
 0x1e0   :  { %1151 = vmatpush.msrb.mxu1 %v5810_v41  ;;  %1219 = vmatpush.msra.mxu0 %v5819_v50  ;;  %v5863_v41 = vld [vmem:[#allocation214_spill] sm:$0xff]  ;;  %v5872_v50 = vld [vmem:[#allocation205_spill] sm:$0xff] }
 0x1e1   :  { %1171 = vmatpush.msra.mxu2 %v5812_v43  ;;  %1190 = vmatpush.msra.mxu3 %v5813_v44  ;;  %v5865_v43 = vld [vmem:[#allocation212_spill] sm:$0xff]  ;;  %v5866_v44 = vld [vmem:[#allocation211_spill] sm:$0xff] }
 0x1e2   :  { %1152 = vmatpush.msrb.mxu1 %v5814_v45  ;;  %1220 = vmatpush.msra.mxu0 %v5823_v56  ;;  %v5867_v45 = vld [vmem:[#allocation210_spill] sm:$0xff]  ;;  %v668_v56 = vld [vmem:[%s5452_s0 + $0x78] sm:$0xff] }
 0x1e3   :  { %1172 = vmatpush.msra.mxu2 %v5816_v47  ;;  %1191 = vmatpush.msra.mxu3 %v5817_v48  ;;  %v5869_v47 = vld [vmem:[#allocation208_spill] sm:$0xff]  ;;  %v5870_v48 = vld [vmem:[#allocation207_spill] sm:$0xff] }
 0x1e4   :  { %1153 = vmatpush.msrb.mxu1 %v5818_v49  ;;  %1221 = vmatpush.msra.mxu0 %v5827_v61  ;;  %v5871_v49 = vld [vmem:[#allocation206_spill] sm:$0xff]  ;;  %v1251_v61 = vld [vmem:[%s5456_s4 + $0x10] sm:$0xff] }
 0x1e5   :  { %1173 = vmatpush.msra.mxu2 %v5820_v51  ;;  %1192 = vmatpush.msra.mxu3 %v5821_v52  ;;  %v5873_v51 = vld [vmem:[#allocation204_spill] sm:$0xff]  ;;  %v5874_v52 = vld [vmem:[#allocation203_spill] sm:$0xff] }
 0x1e6   :  { %1154 = vmatpush.msrb.mxu1 %v5822_v54  ;;  %1222 = vmatpush.msra.mxu0 %v5831_v16  ;;  %v5875_v54 = vld [vmem:[#allocation202_spill] sm:$0xff] }
 0x1e7   :  { %1174 = vmatpush.msra.mxu2 %v5824_v57  ;;  %1193 = vmatpush.msra.mxu3 %v5825_v59  ;;  %v5876_v57 = vld [vmem:[#allocation201_spill] sm:$0xff]  ;;  %v2907_v59 = vld [vmem:[%s5454_s2] ss:$0 sm:$0xff] }
 0x1e8   :  { %1155 = vmatpush.msrb.mxu1 %v5826_v60  ;;  %1223 = vmatpush.msra.mxu0 %v5835_v7  ;;  %v1252_v60 = vld [vmem:[%s5456_s4 + $0x18] sm:$0xff] }
 0x1e9   :  { %1175 = vmatpush.msra.mxu2 %v5828_v62  ;;  %1194 = vmatpush.msra.mxu3 %v5829_v0  ;;  %v4904_v62 = vld [vmem:[%s5457_s5 + $0x18] sm:$0xff]  ;;  %v4910_v0 = vld [vmem:[%s5457_s5 + $0x10] sm:$0xff] }
 0x1ea   :  { %1156 = vmatpush.msrb.mxu1 %v5830_v55  ;;  %1224 = vmatpush.msra.mxu0 %v5839_v3  ;;  %v1250_v55 = vld [vmem:[%s5456_s4 + $0x8] sm:$0xff] }
 0x1eb   :  { %1176 = vmatpush.msra.mxu2 %v5832_v1  ;;  %1195 = vmatpush.msra.mxu3 %v5833_v5 }
 0x1ec   :  { %1157 = vmatpush.msrb.mxu1 %v5834_v6  ;;  %1225 = vmatmul.f32.vlgmr.msra.gmra.mxu0 %v667_v9 }
 0x1ed   :  { %1177 = vmatpush.msra.mxu2 %v5836_v4  ;;  %1196 = vmatpush.msra.mxu3 %v5837_v8 }
 0x1ee   :  { %1158 = vmatpush.msrb.mxu1 %v5838_v10 }
 0x1ef   :  { %1178 = vmatpush.msra.mxu2 %v5840_v11  ;;  %1197 = vmatpush.msra.mxu3 %v5841_v12  ;;  %v1249_v12 = vld [vmem:[%s5456_s4] sm:$0xff]  ;;  %s3164_s4 = smov 64  }
 0x1f0   :  { %1159 = vmatpush.msrb.mxu1 %v5842_v13  ;;  %v4922_v13 = vld [vmem:[%s5457_s5 + $0x8] sm:$0xff] }
 0x1f1   :  { %1179 = vmatpush.msra.mxu2 %v5843_v14  ;;  %1198 = vmatpush.msra.mxu3 %v5844_v15  ;;  %v4928_v15 = vld [vmem:[%s5457_s5] sm:$0xff]  ;;  %s3165_s5 = smov 32  }
 0x1f2   :  { %1160 = vmatpush.msrb.mxu1 %v5845_v18 }
 0x1f3   :  { %1180 = vmatpush.msra.mxu2 %v5846_v19  ;;  %1199 = vmatpush.msra.mxu3 %v5847_v20  ;;  %v3163_v19 = vmov 0.0  }
 0x1f4   :  { %1161 = vmatpush.msrb.mxu1 %v5848_v21 }
 0x1f5   :  { %1181 = vmatpush.msra.mxu2 %v5849_v22  ;;  %1200 = vmatpush.msra.mxu3 %v5850_v23 }
 0x1f6   :  { %1162 = vmatpush.msrb.mxu1 %v5851_v24 }
 0x1f7   :  { %1182 = vmatpush.msra.mxu2 %v5852_v25  ;;  %1201 = vmatpush.msra.mxu3 %v5853_v26 }
 0x1f8   :  { %1163 = vmatpush.msrb.mxu1 %v5854_v27 }
 0x1f9   :  { %1183 = vmatpush.msra.mxu2 %v5855_v28  ;;  %1202 = vmatpush.msra.mxu3 %v5856_v29 }
 0x1fa   :  { %1164 = vmatpush.msrb.mxu1 %v5857_v32 }
 0x1fb   :  { %1184 = vmatpush.msra.mxu2 %v5858_v35  ;;  %1203 = vmatpush.msra.mxu3 %v5859_v36 }
 0x1fc   :  { %1165 = vmatmul.f32.vlgmr.msrb.gmra.mxu1 %v664_v30  ;;  %1185 = vmatmul.f32.vlgmr.msra.gmra.mxu2 %v665_v31 }
 0x1fd   :  { %1229 = vmatpush.msra.mxu1 %v5860_v38  ;;  %1204 = vmatpush.msra.mxu3 %v5861_v39 }
 0x1fe   :  { %1205 = vmatmul.f32.vlgmr.msra.gmra.mxu3 %v666_v37  ;;  %1268 = vmatpush.msrb.mxu2 %v1252_v60 }
 0x1ff   :  { %1230 = vmatpush.msra.mxu1 %v5862_v40  ;;  %1304 = vmatpush.msrb.mxu3 %v4904_v62 }
 0x200   :  { %1269 = vmatpush.msrb.mxu2 %v1251_v61 }
 0x201   :  { %1231 = vmatpush.msra.mxu1 %v5863_v41  ;;  %1305 = vmatpush.msrb.mxu3 %v4910_v0 }
 0x202   :  { %1270 = vmatpush.msrb.mxu2 %v1250_v55 }
 0x203   :  { %1232 = vmatpush.msra.mxu1 %v5864_v42  ;;  %1306 = vmatpush.msrb.mxu3 %v4922_v13 }
 0x204   :  { %1271 = vmatpush.msrb.mxu2 %v1249_v12 }
 0x205   :  { %1233 = vmatpush.msra.mxu1 %v5865_v43  ;;  %1307 = vmatpush.msrb.mxu3 %v4928_v15 }
 0x206   :  { %1433 = vmatpush.msra.mxu2 %v4904_v62  ;;  %1308 = vmatmul.f32.vlgmr.msrb.gmra.mxu3 %v3163_v19 }
 0x207   :  { %1234 = vmatpush.msra.mxu1 %v5866_v44 }
 0x208   :  { %1434 = vmatpush.msra.mxu2 %v4910_v0 }
 0x209   :  { %1235 = vmatpush.msra.mxu1 %v5867_v45 }
 0x20a   :  { %1435 = vmatpush.msra.mxu2 %v4922_v13 }
 0x20b   :  { %1236 = vmatpush.msra.mxu1 %v5868_v46 }
 0x20c   :  { %1436 = vmatpush.msra.mxu2 %v4928_v15 }
 0x20d   :  { %1237 = vmatpush.msra.mxu1 %v5869_v47 }
 0x20f   :  { %1238 = vmatpush.msra.mxu1 %v5870_v48 }
 0x211   :  { %1239 = vmatpush.msra.mxu1 %v5871_v49 }
 0x213   :  { %1240 = vmatpush.msra.mxu1 %v5872_v50 }
 0x215   :  { %1241 = vmatpush.msra.mxu1 %v5873_v51 }
 0x217   :  { %1242 = vmatpush.msra.mxu1 %v5874_v52 }
 0x219   :  { %1243 = vmatpush.msra.mxu1 %v5875_v54  ;;  %v946_v16 = vpop.f32.mrf.mxu1 }
 0x21a   :  { %v947_v1 = vadd.f32 %v2907_v59, %v946_v16 }
 0x21b   :  { %1244 = vmatpush.msra.mxu1 %v5876_v57 }
 0x21c   :  { %1245 = vmatmul.f32.vlgmr.msra.gmra.mxu1 %v668_v56 }
 0x21d   :  { %v966_v5 = vpop.f32.mrf.mxu2 }
 0x21e   :  { %v967_v6 = vadd.f32 %v966_v5, %v947_v1 }
 0x223   :  { %v1066_v18 = vpop.f32.mrf.mxu0 }
 0x239   :  { %v986_v7 = vpop.f32.mrf.mxu3  ;;  %v1006_v8 = vpop.f32.mrf.mxu1 }
 0x23a   :  { %v987_v4 = vadd.f32 %v986_v7, %v967_v6  ;;  %v4950_v7 = vld [vmem:[%s5459_s7 + $0x38] sm:$0xff] }
 0x23b   :  { %1370 = vmatpush.msrb.mxu1 %v4950_v7  ;;  %1499 = vmatpush.msra.mxu3 %v4950_v7 }
 0x23c   :  { %v1007_v9 = vadd.f32 %v1006_v8, %v987_v4  ;;  %v4955_v4 = vld [vmem:[%s5459_s7 + $0x30] sm:$0xff]  ;;  %v4962_v8 = vld [vmem:[%s5459_s7 + $0x28] sm:$0xff]  ;;  %1628 = vmatpush.msrb.mxu0 %v4950_v7 }
 0x23d   :  { %v1026_v10 = vpop.f32.mrf.mxu2  ;;  %1371 = vmatpush.msrb.mxu1 %v4955_v4  ;;  %1500 = vmatpush.msra.mxu3 %v4955_v4 }
 0x23e   :  { %v1027_v3 = vadd.f32 %v1026_v10, %v1007_v9  ;;  %v4970_v9 = vld [vmem:[%s5459_s7 + $0x20] sm:$0xff]  ;;  %1629 = vmatpush.msrb.mxu0 %v4955_v4  ;;  %v4978_v10 = vld [vmem:[%s5459_s7 + $0x18] sm:$0xff] }
 0x23f   :  { %1372 = vmatpush.msrb.mxu1 %v4962_v8  ;;  %1501 = vmatpush.msra.mxu3 %v4962_v8 }
 0x240   :  { %1630 = vmatpush.msrb.mxu0 %v4962_v8 }
 0x241   :  { %1373 = vmatpush.msrb.mxu1 %v4970_v9  ;;  %1502 = vmatpush.msra.mxu3 %v4970_v9 }
 0x242   :  { %v1046_v11 = vpop.f32.mrf.mxu3  ;;  %1631 = vmatpush.msrb.mxu0 %v4970_v9 }
 0x243   :  { %v1047_v14 = vadd.f32 %v1046_v11, %v1027_v3  ;;  %v4986_v3 = vld [vmem:[%s5459_s7 + $0x10] sm:$0xff]  ;;  %1374 = vmatpush.msrb.mxu1 %v4978_v10  ;;  %1503 = vmatpush.msra.mxu3 %v4978_v10  ;;  %v4994_v11 = vld [vmem:[%s5459_s7 + $0x8] sm:$0xff] }
 0x244   :  { %v1146_v27 = vpop.f32.mrf.mxu0  ;;  %1632 = vmatpush.msrb.mxu0 %v4978_v10 }
 0x245   :  { %v1067_v21 = vadd.f32 %v1066_v18, %v1047_v14  ;;  %1375 = vmatpush.msrb.mxu1 %v4986_v3  ;;  %1504 = vmatpush.msra.mxu3 %v4986_v3  ;;  %v5007_v18 = vld [vmem:[%s5459_s7] sm:$0xff] }
 0x246   :  { %1633 = vmatpush.msrb.mxu0 %v4986_v3 }
 0x247   :  { %1376 = vmatpush.msrb.mxu1 %v4994_v11  ;;  %1505 = vmatpush.msra.mxu3 %v4994_v11 }
 0x248   :  { %1634 = vmatpush.msrb.mxu0 %v4994_v11 }
 0x249   :  { %1377 = vmatpush.msrb.mxu1 %v5007_v18  ;;  %1506 = vmatpush.msra.mxu3 %v5007_v18 }
 0x24a   :  { %1635 = vmatpush.msrb.mxu0 %v5007_v18 }
 0x24b   :  { %1820 = vmatpush.msra.mxu1 %v4904_v62  ;;  %1757 = vmatpush.msrb.mxu3 %v4950_v7 }
 0x24c   :  { %1949 = vmatpush.msra.mxu0 %v4904_v62 }
 0x24d   :  { %1821 = vmatpush.msra.mxu1 %v4910_v0  ;;  %1758 = vmatpush.msrb.mxu3 %v4955_v4 }
 0x24e   :  { %1950 = vmatpush.msra.mxu0 %v4910_v0 }
 0x24f   :  { %1822 = vmatpush.msra.mxu1 %v4922_v13  ;;  %1759 = vmatpush.msrb.mxu3 %v4962_v8 }
 0x250   :  { %1951 = vmatpush.msra.mxu0 %v4922_v13 }
 0x251   :  { %1823 = vmatpush.msra.mxu1 %v4928_v15  ;;  %1760 = vmatpush.msrb.mxu3 %v4970_v9 }
 0x252   :  { %1952 = vmatpush.msra.mxu0 %v4928_v15 }
 0x253   :  { %1761 = vmatpush.msrb.mxu3 %v4978_v10 }
 0x255   :  { %1762 = vmatpush.msrb.mxu3 %v4986_v3 }
 0x257   :  { %1763 = vmatpush.msrb.mxu3 %v4994_v11 }
 0x258   :  { %v1086_v20 = vpop.f32.mrf.mxu1 }
 0x259   :  { %v1087_v23 = vadd.f32 %v1086_v20, %v1067_v21  ;;  %1764 = vmatpush.msrb.mxu3 %v5007_v18 }
 0x25e   :  { %v1106_v22 = vpop.f32.mrf.mxu2 }
 0x25f   :  { %v1107_v24 = vadd.f32 %v1106_v22, %v1087_v23  ;;  %v5877_v22 = vld [vmem:[#allocation217_spill] sm:$0xff] }
 0x261   :  { %v1126_v25 = vpop.f32.mrf.mxu3 }
 0x262   :  { %v1127_v26 = vadd.f32 %v1126_v25, %v1107_v24  ;;  %v5047_v24 = vld [vmem:[%s5460_s8] ss:$0 sm:$0xff] }
 0x264   :  { %v1147_v29 = vadd.f32 %v1146_v27, %v1127_v26 }
 0x269   :  { %v1226_v37 = vpop.f32.mrf.mxu0 }
 0x279   :  { %v1166_v28 = vpop.f32.mrf.mxu1 }
 0x27a   :  { %v1167_v31 = vadd.f32 %v1166_v28, %v1147_v29 }
 0x27f   :  { %v1186_v30 = vpop.f32.mrf.mxu2 }
 0x280   :  { %v1187_v32 = vadd.f32 %v1186_v30, %v1167_v31 }
 0x281   :  { %v1206_v35 = vpop.f32.mrf.mxu3 }
 0x282   :  { %v1207_v36 = vadd.f32 %v1206_v35, %v1187_v32 }
 0x284   :  { %v1227_v38 = vadd.f32 %v1226_v37, %v1207_v36 }
 0x289   :  { %v1309_v42 = vpop.f32.mrf.mxu3 }
 0x299   :  { %v1246_v39 = vpop.f32.mrf.mxu1 }
 0x29a   :  { %v1247_v40 = vadd.f32 %v1246_v39, %v1227_v38 }
 0x29c   :  { %2849 = vmatmul.msk.f32.vlgmr.msrb.gmra.mxu2 %vm584_vm0, %v1247_v40 }
 0x29d   :  { %1562 = vmatpush.msrb.mxu2 %v4904_v62 }
 0x29f   :  { %1563 = vmatpush.msrb.mxu2 %v4910_v0 }
 0x2a1   :  { %1564 = vmatpush.msrb.mxu2 %v4922_v13 }
 0x2a3   :  { %1565 = vmatpush.msrb.mxu2 %v4928_v15 }
 0x31f   :  { %v1273_v41 = vpop.f32.mrf.mxu2 }
 0x320   :  { %v1274_v43 = vadd.f32 %v4562_v63, %v1273_v41 }
 0x322   :  { %v1312_v44 = vadd.f32 %v1309_v42, %v1274_v43 }
 0x324   :  { %2910 = vtanh.f32 %v1312_v44  ;;  %v2850_v46 = vmul.f32 -1.442695, %v1312_v44 }
 0x326   :  { %2912 = vpow2.f32 %v2850_v46 }
 0x32a   :  { %v2911_v45 = vpop.eup %2910 }
 0x32b   :  { %1335 = vrot.lane.b32.xlu0 %v2911_v45, %s3164_s4 }
 0x32c   :  { %v2913_v47 = vpop.eup %2912 }
 0x32d   :  { %v1316_v48 = vadd.f32 1.0, %v2913_v47 }
 0x32f   :  { %2914 = vrcp.f32 %v1316_v48  ;;  %v1328_v56 = vand.u32 2147483648, %v1316_v48  ;;  %vm1322_vm2 = vweird.f32 %v1316_v48  ;;  %v1326_v63 = vand.u32 2147483647, %v1316_v48 }
 0x331   :  { %v1329_v59 = vor.u32 1.1754944e-38, %v1328_v56  ;;  %vm1327_vm4 = vcmp.eq.f32.partialorder %v1326_v63, 8.507059e+37 }
 0x335   :  { %v2915_v49 = vpop.eup %2914 }
 0x336   :  { %v1318_v50 = vmul.f32 %v2915_v49, %v1316_v48  ;;  %vm1323_vm1 = vweird.f32 %v2915_v49 }
 0x337   :  { %vm1324_vm3 = vmor %vm1322_vm2, %vm1323_vm1 }
 0x338   :  { %v1319_v51 = vsub.f32 1.0, %v1318_v50 }
 0x33a   :  { %v1320_v52 = vmul.f32 %v2915_v49, %v1319_v51 }
 0x33c   :  { %v1321_v54 = vadd.f32 %v2915_v49, %v1320_v52 }
 0x33e   :  { %v1325_v57 = vsel %vm1324_vm3, %v2915_v49, %v1321_v54 }
 0x33f   :  { %v1330_v61 = vsel %vm1327_vm4, %v1329_v59, %v1325_v57 }
 0x340   :  { %v1333_v16 = vmul.f32 0.0, %v1330_v61 }
 0x39d   :  { %v1336_v60 = vpop.permute.xlu0 %1335 }
 0x39e   :  { %v1338_v55 = vmul.f32 %v1336_v60, %v1330_v61 }
 0x3a0   :  { %1340 = vrot.lane.b32.xlu0 %v1338_v55, %s3165_s5 }
 0x412   :  { %v1341_v1 = vpop.permute.xlu0 %1340 }
 0x413   :  { %v4943_v5 = vadd.f32 %v1341_v1, %v1333_v16 }
 0x415   :  { %2916 = vtanh.f32 %v4943_v5 }
 0x41b   :  { %v2917_v6 = vpop.eup %2916 }
 0x41c   :  { %1346 = vrot.lane.b32.xlu1 %v2917_v6, %s3164_s4 }
 0x48e   :  { %v1347_v12 = vpop.permute.xlu1 %1346 }
 0x48f   :  { %v1349_v14 = vmul.f32 %v1347_v12, %v1330_v61 }
 0x491   :  { %1351 = vrot.lane.b32.xlu1 %v1349_v14, %s3165_s5 }
 0x503   :  { %v1352_v19 = vpop.permute.xlu1 %1351 }
 0x504   :  { %v1354_v20 = vsel %vm584_vm0, %v1352_v19, 0.0  ;;  %2853 = vmatmul.msk.f32.vlgmr.msra.gmra.mxu2 %vm584_vm0, %v1352_v19 }
 0x505   :  { %2851 = vmatmul.msk.f32.vlgmr.msrb.gmra.mxu1 %vm1358_vm5, %v1354_v20  ;;  %1691 = vmatpush.msra.mxu2 %v4904_v62 }
 0x506   :  { %2015 = vmatpush.msrb.mxu1 %v4950_v7 }
 0x507   :  { %1692 = vmatpush.msra.mxu2 %v4910_v0 }
 0x508   :  { %2016 = vmatpush.msrb.mxu1 %v4955_v4 }
 0x509   :  { %1693 = vmatpush.msra.mxu2 %v4922_v13 }
 0x50a   :  { %2017 = vmatpush.msrb.mxu1 %v4962_v8 }
 0x50b   :  { %1694 = vmatpush.msra.mxu2 %v4928_v15 }
 0x50c   :  { %2018 = vmatpush.msrb.mxu1 %v4970_v9 }
 0x50e   :  { %2019 = vmatpush.msrb.mxu1 %v4978_v10 }
 0x510   :  { %2020 = vmatpush.msrb.mxu1 %v4986_v3 }
 0x512   :  { %2021 = vmatpush.msrb.mxu1 %v4994_v11 }
 0x514   :  { %2022 = vmatpush.msrb.mxu1 %v5007_v18 }
 0x582   :  { %v1379_v25 = vpop.f32.mrf.mxu1 }
 0x583   :  { %v1380_v26 = vadd.f32 %v5047_v24, %v1379_v25 }
 0x585   :  { %v2852_v30 = vmul.f32 -1.442695, %v1380_v26 }
 0x587   :  { %v1438_v21 = vpop.f32.mrf.mxu2 }
 0x588   :  { %v1441_v23 = vadd.f32 %v1438_v21, %v5877_v22 }
 0x58a   :  { %2918 = vtanh.f32 %v1441_v23  ;;  %v2854_v29 = vmul.f32 -1.442695, %v1441_v23 }
 0x58b   :  { %2920 = vtanh.f32 %v1380_v26 }
 0x58c   :  { %2922 = vpow2.f32 %v2854_v29 }
 0x58d   :  { %2924 = vpow2.f32 %v2852_v30 }
 0x590   :  { %v2919_v27 = vpop.eup %2918 }
 0x591   :  { %1464 = vrot.lane.b32.xlu2 %v2919_v27, %s3164_s4  ;;  %v2921_v28 = vpop.eup %2920 }
 0x592   :  { %v2923_v31 = vpop.eup %2922 }
 0x593   :  { %v1445_v32 = vadd.f32 1.0, %v2923_v31  ;;  %v2925_v35 = vpop.eup %2924 }
 0x594   :  { %v1385_v36 = vadd.f32 1.0, %v2925_v35 }
 0x595   :  { %2926 = vrcp.f32 %v1445_v32  ;;  %v1457_v45 = vand.u32 2147483648, %v1445_v32  ;;  %vm1451_vm7 = vweird.f32 %v1445_v32  ;;  %v1455_v46 = vand.u32 2147483647, %v1445_v32 }
 0x596   :  { %2928 = vrcp.f32 %v1385_v36  ;;  %v1397_v56 = vand.u32 2147483648, %v1385_v36  ;;  %vm1391_vm11 = vweird.f32 %v1385_v36  ;;  %v1395_v63 = vand.u32 2147483647, %v1385_v36 }
 0x597   :  { %v1458_v49 = vor.u32 1.1754944e-38, %v1457_v45  ;;  %vm1456_vm9 = vcmp.eq.f32.partialorder %v1455_v46, 8.507059e+37 }
 0x598   :  { %v1398_v59 = vor.u32 1.1754944e-38, %v1397_v56  ;;  %vm1396_vm13 = vcmp.eq.f32.partialorder %v1395_v63, 8.507059e+37 }
 0x599   :  { %1404 = vrot.lane.b32.xlu2 %v2921_v28, %s3164_s4 }
 0x59b   :  { %v2927_v37 = vpop.eup %2926 }
 0x59c   :  { %v1447_v38 = vmul.f32 %v2927_v37, %v1445_v32  ;;  %v2929_v40 = vpop.eup %2928  ;;  %vm1452_vm6 = vweird.f32 %v2927_v37 }
 0x59d   :  { %v1387_v42 = vmul.f32 %v2929_v40, %v1385_v36  ;;  %vm1453_vm8 = vmor %vm1451_vm7, %vm1452_vm6  ;;  %vm1392_vm10 = vweird.f32 %v2929_v40 }
 0x59e   :  { %v1448_v39 = vsub.f32 1.0, %v1447_v38  ;;  %vm1393_vm12 = vmor %vm1391_vm11, %vm1392_vm10 }
 0x59f   :  { %v1388_v44 = vsub.f32 1.0, %v1387_v42 }
 0x5a0   :  { %v1449_v41 = vmul.f32 %v2927_v37, %v1448_v39 }
 0x5a1   :  { %v1389_v48 = vmul.f32 %v2929_v40, %v1388_v44 }
 0x5a2   :  { %v1450_v43 = vadd.f32 %v2927_v37, %v1449_v41 }
 0x5a3   :  { %v1390_v54 = vadd.f32 %v2929_v40, %v1389_v48 }
 0x5a4   :  { %v1454_v47 = vsel %vm1453_vm8, %v2927_v37, %v1450_v43 }
 0x5a5   :  { %v1459_v51 = vsel %vm1456_vm9, %v1458_v49, %v1454_v47  ;;  %v1394_v57 = vsel %vm1393_vm12, %v2929_v40, %v1390_v54 }
 0x5a6   :  { %v1399_v61 = vsel %vm1396_vm13, %v1398_v59, %v1394_v57  ;;  %v1462_v16 = vmul.f32 %v1459_v51, %v4943_v5 }
 0x5a7   :  { %v1402_v12 = vmul.f32 0.0, %v1399_v61 }
 0x5eb   :  { %v1465_v50 = vpop.permute.xlu2 %1464 }
 0x5ec   :  { %v1467_v52 = vmul.f32 %v1465_v50, %v1459_v51 }
 0x5ee   :  { %1469 = vrot.lane.b32.xlu0 %v1467_v52, %s3165_s5 }
 0x5f3   :  { %v1405_v60 = vpop.permute.xlu2 %1404 }
 0x5f4   :  { %v1407_v55 = vmul.f32 %v1405_v60, %v1399_v61 }
 0x5f6   :  { %1409 = vrot.lane.b32.xlu1 %v1407_v55, %s3165_s5 }
 0x660   :  { %v1470_v1 = vpop.permute.xlu0 %1469 }
 0x661   :  { %v5055_v6 = vadd.f32 %v1470_v1, %v1462_v16 }
 0x663   :  { %2930 = vtanh.f32 %v5055_v6 }
 0x668   :  { %v1410_v14 = vpop.permute.xlu1 %1409 }
 0x669   :  { %v2931_v19 = vpop.eup %2930  ;;  %v5058_v20 = vadd.f32 %v1410_v14, %v1402_v12 }
 0x66a   :  { %1475 = vrot.lane.b32.xlu2 %v2931_v19, %s3164_s4 }
 0x66b   :  { %2932 = vtanh.f32 %v5058_v20 }
 0x671   :  { %v2933_v21 = vpop.eup %2932 }
 0x672   :  { %1415 = vrot.lane.b32.xlu0 %v2933_v21, %s3164_s4 }
 0x6c4   :  { %v1476_v22 = vpop.permute.xlu2 %1475 }
 0x6c5   :  { %v1478_v23 = vmul.f32 %v1476_v22, %v1459_v51 }
 0x6c7   :  { %1480 = vrot.lane.b32.xlu1 %v1478_v23, %s3165_s5 }
 0x6e4   :  { %v1416_v5 = vpop.permute.xlu0 %1415 }
 0x6e5   :  { %v5064_v25 = vmul.f32 %v1416_v5, %v1399_v61 }
 0x6e7   :  { %1484 = vrot.lane.b32.xlu2 %v5064_v25, %s3164_s4 }
 0x739   :  { %v1481_v26 = vpop.permute.xlu1 %1480 }
 0x73a   :  { %2857 = vmatmul.msk.f32.vlgmr.msrb.gmra.mxu2 %vm584_vm0, %v1481_v26 }
 0x73b   :  { %1886 = vmatpush.msrb.mxu2 %v4950_v7 }
 0x73d   :  { %1887 = vmatpush.msrb.mxu2 %v4955_v4 }
 0x73f   :  { %1888 = vmatpush.msrb.mxu2 %v4962_v8 }
 0x741   :  { %v1485_v27 = vpop.permute.xlu2 %1484  ;;  %1889 = vmatpush.msrb.mxu2 %v4970_v9 }
 0x742   :  { %v1487_v28 = vsel %vm584_vm0, %v1481_v26, %v1485_v27 }
 0x743   :  { %2855 = vmatmul.msk.f32.vlgmr.msra.gmra.mxu3 %vm1358_vm5, %v1487_v28  ;;  %1890 = vmatpush.msrb.mxu2 %v4978_v10 }
 0x744   :  { %2078 = vmatpush.msra.mxu3 %v4904_v62 }
 0x745   :  { %1891 = vmatpush.msrb.mxu2 %v4986_v3 }
 0x746   :  { %2079 = vmatpush.msra.mxu3 %v4910_v0 }
 0x747   :  { %1892 = vmatpush.msrb.mxu2 %v4994_v11 }
 0x748   :  { %2080 = vmatpush.msra.mxu3 %v4922_v13 }
 0x749   :  { %1893 = vmatpush.msrb.mxu2 %v5007_v18 }
 0x74a   :  { %2081 = vmatpush.msra.mxu3 %v4928_v15 }
 0x7bd   :  { %v1567_v29 = vpop.f32.mrf.mxu2 }
 0x7be   :  { %v1570_v30 = vadd.f32 %v1567_v29, %v4571_v34 }
 0x7c0   :  { %2934 = vtanh.f32 %v1570_v30  ;;  %v2858_v37 = vmul.f32 -1.442695, %v1570_v30 }
 0x7c6   :  { %v2935_v31 = vpop.eup %2934  ;;  %v1508_v32 = vpop.f32.mrf.mxu3 }
 0x7c7   :  { %v1509_v35 = vadd.f32 %v5047_v24, %v1508_v32  ;;  %1593 = vrot.lane.b32.xlu0 %v2935_v31, %s3164_s4 }
 0x7c9   :  { %2936 = vtanh.f32 %v1509_v35  ;;  %v2856_v38 = vmul.f32 -1.442695, %v1509_v35 }
 0x7ca   :  { %2938 = vpow2.f32 %v2858_v37 }
 0x7cb   :  { %2940 = vpow2.f32 %v2856_v38 }
 0x7cf   :  { %v2937_v36 = vpop.eup %2936 }
 0x7d0   :  { %1533 = vrot.lane.b32.xlu1 %v2937_v36, %s3164_s4  ;;  %v2939_v39 = vpop.eup %2938 }
 0x7d1   :  { %v1574_v40 = vadd.f32 1.0, %v2939_v39  ;;  %v2941_v41 = vpop.eup %2940 }
 0x7d2   :  { %v1514_v34 = vadd.f32 1.0, %v2941_v41 }
 0x7d3   :  { %2942 = vrcp.f32 %v1574_v40  ;;  %v1586_v49 = vand.u32 2147483648, %v1574_v40  ;;  %vm1580_vm15 = vweird.f32 %v1574_v40  ;;  %v1584_v51 = vand.u32 2147483647, %v1574_v40 }
 0x7d4   :  { %2944 = vrcp.f32 %v1514_v34  ;;  %v1526_v61 = vand.u32 2147483648, %v1514_v34  ;;  %vm1520_vm4 = vweird.f32 %v1514_v34  ;;  %v1524_v55 = vand.u32 2147483647, %v1514_v34 }
 0x7d5   :  { %v1587_v54 = vor.u32 1.1754944e-38, %v1586_v49  ;;  %vm1585_vm2 = vcmp.eq.f32.partialorder %v1584_v51, 8.507059e+37 }
 0x7d6   :  { %v1527_v1 = vor.u32 1.1754944e-38, %v1526_v61  ;;  %vm1525_vm7 = vcmp.eq.f32.partialorder %v1524_v55, 8.507059e+37 }
 0x7d9   :  { %v2943_v42 = vpop.eup %2942 }
 0x7da   :  { %v1576_v43 = vmul.f32 %v2943_v42, %v1574_v40  ;;  %v2945_v45 = vpop.eup %2944  ;;  %vm1581_vm14 = vweird.f32 %v2943_v42 }
 0x7db   :  { %v1516_v47 = vmul.f32 %v2945_v45, %v1514_v34  ;;  %vm1582_vm1 = vmor %vm1580_vm15, %vm1581_vm14  ;;  %vm1521_vm3 = vweird.f32 %v2945_v45 }
 0x7dc   :  { %v1577_v44 = vsub.f32 1.0, %v1576_v43  ;;  %vm1522_vm6 = vmor %vm1520_vm4, %vm1521_vm3 }
 0x7dd   :  { %v1517_v50 = vsub.f32 1.0, %v1516_v47 }
 0x7de   :  { %v1578_v46 = vmul.f32 %v2943_v42, %v1577_v44 }
 0x7df   :  { %v1518_v56 = vmul.f32 %v2945_v45, %v1517_v50 }
 0x7e0   :  { %v1579_v48 = vadd.f32 %v2943_v42, %v1578_v46 }
 0x7e1   :  { %v1519_v60 = vadd.f32 %v2945_v45, %v1518_v56 }
 0x7e2   :  { %v1583_v52 = vsel %vm1582_vm1, %v2943_v42, %v1579_v48 }
 0x7e3   :  { %v1588_v63 = vsel %vm1585_vm2, %v1587_v54, %v1583_v52  ;;  %v1523_v16 = vsel %vm1522_vm6, %v2945_v45, %v1519_v60 }
 0x7e4   :  { %v1528_v14 = vsel %vm1525_vm7, %v1527_v1, %v1523_v16  ;;  %v1591_v21 = vmul.f32 %v1588_v63, %v5055_v6 }
 0x7e5   :  { %v1531_v26 = vmul.f32 %v1528_v14, %v5058_v20 }
 0x839   :  { %v1594_v57 = vpop.permute.xlu0 %1593 }
 0x83a   :  { %v1596_v59 = vmul.f32 %v1594_v57, %v1588_v63 }
 0x83c   :  { %1598 = vrot.lane.b32.xlu2 %v1596_v59, %s3165_s5 }
 0x842   :  { %v1534_v12 = vpop.permute.xlu1 %1533 }
 0x843   :  { %v1536_v19 = vmul.f32 %v1534_v12, %v1528_v14 }
 0x845   :  { %1538 = vrot.lane.b32.xlu0 %v1536_v19, %s3165_s5 }
 0x896   :  { %v1599_v22 = vpop.permute.xlu2 %1598 }
 0x897   :  { %v5090_v23 = vadd.f32 %v1599_v22, %v1591_v21 }
 0x899   :  { %2946 = vtanh.f32 %v5090_v23 }
 0x89f   :  { %v2947_v5 = vpop.eup %2946 }
 0x8a0   :  { %1604 = vrot.lane.b32.xlu1 %v2947_v5, %s3164_s4 }
 0x8b7   :  { %v1539_v27 = vpop.permute.xlu0 %1538 }
 0x8b8   :  { %v5095_v28 = vadd.f32 %v1539_v27, %v1531_v26 }
 0x8ba   :  { %2948 = vtanh.f32 %v5095_v28 }
 0x8c0   :  { %v2949_v29 = vpop.eup %2948 }
 0x8c1   :  { %1544 = vrot.lane.b32.xlu2 %v2949_v29, %s3164_s4 }
 0x912   :  { %v1605_v30 = vpop.permute.xlu1 %1604 }
 0x913   :  { %v1607_v6 = vmul.f32 %v1605_v30, %v1588_v63 }
 0x915   :  { %1609 = vrot.lane.b32.xlu0 %v1607_v6, %s3165_s5 }
 0x91b   :  { %v1545_v31 = vpop.permute.xlu2 %1544 }
 0x91c   :  { %v5100_v32 = vmul.f32 %v1545_v31, %v1528_v14 }
 0x91e   :  { %1613 = vrot.lane.b32.xlu1 %v5100_v32, %s3164_s4 }
 0x987   :  { %v1610_v35 = vpop.permute.xlu0 %1609 }
 0x988   :  { %2861 = vmatmul.msk.f32.vlgmr.msra.gmra.mxu2 %vm584_vm0, %v1610_v35 }
 0x989   :  { %2207 = vmatpush.msra.mxu2 %v4904_v62 }
 0x98b   :  { %2208 = vmatpush.msra.mxu2 %v4910_v0 }
 0x98d   :  { %2209 = vmatpush.msra.mxu2 %v4922_v13 }
 0x98f   :  { %2210 = vmatpush.msra.mxu2 %v4928_v15 }
 0x990   :  { %v1614_v20 = vpop.permute.xlu1 %1613 }
 0x991   :  { %v1616_v36 = vsel %vm584_vm0, %v1610_v35, %v1614_v20 }
 0x992   :  { %2859 = vmatmul.msk.f32.vlgmr.msrb.gmra.mxu0 %vm1358_vm5, %v1616_v36 }
 0x993   :  { %2144 = vmatpush.msrb.mxu0 %v4950_v7 }
 0x995   :  { %2145 = vmatpush.msrb.mxu0 %v4955_v4 }
 0x997   :  { %2146 = vmatpush.msrb.mxu0 %v4962_v8 }
 0x999   :  { %2147 = vmatpush.msrb.mxu0 %v4970_v9 }
 0x99b   :  { %2148 = vmatpush.msrb.mxu0 %v4978_v10 }
 0x99d   :  { %2149 = vmatpush.msrb.mxu0 %v4986_v3 }
 0x99f   :  { %2150 = vmatpush.msrb.mxu0 %v4994_v11 }
 0x9a1   :  { %2151 = vmatpush.msrb.mxu0 %v5007_v18 }
 0xa0b   :  { %v1696_v37 = vpop.f32.mrf.mxu2 }
 0xa0c   :  { %v1699_v38 = vadd.f32 %v1696_v37, %v4577_v2 }
 0xa0e   :  { %2950 = vtanh.f32 %v1699_v38  ;;  %v2862_v45 = vmul.f32 -1.442695, %v1699_v38 }
 0xa0f   :  { %v1637_v39 = vpop.f32.mrf.mxu0 }
 0xa10   :  { %v1638_v40 = vadd.f32 %v5047_v24, %v1637_v39 }
 0xa12   :  { %2952 = vtanh.f32 %v1638_v40  ;;  %v2860_v42 = vmul.f32 -1.442695, %v1638_v40 }
 0xa14   :  { %v2951_v41 = vpop.eup %2950  ;;  %2954 = vpow2.f32 %v2860_v42 }
 0xa15   :  { %1722 = vrot.lane.b32.xlu0 %v2951_v41, %s3164_s4 }
 0xa18   :  { %v2953_v34 = vpop.eup %2952 }
 0xa19   :  { %1662 = vrot.lane.b32.xlu2 %v2953_v34, %s3164_s4 }
 0xa1a   :  { %v2955_v43 = vpop.eup %2954 }
 0xa1b   :  { %v1643_v44 = vadd.f32 1.0, %v2955_v43 }
 0xa1d   :  { %2956 = vrcp.f32 %v1643_v44  ;;  %v1655_v52 = vand.u32 2147483648, %v1643_v44  ;;  %vm1649_vm9 = vweird.f32 %v1643_v44  ;;  %v1653_v54 = vand.u32 2147483647, %v1643_v44 }
 0xa1e   :  { %2958 = vpow2.f32 %v2862_v45 }
 0xa1f   :  { %v1656_v57 = vor.u32 1.1754944e-38, %v1655_v52  ;;  %vm1654_vm11 = vcmp.eq.f32.partialorder %v1653_v54, 8.507059e+37 }
 0xa23   :  { %v2957_v46 = vpop.eup %2956 }
 0xa24   :  { %v1645_v2 = vmul.f32 %v2957_v46, %v1643_v44  ;;  %v2959_v47 = vpop.eup %2958  ;;  %vm1650_vm8 = vweird.f32 %v2957_v46 }
 0xa25   :  { %v1703_v49 = vadd.f32 1.0, %v2959_v47  ;;  %vm1651_vm10 = vmor %vm1649_vm9, %vm1650_vm8 }
 0xa26   :  { %v1646_v48 = vsub.f32 1.0, %v1645_v2 }
 0xa27   :  { %2960 = vrcp.f32 %v1703_v49  ;;  %v1715_v14 = vand.u32 2147483648, %v1703_v49  ;;  %vm1709_vm13 = vweird.f32 %v1703_v49  ;;  %v1713_v19 = vand.u32 2147483647, %v1703_v49 }
 0xa28   :  { %v1647_v50 = vmul.f32 %v2957_v46, %v1646_v48 }
 0xa29   :  { %v1716_v22 = vor.u32 1.1754944e-38, %v1715_v14  ;;  %vm1714_vm15 = vcmp.eq.f32.partialorder %v1713_v19, 8.507059e+37 }
 0xa2a   :  { %v1648_v51 = vadd.f32 %v2957_v46, %v1647_v50 }
 0xa2c   :  { %v1652_v56 = vsel %vm1651_vm10, %v2957_v46, %v1648_v51 }
 0xa2d   :  { %v2961_v63 = vpop.eup %2960  ;;  %v1657_v60 = vsel %vm1654_vm11, %v1656_v57, %v1652_v56 }
 0xa2e   :  { %v1705_v55 = vmul.f32 %v2961_v63, %v1703_v49  ;;  %vm1710_vm12 = vweird.f32 %v2961_v63  ;;  %v1660_v31 = vmul.f32 %v1657_v60, %v5095_v28 }
 0xa2f   :  { %vm1711_vm14 = vmor %vm1709_vm13, %vm1710_vm12 }
 0xa30   :  { %v1706_v16 = vsub.f32 1.0, %v1705_v55 }
 0xa32   :  { %v1707_v1 = vmul.f32 %v2961_v63, %v1706_v16 }
 0xa34   :  { %v1708_v12 = vadd.f32 %v2961_v63, %v1707_v1 }
 0xa36   :  { %v1712_v21 = vsel %vm1711_vm14, %v2961_v63, %v1708_v12 }
 0xa37   :  { %v1717_v26 = vsel %vm1714_vm15, %v1716_v22, %v1712_v21 }
 0xa38   :  { %v1720_v29 = vmul.f32 %v1717_v26, %v5090_v23 }
 0xa73   :  { %v1663_v59 = vpop.permute.xlu2 %1662 }
 0xa74   :  { %v1665_v61 = vmul.f32 %v1663_v59, %v1657_v60 }
 0xa76   :  { %1667 = vrot.lane.b32.xlu1 %v1665_v61, %s3165_s5 }
 0xa87   :  { %v1723_v5 = vpop.permute.xlu0 %1722 }
 0xa88   :  { %v1725_v27 = vmul.f32 %v1723_v5, %v1717_v26 }
 0xa8a   :  { %1727 = vrot.lane.b32.xlu2 %v1725_v27, %s3165_s5 }
 0xae4   :  { %v1728_v30 = vpop.permute.xlu2 %1727 }
 0xae5   :  { %v5126_v6 = vadd.f32 %v1728_v30, %v1720_v29 }
 0xae7   :  { %2962 = vtanh.f32 %v5126_v6 }
 0xae8   :  { %v1668_v35 = vpop.permute.xlu1 %1667 }
 0xae9   :  { %v5130_v20 = vadd.f32 %v1668_v35, %v1660_v31 }
 0xaeb   :  { %2964 = vtanh.f32 %v5130_v20 }
 0xaed   :  { %v2963_v36 = vpop.eup %2962 }
 0xaee   :  { %1733 = vrot.lane.b32.xlu1 %v2963_v36, %s3164_s4 }
 0xaf1   :  { %v2965_v37 = vpop.eup %2964 }
 0xaf2   :  { %1673 = vrot.lane.b32.xlu0 %v2965_v37, %s3164_s4 }
 0xb60   :  { %v1734_v38 = vpop.permute.xlu1 %1733 }
 0xb61   :  { %v1736_v23 = vmul.f32 %v1734_v38, %v1717_v26 }
 0xb63   :  { %1738 = vrot.lane.b32.xlu2 %v1736_v23, %s3165_s5 }
 0xb64   :  { %v1674_v39 = vpop.permute.xlu0 %1673 }
 0xb65   :  { %v5136_v40 = vmul.f32 %v1674_v39, %v1657_v60 }
 0xb67   :  { %1742 = vrot.lane.b32.xlu0 %v5136_v40, %s3164_s4 }
 0xbbd   :  { %v1739_v28 = vpop.permute.xlu2 %1738 }
 0xbbe   :  { %2865 = vmatmul.msk.f32.vlgmr.msra.gmra.mxu1 %vm584_vm0, %v1739_v28 }
 0xbbf   :  { %2336 = vmatpush.msra.mxu1 %v4904_v62 }
 0xbc1   :  { %2337 = vmatpush.msra.mxu1 %v4910_v0 }
 0xbc3   :  { %2338 = vmatpush.msra.mxu1 %v4922_v13 }
 0xbc5   :  { %2339 = vmatpush.msra.mxu1 %v4928_v15 }
 0xbd9   :  { %v1743_v41 = vpop.permute.xlu0 %1742 }
 0xbda   :  { %v1745_v34 = vsel %vm584_vm0, %v1739_v28, %v1743_v41 }
 0xbdb   :  { %2863 = vmatmul.msk.f32.vlgmr.msrb.gmra.mxu3 %vm1358_vm5, %v1745_v34 }
 0xbdc   :  { %2273 = vmatpush.msrb.mxu3 %v4950_v7 }
 0xbde   :  { %2274 = vmatpush.msrb.mxu3 %v4955_v4 }
 0xbe0   :  { %2275 = vmatpush.msrb.mxu3 %v4962_v8 }
 0xbe2   :  { %2276 = vmatpush.msrb.mxu3 %v4970_v9 }
 0xbe4   :  { %2277 = vmatpush.msrb.mxu3 %v4978_v10 }
 0xbe6   :  { %2278 = vmatpush.msrb.mxu3 %v4986_v3 }
 0xbe8   :  { %2279 = vmatpush.msrb.mxu3 %v4994_v11 }
 0xbea   :  { %2280 = vmatpush.msrb.mxu3 %v5007_v18 }
 0xc3b   :  { %v1825_v62 = vpop.f32.mrf.mxu1 }
 0xc3c   :  { %v1828_v0 = vadd.f32 %v1825_v62, %v4583_v33 }
 0xc3e   :  { %2966 = vtanh.f32 %v1828_v0  ;;  %v2866_v44 = vmul.f32 -1.442695, %v1828_v0 }
 0xc44   :  { %v2967_v13 = vpop.eup %2966 }
 0xc45   :  { %1851 = vrot.lane.b32.xlu1 %v2967_v13, %s3164_s4 }
 0xc5e   :  { %v1766_v15 = vpop.f32.mrf.mxu3 }
 0xc5f   :  { %v1767_v42 = vadd.f32 %v5047_v24, %v1766_v15  ;;  %v5878_v15 = vld [vmem:[#allocation218_spill] sm:$0xff] }
 0xc61   :  { %2968 = vtanh.f32 %v1767_v42  ;;  %v2864_v46 = vmul.f32 -1.442695, %v1767_v42 }
 0xc62   :  { %2970 = vpow2.f32 %v2866_v44 }
 0xc63   :  { %2972 = vpow2.f32 %v2864_v46 }
 0xc67   :  { %v2969_v43 = vpop.eup %2968 }
 0xc68   :  { %1791 = vrot.lane.b32.xlu2 %v2969_v43, %s3164_s4  ;;  %v2971_v45 = vpop.eup %2970 }
 0xc69   :  { %v1832_v2 = vadd.f32 1.0, %v2971_v45  ;;  %v2973_v47 = vpop.eup %2972 }
 0xc6a   :  { %v1772_v48 = vadd.f32 1.0, %v2973_v47 }
 0xc6b   :  { %2974 = vrcp.f32 %v1832_v2  ;;  %v1844_v63 = vand.u32 2147483648, %v1832_v2  ;;  %vm1838_vm2 = vweird.f32 %v1832_v2  ;;  %v1842_v57 = vand.u32 2147483647, %v1832_v2 }
 0xc6c   :  { %2976 = vrcp.f32 %v1772_v48  ;;  %v1784_v19 = vand.u32 2147483648, %v1772_v48  ;;  %vm1778_vm7 = vweird.f32 %v1772_v48  ;;  %v1782_v21 = vand.u32 2147483647, %v1772_v48 }
 0xc6d   :  { %v1845_v61 = vor.u32 1.1754944e-38, %v1844_v63  ;;  %vm1843_vm4 = vcmp.eq.f32.partialorder %v1842_v57, 8.507059e+37 }
 0xc6e   :  { %v1785_v5 = vor.u32 1.1754944e-38, %v1784_v19  ;;  %vm1783_vm9 = vcmp.eq.f32.partialorder %v1782_v21, 8.507059e+37 }
 0xc71   :  { %v2975_v33 = vpop.eup %2974 }
 0xc72   :  { %v1834_v49 = vmul.f32 %v2975_v33, %v1832_v2  ;;  %v2977_v51 = vpop.eup %2976  ;;  %vm1839_vm1 = vweird.f32 %v2975_v33 }
 0xc73   :  { %v1774_v54 = vmul.f32 %v2977_v51, %v1772_v48  ;;  %vm1840_vm3 = vmor %vm1838_vm2, %vm1839_vm1  ;;  %vm1779_vm6 = vweird.f32 %v2977_v51 }
 0xc74   :  { %v1835_v50 = vsub.f32 1.0, %v1834_v49  ;;  %vm1780_vm8 = vmor %vm1778_vm7, %vm1779_vm6 }
 0xc75   :  { %v1775_v59 = vsub.f32 1.0, %v1774_v54 }
 0xc76   :  { %v1836_v52 = vmul.f32 %v2975_v33, %v1835_v50 }
 0xc77   :  { %v1776_v1 = vmul.f32 %v2977_v51, %v1775_v59 }
 0xc78   :  { %v1837_v56 = vadd.f32 %v2975_v33, %v1836_v52 }
 0xc79   :  { %v1777_v14 = vadd.f32 %v2977_v51, %v1776_v1 }
 0xc7a   :  { %v1841_v60 = vsel %vm1840_vm3, %v2975_v33, %v1837_v56 }
 0xc7b   :  { %v1846_v16 = vsel %vm1843_vm4, %v1845_v61, %v1841_v60  ;;  %v1781_v22 = vsel %vm1780_vm8, %v2977_v51, %v1777_v14 }
 0xc7c   :  { %v1786_v27 = vsel %vm1783_vm9, %v1785_v5, %v1781_v22  ;;  %v1849_v30 = vmul.f32 %v1846_v16, %v5126_v6 }
 0xc7d   :  { %v1789_v37 = vmul.f32 %v1786_v27, %v5130_v20 }
 0xcb7   :  { %v1852_v55 = vpop.permute.xlu1 %1851 }
 0xcb8   :  { %v1854_v12 = vmul.f32 %v1852_v55, %v1846_v16 }
 0xcba   :  { %1856 = vrot.lane.b32.xlu0 %v1854_v12, %s3165_s5 }
 0xcc2   :  { %v1792_v26 = vpop.permute.xlu2 %1791 }
 0xcc3   :  { %v1794_v29 = vmul.f32 %v1792_v26, %v1786_v27 }
 0xcc5   :  { %1796 = vrot.lane.b32.xlu1 %v1794_v29, %s3165_s5 }
 0xd2c   :  { %v1857_v31 = vpop.permute.xlu0 %1856 }
 0xd2d   :  { %v5162_v35 = vadd.f32 %v1857_v31, %v1849_v30 }
 0xd2f   :  { %2978 = vtanh.f32 %v5162_v35 }
 0xd35   :  { %v2979_v36 = vpop.eup %2978 }
 0xd36   :  { %1862 = vrot.lane.b32.xlu2 %v2979_v36, %s3164_s4 }
 0xd37   :  { %v1797_v38 = vpop.permute.xlu1 %1796 }
 0xd38   :  { %v5167_v23 = vadd.f32 %v1797_v38, %v1789_v37 }
 0xd3a   :  { %2980 = vtanh.f32 %v5167_v23 }
 0xd40   :  { %v2981_v39 = vpop.eup %2980 }
 0xd41   :  { %1802 = vrot.lane.b32.xlu0 %v2981_v39, %s3164_s4 }
 0xd90   :  { %v1863_v28 = vpop.permute.xlu2 %1862 }
 0xd91   :  { %v1865_v6 = vmul.f32 %v1863_v28, %v1846_v16 }
 0xd93   :  { %1867 = vrot.lane.b32.xlu1 %v1865_v6, %s3165_s5 }
 0xdb3   :  { %v1803_v41 = vpop.permute.xlu0 %1802 }
 0xdb4   :  { %v5172_v34 = vmul.f32 %v1803_v41, %v1786_v27 }
 0xdb6   :  { %1871 = vrot.lane.b32.xlu2 %v5172_v34, %s3164_s4 }
 0xe05   :  { %v1868_v62 = vpop.permute.xlu1 %1867 }
 0xe06   :  { %2869 = vmatmul.msk.f32.vlgmr.msra.gmra.mxu0 %vm584_vm0, %v1868_v62 }
 0xe10   :  { %v1872_v20 = vpop.permute.xlu2 %1871 }
 0xe11   :  { %v1874_v0 = vsel %vm584_vm0, %v1868_v62, %v1872_v20 }
 0xe12   :  { %2867 = vmatmul.msk.f32.vlgmr.msrb.gmra.mxu2 %vm1358_vm5, %v1874_v0 }
 0xe13   :  { %2402 = vmatpush.msrb.mxu2 %v4950_v7 }
 0xe15   :  { %2403 = vmatpush.msrb.mxu2 %v4955_v4 }
 0xe17   :  { %2404 = vmatpush.msrb.mxu2 %v4962_v8 }
 0xe19   :  { %2405 = vmatpush.msrb.mxu2 %v4970_v9 }
 0xe1b   :  { %2406 = vmatpush.msrb.mxu2 %v4978_v10 }
 0xe1d   :  { %2407 = vmatpush.msrb.mxu2 %v4986_v3 }
 0xe1f   :  { %2408 = vmatpush.msrb.mxu2 %v4994_v11 }
 0xe21   :  { %2409 = vmatpush.msrb.mxu2 %v5007_v18 }
 0xe83   :  { %v1954_v13 = vpop.f32.mrf.mxu0 }
 0xe84   :  { %v1957_v42 = vadd.f32 %v1954_v13, %v5878_v15 }
 0xe86   :  { %2982 = vtanh.f32 %v1957_v42  ;;  %v2870_v9 = vmul.f32 -1.442695, %v1957_v42 }
 0xe8c   :  { %v2983_v43 = vpop.eup %2982 }
 0xe8d   :  { %1980 = vrot.lane.b32.xlu0 %v2983_v43, %s3164_s4 }
 0xe95   :  { %v1895_v7 = vpop.f32.mrf.mxu2 }
 0xe96   :  { %v1896_v4 = vadd.f32 %v5047_v24, %v1895_v7 }
 0xe98   :  { %2984 = vtanh.f32 %v1896_v4  ;;  %v2868_v11 = vmul.f32 -1.442695, %v1896_v4 }
 0xe99   :  { %2986 = vpow2.f32 %v2870_v9 }
 0xe9e   :  { %v2985_v8 = vpop.eup %2984 }
 0xe9f   :  { %1920 = vrot.lane.b32.xlu1 %v2985_v8, %s3164_s4  ;;  %v2987_v10 = vpop.eup %2986 }
 0xea0   :  { %v1961_v3 = vadd.f32 1.0, %v2987_v10 }
 0xea2   :  { %2988 = vrcp.f32 %v1961_v3  ;;  %v1973_v48 = vand.u32 2147483648, %v1961_v3  ;;  %vm1967_vm11 = vweird.f32 %v1961_v3  ;;  %v1971_v49 = vand.u32 2147483647, %v1961_v3 }
 0xea3   :  { %2990 = vpow2.f32 %v2868_v11 }
 0xea4   :  { %v1974_v52 = vor.u32 1.1754944e-38, %v1973_v48  ;;  %vm1972_vm13 = vcmp.eq.f32.partialorder %v1971_v49, 8.507059e+37 }
 0xea8   :  { %v2989_v18 = vpop.eup %2988 }
 0xea9   :  { %v1963_v44 = vmul.f32 %v2989_v18, %v1961_v3  ;;  %v2991_v45 = vpop.eup %2990  ;;  %vm1968_vm10 = vweird.f32 %v2989_v18 }
 0xeaa   :  { %v1901_v2 = vadd.f32 1.0, %v2991_v45  ;;  %vm1969_vm12 = vmor %vm1967_vm11, %vm1968_vm10 }
 0xeab   :  { %v1964_v46 = vsub.f32 1.0, %v1963_v44 }
 0xeac   :  { %2992 = vrcp.f32 %v1901_v2  ;;  %v1913_v55 = vand.u32 2147483648, %v1901_v2  ;;  %vm1907_vm15 = vweird.f32 %v1901_v2  ;;  %v1911_v16 = vand.u32 2147483647, %v1901_v2 }
 0xead   :  { %v1965_v47 = vmul.f32 %v2989_v18, %v1964_v46 }
 0xeae   :  { %v1914_v12 = vor.u32 1.1754944e-38, %v1913_v55  ;;  %vm1912_vm2 = vcmp.eq.f32.partialorder %v1911_v16, 8.507059e+37 }
 0xeaf   :  { %v1966_v33 = vadd.f32 %v2989_v18, %v1965_v47 }
 0xeb1   :  { %v1970_v51 = vsel %vm1969_vm12, %v2989_v18, %v1966_v33 }
 0xeb2   :  { %v2993_v50 = vpop.eup %2992  ;;  %v1975_v56 = vsel %vm1972_vm13, %v1974_v52, %v1970_v51 }
 0xeb3   :  { %v1903_v54 = vmul.f32 %v2993_v50, %v1901_v2  ;;  %vm1908_vm14 = vweird.f32 %v2993_v50  ;;  %v1978_v22 = vmul.f32 %v1975_v56, %v5162_v35 }
 0xeb4   :  { %vm1909_vm1 = vmor %vm1907_vm15, %vm1908_vm14 }
 0xeb5   :  { %v1904_v59 = vsub.f32 1.0, %v1903_v54 }
 0xeb7   :  { %v1905_v60 = vmul.f32 %v2993_v50, %v1904_v59 }
 0xeb9   :  { %v1906_v61 = vadd.f32 %v2993_v50, %v1905_v60 }
 0xebb   :  { %v1910_v1 = vsel %vm1909_vm1, %v2993_v50, %v1906_v61 }
 0xebc   :  { %v1915_v19 = vsel %vm1912_vm2, %v1914_v12, %v1910_v1 }
 0xebd   :  { %v1918_v29 = vmul.f32 %v1915_v19, %v5167_v23 }
 0xeff   :  { %v1981_v63 = vpop.permute.xlu0 %1980 }
 0xf00   :  { %v1983_v57 = vmul.f32 %v1981_v63, %v1975_v56 }
 0xf02   :  { %1985 = vrot.lane.b32.xlu2 %v1983_v57, %s3165_s5 }
 0xf11   :  { %v1921_v14 = vpop.permute.xlu1 %1920 }
 0xf12   :  { %v1923_v21 = vmul.f32 %v1921_v14, %v1915_v19 }
 0xf14   :  { %1925 = vrot.lane.b32.xlu0 %v1923_v21, %s3165_s5 }
 0xf5c   :  { %v1986_v5 = vpop.permute.xlu2 %1985 }
 0xf5d   :  { %v5194_v26 = vadd.f32 %v1986_v5, %v1978_v22 }
 0xf5f   :  { %2994 = vtanh.f32 %v5194_v26 }
 0xf65   :  { %v2995_v27 = vpop.eup %2994 }
 0xf66   :  { %1991 = vrot.lane.b32.xlu1 %v2995_v27, %s3164_s4 }
 0xf86   :  { %v1926_v30 = vpop.permute.xlu0 %1925 }
 0xf87   :  { %v5199_v31 = vadd.f32 %v1926_v30, %v1918_v29 }
 0xf89   :  { %2996 = vtanh.f32 %v5199_v31 }
 0xf8f   :  { %v2997_v36 = vpop.eup %2996 }
 0xf90   :  { %1931 = vrot.lane.b32.xlu2 %v2997_v36, %s3164_s4 }
 0xfd8   :  { %v1992_v37 = vpop.permute.xlu1 %1991 }
 0xfd9   :  { %v1994_v35 = vmul.f32 %v1992_v37, %v1975_v56 }
 0xfdb   :  { %1996 = vrot.lane.b32.xlu0 %v1994_v35, %s3165_s5 }
 0xfea   :  { %v1932_v38 = vpop.permute.xlu2 %1931 }
 0xfeb   :  { %v5204_v39 = vmul.f32 %v1932_v38, %v1915_v19 }
 0xfed   :  { %2000 = vrot.lane.b32.xlu1 %v5204_v39, %s3164_s4 }
0x104d   :  { %v1997_v28 = vpop.permute.xlu0 %1996 }
0x104e   :  { %2873 = vmatmul.msk.f32.vlgmr.msra.gmra.mxu3 %vm584_vm0, %v1997_v28 }
0x105f   :  { %v2001_v23 = vpop.permute.xlu1 %2000 }
0x1060   :  { %v2003_v6 = vsel %vm584_vm0, %v1997_v28, %v2001_v23 }
0x1061   :  { %2871 = vmatmul.msk.f32.vlgmr.msrb.gmra.mxu1 %vm1358_vm5, %v2003_v6 }
0x10d1   :  { %v2083_v41 = vpop.f32.mrf.mxu3 }
0x10d2   :  { %v2086_v62 = vadd.f32 %v2083_v41, %v4574_v58 }
0x10d4   :  { %2998 = vtanh.f32 %v2086_v62  ;;  %v2874_v42 = vmul.f32 -1.442695, %v2086_v62 }
0x10da   :  { %v2999_v20 = vpop.eup %2998 }
0x10db   :  { %2109 = vrot.lane.b32.xlu2 %v2999_v20, %s3164_s4 }
0x10de   :  { %v2024_v0 = vpop.f32.mrf.mxu1 }
0x10df   :  { %v2025_v13 = vadd.f32 %v5047_v24, %v2024_v0 }
0x10e1   :  { %3000 = vtanh.f32 %v2025_v13  ;;  %v2872_v10 = vmul.f32 -1.442695, %v2025_v13 }
0x10e2   :  { %3002 = vpow2.f32 %v2874_v42 }
0x10e7   :  { %v3001_v15 = vpop.eup %3000 }
0x10e8   :  { %2049 = vrot.lane.b32.xlu0 %v3001_v15, %s3164_s4  ;;  %v3003_v43 = vpop.eup %3002 }
0x10e9   :  { %v2090_v7 = vadd.f32 1.0, %v3003_v43 }
0x10eb   :  { %3004 = vrcp.f32 %v2090_v7  ;;  %v2102_v11 = vand.u32 2147483648, %v2090_v7  ;;  %vm2096_vm4 = vweird.f32 %v2090_v7  ;;  %v2100_v18 = vand.u32 2147483647, %v2090_v7 }
0x10ec   :  { %3006 = vpow2.f32 %v2872_v10 }
0x10ed   :  { %v2103_v45 = vor.u32 1.1754944e-38, %v2102_v11  ;;  %vm2101_vm7 = vcmp.eq.f32.partialorder %v2100_v18, 8.507059e+37 }
0x10f1   :  { %v3005_v4 = vpop.eup %3004 }
0x10f2   :  { %v2092_v8 = vmul.f32 %v3005_v4, %v2090_v7  ;;  %vm2097_vm3 = vweird.f32 %v3005_v4  ;;  %v3007_v33 = vpop.eup %3006 }
0x10f3   :  { %vm2098_vm6 = vmor %vm2096_vm4, %vm2097_vm3  ;;  %v2030_v48 = vadd.f32 1.0, %v3007_v33 }
0x10f4   :  { %v2093_v9 = vsub.f32 1.0, %v2092_v8 }
0x10f5   :  { %3008 = vrcp.f32 %v2030_v48  ;;  %v2042_v56 = vand.u32 2147483648, %v2030_v48  ;;  %vm2036_vm9 = vweird.f32 %v2030_v48  ;;  %v2040_v63 = vand.u32 2147483647, %v2030_v48 }
0x10f6   :  { %v2094_v58 = vmul.f32 %v3005_v4, %v2093_v9 }
0x10f7   :  { %v2043_v59 = vor.u32 1.1754944e-38, %v2042_v56  ;;  %vm2041_vm11 = vcmp.eq.f32.partialorder %v2040_v63, 8.507059e+37 }
0x10f8   :  { %v2095_v3 = vadd.f32 %v3005_v4, %v2094_v58 }
0x10fa   :  { %v2099_v44 = vsel %vm2098_vm6, %v3005_v4, %v2095_v3 }
0x10fb   :  { %v2104_v2 = vsel %vm2101_vm7, %v2103_v45, %v2099_v44  ;;  %v3009_v49 = vpop.eup %3008 }
0x10fc   :  { %v2032_v50 = vmul.f32 %v3009_v49, %v2030_v48  ;;  %vm2037_vm8 = vweird.f32 %v3009_v49  ;;  %v2107_v16 = vmul.f32 %v2104_v2, %v5194_v26 }
0x10fd   :  { %vm2038_vm10 = vmor %vm2036_vm9, %vm2037_vm8 }
0x10fe   :  { %v2033_v51 = vsub.f32 1.0, %v2032_v50 }
0x1100   :  { %v2034_v52 = vmul.f32 %v3009_v49, %v2033_v51 }
0x1102   :  { %v2035_v54 = vadd.f32 %v3009_v49, %v2034_v52 }
0x1104   :  { %v2039_v57 = vsel %vm2038_vm10, %v3009_v49, %v2035_v54 }
0x1105   :  { %v2044_v61 = vsel %vm2041_vm11, %v2043_v59, %v2039_v57 }
0x1106   :  { %v2047_v19 = vmul.f32 %v2044_v61, %v5199_v31 }
0x1135   :  { %v2110_v46 = vpop.permute.xlu2 %2109 }
0x1136   :  { %v2112_v47 = vmul.f32 %v2110_v46, %v2104_v2 }
0x1138   :  { %2114 = vrot.lane.b32.xlu1 %v2112_v47, %s3165_s5 }
0x115a   :  { %v2050_v60 = vpop.permute.xlu0 %2049 }
0x115b   :  { %v2052_v55 = vmul.f32 %v2050_v60, %v2044_v61 }
0x115d   :  { %2054 = vrot.lane.b32.xlu2 %v2052_v55, %s3165_s5 }
0x11aa   :  { %v2115_v1 = vpop.permute.xlu1 %2114 }
0x11ab   :  { %v5218_v12 = vadd.f32 %v2115_v1, %v2107_v16 }
0x11ad   :  { %3010 = vtanh.f32 %v5218_v12 }
0x11b3   :  { %v3011_v14 = vpop.eup %3010 }
0x11b4   :  { %2120 = vrot.lane.b32.xlu0 %v3011_v14, %s3164_s4 }
0x11b7   :  { %v2055_v21 = vpop.permute.xlu2 %2054 }
0x11b8   :  { %v5223_v22 = vadd.f32 %v2055_v21, %v2047_v19 }
0x11ba   :  { %3012 = vtanh.f32 %v5223_v22 }
0x11c0   :  { %v3013_v5 = vpop.eup %3012 }
0x11c1   :  { %2060 = vrot.lane.b32.xlu1 %v3013_v5, %s3164_s4 }
0x1226   :  { %v2121_v27 = vpop.permute.xlu0 %2120 }
0x1227   :  { %v2123_v26 = vmul.f32 %v2121_v27, %v2104_v2 }
0x1229   :  { %2125 = vrot.lane.b32.xlu2 %v2123_v26, %s3165_s5 }
0x1233   :  { %v2061_v29 = vpop.permute.xlu1 %2060 }
0x1234   :  { %v5228_v30 = vmul.f32 %v2061_v29, %v2044_v61 }
0x1236   :  { %2129 = vrot.lane.b32.xlu0 %v5228_v30, %s3164_s4 }
0x1283   :  { %v2126_v36 = vpop.permute.xlu2 %2125 }
0x1284   :  { %2877 = vmatmul.msk.f32.vlgmr.msra.gmra.mxu2 %vm584_vm0, %v2126_v36 }
0x12a8   :  { %v2130_v31 = vpop.permute.xlu0 %2129 }
0x12a9   :  { %v2132_v37 = vsel %vm584_vm0, %v2126_v36, %v2130_v31  ;;  %v5264_v31 = vld [vmem:[%s5460_s8] ss:$0 sm:$0xff] }
0x12aa   :  { %2875 = vmatmul.msk.f32.vlgmr.msrb.gmra.mxu0 %vm1358_vm5, %v2132_v37 }
0x1307   :  { %v2212_v35 = vpop.f32.mrf.mxu2 }
0x1308   :  { %v2215_v38 = vadd.f32 %v2212_v35, %v4580_v53 }
0x130a   :  { %3014 = vtanh.f32 %v2215_v38  ;;  %v2878_v62 = vmul.f32 -1.442695, %v2215_v38 }
0x1310   :  { %v3015_v28 = vpop.eup %3014 }
0x1311   :  { %2238 = vrot.lane.b32.xlu2 %v3015_v28, %s3164_s4 }
0x1327   :  { %v2153_v23 = vpop.f32.mrf.mxu0 }
0x1328   :  { %v2154_v6 = vadd.f32 %v5047_v24, %v2153_v23 }
0x132a   :  { %3016 = vtanh.f32 %v2154_v6  ;;  %v2876_v3 = vmul.f32 -1.442695, %v2154_v6 }
0x132b   :  { %3018 = vpow2.f32 %v2878_v62 }
0x1330   :  { %v3017_v41 = vpop.eup %3016 }
0x1331   :  { %2178 = vrot.lane.b32.xlu1 %v3017_v41, %s3164_s4  ;;  %v3019_v20 = vpop.eup %3018 }
0x1332   :  { %v2219_v0 = vadd.f32 1.0, %v3019_v20 }
0x1334   :  { %3020 = vrcp.f32 %v2219_v0  ;;  %v2231_v7 = vand.u32 2147483648, %v2219_v0  ;;  %vm2225_vm13 = vweird.f32 %v2219_v0  ;;  %v2229_v4 = vand.u32 2147483647, %v2219_v0 }
0x1335   :  { %3022 = vpow2.f32 %v2876_v3 }
0x1336   :  { %v2232_v8 = vor.u32 1.1754944e-38, %v2231_v7  ;;  %vm2230_vm15 = vcmp.eq.f32.partialorder %v2229_v4, 8.507059e+37 }
0x133a   :  { %v3021_v13 = vpop.eup %3020 }
0x133b   :  { %v2221_v15 = vmul.f32 %v3021_v13, %v2219_v0  ;;  %vm2226_vm12 = vweird.f32 %v3021_v13  ;;  %v3023_v11 = vpop.eup %3022 }
0x133c   :  { %vm2227_vm14 = vmor %vm2225_vm13, %vm2226_vm12  ;;  %v2159_v18 = vadd.f32 1.0, %v3023_v11 }
0x133d   :  { %v2222_v42 = vsub.f32 1.0, %v2221_v15 }
0x133e   :  { %3024 = vrcp.f32 %v2159_v18  ;;  %v2171_v33 = vand.u32 2147483648, %v2159_v18  ;;  %vm2165_vm2 = vweird.f32 %v2159_v18  ;;  %v2169_v48 = vand.u32 2147483647, %v2159_v18 }
0x133f   :  { %v2223_v53 = vmul.f32 %v3021_v13, %v2222_v42 }
0x1340   :  { %v2172_v50 = vor.u32 1.1754944e-38, %v2171_v33  ;;  %vm2170_vm4 = vcmp.eq.f32.partialorder %v2169_v48, 8.507059e+37 }
0x1341   :  { %v2224_v43 = vadd.f32 %v3021_v13, %v2223_v53 }
0x1343   :  { %v2228_v24 = vsel %vm2227_vm14, %v3021_v13, %v2224_v43 }
0x1344   :  { %v2233_v58 = vsel %vm2230_vm15, %v2232_v8, %v2228_v24  ;;  %v3025_v44 = vpop.eup %3024 }
0x1345   :  { %v2161_v45 = vmul.f32 %v3025_v44, %v2159_v18  ;;  %vm2166_vm1 = vweird.f32 %v3025_v44  ;;  %v2236_v56 = vmul.f32 %v2233_v58, %v5218_v12 }
0x1346   :  { %vm2167_vm3 = vmor %vm2165_vm2, %vm2166_vm1 }
0x1347   :  { %v2162_v46 = vsub.f32 1.0, %v2161_v45 }
0x1349   :  { %v2163_v2 = vmul.f32 %v3025_v44, %v2162_v46 }
0x134b   :  { %v2164_v47 = vadd.f32 %v3025_v44, %v2163_v2 }
0x134d   :  { %v2168_v49 = vsel %vm2167_vm3, %v3025_v44, %v2164_v47 }
0x134e   :  { %v2173_v52 = vsel %vm2170_vm4, %v2172_v50, %v2168_v49 }
0x134f   :  { %v2176_v60 = vmul.f32 %v2173_v52, %v5223_v22 }
0x136b   :  { %v2239_v9 = vpop.permute.xlu2 %2238 }
0x136c   :  { %v2241_v10 = vmul.f32 %v2239_v9, %v2233_v58 }
0x136e   :  { %2243 = vrot.lane.b32.xlu1 %v2241_v10, %s3165_s5 }
0x13a3   :  { %v2179_v51 = vpop.permute.xlu1 %2178 }
0x13a4   :  { %v2181_v54 = vmul.f32 %v2179_v51, %v2173_v52 }
0x13a6   :  { %2183 = vrot.lane.b32.xlu0 %v2181_v54, %s3165_s5 }
0x13e0   :  { %v2244_v63 = vpop.permute.xlu1 %2243 }
0x13e1   :  { %v5242_v57 = vadd.f32 %v2244_v63, %v2236_v56 }
0x13e3   :  { %3026 = vtanh.f32 %v5242_v57 }
0x13e9   :  { %v3027_v59 = vpop.eup %3026 }
0x13ea   :  { %2249 = vrot.lane.b32.xlu0 %v3027_v59, %s3164_s4 }
0x1418   :  { %v2184_v61 = vpop.permute.xlu0 %2183 }
0x1419   :  { %v5247_v55 = vadd.f32 %v2184_v61, %v2176_v60 }
0x141b   :  { %3028 = vtanh.f32 %v5247_v55 }
0x1421   :  { %v3029_v16 = vpop.eup %3028 }
0x1422   :  { %2189 = vrot.lane.b32.xlu2 %v3029_v16, %s3164_s4  ;;  %v2453_v16 = vld [vmem:[%s5461_s9 + $0x10] sm:$0xff] }
0x145c   :  { %v2250_v1 = vpop.permute.xlu0 %2249 }
0x145d   :  { %v2252_v12 = vmul.f32 %v2250_v1, %v2233_v58  ;;  %v2452_v1 = vld [vmem:[%s5461_s9 + $0x8] sm:$0xff] }
0x145f   :  { %2254 = vrot.lane.b32.xlu1 %v2252_v12, %s3165_s5  ;;  %v2451_v12 = vld [vmem:[%s5461_s9] sm:$0xff] }
0x147c   :  { %v2190_v14 = vpop.permute.xlu2 %2189 }
0x147d   :  { %v5252_v19 = vmul.f32 %v2190_v14, %v2173_v52 }
0x147f   :  { %2258 = vrot.lane.b32.xlu2 %v5252_v19, %s3164_s4 }
0x14d1   :  { %v2255_v21 = vpop.permute.xlu1 %2254 }
0x14d2   :  { %2881 = vmatmul.msk.f32.vlgmr.msra.gmra.mxu1 %vm584_vm0, %v2255_v21 }
0x14d9   :  { %v2259_v22 = vpop.permute.xlu2 %2258 }
0x14da   :  { %v2261_v5 = vsel %vm584_vm0, %v2255_v21, %v2259_v22 }
0x14db   :  { %2879 = vmatmul.msk.f32.vlgmr.msrb.gmra.mxu3 %vm1358_vm5, %v2261_v5 }
0x154f   :  { %v2341_v27 = vpop.f32.mrf.mxu1 }
0x1550   :  { %v2344_v26 = vadd.f32 %v2341_v27, %v4586_v17 }
0x1552   :  { %3030 = vtanh.f32 %v2344_v26  ;;  %v2882_v38 = vmul.f32 -1.442695, %v2344_v26 }
0x1558   :  { %v3031_v29 = vpop.eup %3030 }
0x1559   :  { %2367 = vrot.lane.b32.xlu1 %v3031_v29, %s3164_s4 }
0x155e   :  { %v2282_v36 = vpop.f32.mrf.mxu3 }
0x155f   :  { %v2283_v37 = vadd.f32 %v5264_v31, %v2282_v36  ;;  %v2540_v36 = vlaneseq }
0x1561   :  { %3032 = vtanh.f32 %v2283_v37  ;;  %v2880_v23 = vmul.f32 -1.442695, %v2283_v37 }
0x1562   :  { %3034 = vpow2.f32 %v2882_v38  ;;  %v5309_v38 = vand.u32 127, %v2540_v36 }
0x1567   :  { %v3033_v35 = vpop.eup %3032 }
0x1568   :  { %2307 = vrot.lane.b32.xlu0 %v3033_v35, %s3164_s4  ;;  %v3035_v28 = vpop.eup %3034 }
0x1569   :  { %v2348_v17 = vadd.f32 1.0, %v3035_v28 }
0x156b   :  { %3036 = vrcp.f32 %v2348_v17  ;;  %v2360_v53 = vand.u32 2147483648, %v2348_v17  ;;  %vm2354_vm7 = vweird.f32 %v2348_v17  ;;  %v2358_v43 = vand.u32 2147483647, %v2348_v17 }
0x156c   :  { %3038 = vpow2.f32 %v2880_v23 }
0x156d   :  { %v2361_v24 = vor.u32 1.1754944e-38, %v2360_v53  ;;  %vm2359_vm9 = vcmp.eq.f32.partialorder %v2358_v43, 8.507059e+37 }
0x1571   :  { %v3037_v6 = vpop.eup %3036 }
0x1572   :  { %v3039_v41 = vpop.eup %3038  ;;  %v2350_v62 = vmul.f32 %v3037_v6, %v2348_v17  ;;  %vm2355_vm6 = vweird.f32 %v3037_v6 }
0x1573   :  { %v2288_v20 = vadd.f32 1.0, %v3039_v41  ;;  %vm2356_vm8 = vmor %vm2354_vm7, %vm2355_vm6 }
0x1574   :  { %v2351_v0 = vsub.f32 1.0, %v2350_v62 }
0x1575   :  { %3040 = vrcp.f32 %v2288_v20  ;;  %v2300_v18 = vand.u32 2147483648, %v2288_v20  ;;  %vm2294_vm11 = vweird.f32 %v2288_v20  ;;  %v2298_v44 = vand.u32 2147483647, %v2288_v20 }
0x1576   :  { %v2352_v13 = vmul.f32 %v3037_v6, %v2351_v0 }
0x1577   :  { %v2301_v46 = vor.u32 1.1754944e-38, %v2300_v18  ;;  %vm2299_vm13 = vcmp.eq.f32.partialorder %v2298_v44, 8.507059e+37 }
0x1578   :  { %v2353_v42 = vadd.f32 %v3037_v6, %v2352_v13 }
0x157a   :  { %v2357_v4 = vsel %vm2356_vm8, %v3037_v6, %v2353_v42 }
0x157b   :  { %v3041_v15 = vpop.eup %3040  ;;  %v2362_v9 = vsel %vm2359_vm9, %v2361_v24, %v2357_v4 }
0x157c   :  { %v2290_v7 = vmul.f32 %v3041_v15, %v2288_v20  ;;  %vm2295_vm10 = vweird.f32 %v3041_v15  ;;  %v2365_v51 = vmul.f32 %v2362_v9, %v5242_v57  ;;  %v2454_v57 = vld [vmem:[%s5461_s9 + $0x18] sm:$0xff] }
0x157d   :  { %vm2296_vm12 = vmor %vm2294_vm11, %vm2295_vm10  ;;  %2508 = vmatpush.msra.mxu0 %v2454_v57 }
0x157e   :  { %v2291_v58 = vsub.f32 1.0, %v2290_v7 }
0x157f   :  { %2509 = vmatpush.msra.mxu0 %v2453_v16 }
0x1580   :  { %v2292_v3 = vmul.f32 %v3041_v15, %v2291_v58 }
0x1581   :  { %2510 = vmatpush.msra.mxu0 %v2452_v1 }
0x1582   :  { %v2293_v11 = vadd.f32 %v3041_v15, %v2292_v3 }
0x1583   :  { %2511 = vmatpush.msra.mxu0 %v2451_v12 }
0x1584   :  { %v2297_v45 = vsel %vm2296_vm12, %v3041_v15, %v2293_v11 }
0x1585   :  { %v2302_v47 = vsel %vm2299_vm13, %v2301_v46, %v2297_v45 }
0x1586   :  { %v2305_v48 = vmul.f32 %v2302_v47, %v5247_v55 }
0x15cb   :  { %v2368_v8 = vpop.permute.xlu1 %2367 }
0x15cc   :  { %v2370_v10 = vmul.f32 %v2368_v8, %v2362_v9 }
0x15ce   :  { %2372 = vrot.lane.b32.xlu0 %v2370_v10, %s3165_s5 }
0x15da   :  { %v2308_v2 = vpop.permute.xlu0 %2307 }
0x15db   :  { %v2310_v33 = vmul.f32 %v2308_v2, %v2302_v47 }
0x15dd   :  { %2312 = vrot.lane.b32.xlu2 %v2310_v33, %s3165_s5 }
0x1637   :  { %v2313_v49 = vpop.permute.xlu2 %2312 }
0x1638   :  { %v5271_v50 = vadd.f32 %v2313_v49, %v2305_v48 }
0x163a   :  { %3042 = vtanh.f32 %v5271_v50 }
0x1640   :  { %v3043_v52 = vpop.eup %3042  ;;  %v2373_v54 = vpop.permute.xlu0 %2372 }
0x1641   :  { %v2375_v56 = vadd.f32 %v2373_v54, %v2365_v51  ;;  %2318 = vrot.lane.b32.xlu1 %v3043_v52, %s3164_s4 }
0x1643   :  { %3044 = vtanh.f32 %v2375_v56 }
0x1649   :  { %v3045_v63 = vpop.eup %3044 }
0x164a   :  { %2378 = vrot.lane.b32.xlu2 %v3045_v63, %s3164_s4 }
0x16a4   :  { %v2379_v59 = vpop.permute.xlu2 %2378 }
0x16a5   :  { %v2381_v60 = vmul.f32 %v2379_v59, %v2362_v9 }
0x16a7   :  { %2383 = vrot.lane.b32.xlu0 %v2381_v60, %s3165_s5 }
0x16b3   :  { %v2319_v61 = vpop.permute.xlu1 %2318 }
0x16b4   :  { %v2321_v55 = vmul.f32 %v2319_v61, %v2302_v47 }
0x16b6   :  { %2387 = vrot.lane.b32.xlu1 %v2321_v55, %s3164_s4 }
0x16be   :  { %2460 = vrot.lane.b32.xlu1 %v5064_v25, %s3165_s5 }
0x1719   :  { %v2384_v25 = vpop.permute.xlu0 %2383 }
0x1728   :  { %v2388_v14 = vpop.permute.xlu1 %2387 }
0x1729   :  { %v2390_v21 = vsel %vm584_vm0, %v2384_v25, %v2388_v14 }
0x172a   :  { %2883 = vmatmul.msk.f32.vlgmr.msrb.gmra.mxu2 %vm1358_vm5, %v2390_v21  ;;  %vm2542_vm5 = vcmp.lt.s32.totalorder %v5309_v38, 64 }
0x1730   :  { %v2461_v22 = vpop.permute.xlu1 %2460 }
0x1731   :  { %2885 = vmatmul.msk.f32.vlgmr.msra.gmra.mxu0 %vm584_vm0, %v2461_v22 }
0x17ad   :  { %v2411_v5 = vpop.f32.mrf.mxu2 }
0x17ae   :  { %v2412_v27 = vadd.f32 %v5264_v31, %v2411_v5  ;;  %v5307_v31 = vld [vmem:[%s5462_s10] ss:$0 sm:$0xff]  ;;  %v2513_v35 = vpop.f32.mrf.mxu0  ;;  %s3166_s10 = smov [#allocation4]  }
0x17b0   :  { %3046 = vtanh.f32 %v2412_v27  ;;  %v2884_v29 = vmul.f32 -1.442695, %v2412_v27 }
0x17b2   :  { %3048 = vpow2.f32 %v2884_v29 }
0x17b6   :  { %v3047_v26 = vpop.eup %3046 }
0x17b7   :  { %2436 = vrot.lane.b32.xlu2 %v3047_v26, %s3164_s4 }
0x17b8   :  { %v3049_v37 = vpop.eup %3048 }
0x17b9   :  { %v2417_v28 = vadd.f32 1.0, %v3049_v37 }
0x17bb   :  { %3050 = vrcp.f32 %v2417_v28  ;;  %v2429_v62 = vand.u32 2147483648, %v2417_v28  ;;  %vm2423_vm15 = vweird.f32 %v2417_v28  ;;  %v2427_v20 = vand.u32 2147483647, %v2417_v28 }
0x17bd   :  { %v2430_v13 = vor.u32 1.1754944e-38, %v2429_v62  ;;  %vm2428_vm2 = vcmp.eq.f32.partialorder %v2427_v20, 8.507059e+37 }
0x17bf   :  { %2462 = vrot.lane.b32.xlu2 %v5100_v32, %s3165_s5  ;;  %v2514_v32 = vadd.f32 %v5307_v31, %v2513_v35 }
0x17c7   :  { %2466 = vrot.lane.b32.xlu2 %v5172_v34, %s3165_s5  ;;  %v5315_v34 = vsel %vm2542_vm5, %v2514_v32, -1e+30 }
0x17cf   :  { %2472 = vrot.lane.b32.xlu2 %v5252_v19, %s3165_s5  ;;  %v3051_v19 = vpop.eup %3050 }
0x17d0   :  { %v2419_v17 = vmul.f32 %v3051_v19, %v2417_v28  ;;  %vm2424_vm14 = vweird.f32 %v3051_v19 }
0x17d1   :  { %vm2425_vm1 = vmor %vm2423_vm15, %vm2424_vm14 }
0x17d2   :  { %v2420_v23 = vsub.f32 1.0, %v2419_v17 }
0x17d4   :  { %v2421_v6 = vmul.f32 %v3051_v19, %v2420_v23 }
0x17d6   :  { %v2422_v41 = vadd.f32 %v3051_v19, %v2421_v6 }
0x17d8   :  { %v2426_v0 = vsel %vm2425_vm1, %v3051_v19, %v2422_v41 }
0x17d9   :  { %v2431_v42 = vsel %vm2428_vm2, %v2430_v13, %v2426_v0 }
0x17da   :  { %v2434_v7 = vmul.f32 %v2431_v42, %v5271_v50 }
0x17f8   :  { %2552 = vmax.xlane.f32.xlu2 %v5315_v34 }
0x1811   :  { %v2437_v15 = vpop.permute.xlu2 %2436 }
0x1812   :  { %v2439_v53 = vmul.f32 %v2437_v15, %v2431_v42 }
0x1814   :  { %2441 = vrot.lane.b32.xlu0 %v2439_v53, %s3165_s5 }
0x1819   :  { %v2463_v43 = vpop.permute.xlu2 %2462 }
0x181a   :  { %2886 = vmatmul.msk.f32.gmra.mxu0 %vm584_vm0, %v2463_v43 }
0x181c   :  { %2464 = vrot.lane.b32.xlu0 %v5136_v40, %s3165_s5 }
0x1821   :  { %v2467_v58 = vpop.permute.xlu2 %2466 }
0x1824   :  { %2468 = vrot.lane.b32.xlu0 %v5204_v39, %s3165_s5 }
0x1829   :  { %v2473_v46 = vpop.permute.xlu2 %2472 }
0x182c   :  { %2474 = vrot.lane.b32.xlu0 %v2321_v55, %s3165_s5 }
0x186b   :  { %v2553_v56 = vpop.xlane.xlu2 %2552 }
0x186c   :  { %v5353_v61 = vsub.f32 %v5315_v34, %v2553_v56 }
0x186e   :  { %v2579_v16 = vmul.f32 1.442695, %v5353_v61 }
0x1886   :  { %v2442_v4 = vpop.permute.xlu0 %2441 }
0x1887   :  { %v2444_v24 = vadd.f32 %v2442_v4, %v2434_v7 }
0x1889   :  { %3052 = vtanh.f32 %v2444_v24 }
0x188a   :  { %3054 = vpow2.f32 %v2579_v16 }
0x188e   :  { %v2465_v8 = vpop.permute.xlu0 %2464 }
0x188f   :  { %v3053_v9 = vpop.eup %3052  ;;  %2887 = vmatmul.msk.f32.gmra.mxu0 %vm584_vm0, %v2465_v8 }
0x1890   :  { %2447 = vrot.lane.b32.xlu1 %v3053_v9, %s3164_s4  ;;  %v5366_v36 = vpop.eup %3054  ;;  %s2799_s4 = sshll.u32 %s3166_s10, 4  ;;  %s2800_s4 = int_to_ptr.vmem [resolvable:$true] %s2799_s4 }
0x1896   :  { %v2469_v3 = vpop.permute.xlu0 %2468 }
0x1897   :  { %v2516_v10 = vpop.f32.mrf.mxu0  ;;  %2888 = vmatmul.msk.f32.gmra.mxu0 %vm584_vm0, %v2467_v58 }
0x1898   :  { %v2517_v40 = vadd.f32 %v5307_v31, %v2516_v10  ;;  %2470 = vrot.lane.b32.xlu1 %v5228_v30, %s3165_s5 }
0x189a   :  { %v2544_v39 = vsel %vm2542_vm5, %v2517_v40, -1e+30 }
0x189b   :  { %2554 = vmax.xlane.f32.xlu0 %v2544_v39 }
0x189e   :  { %v2475_v33 = vpop.permute.xlu0 %2474 }
0x189f   :  { %2889 = vmatmul.msk.f32.gmra.mxu0 %vm584_vm0, %v2469_v3 }
0x1902   :  { %v2448_v11 = vpop.permute.xlu1 %2447 }
0x1903   :  { %v2450_v18 = vmul.f32 %v2448_v11, %v2431_v42 }
0x1905   :  { %2476 = vrot.lane.b32.xlu1 %v2450_v18, %s3165_s5 }
0x190a   :  { %v2471_v44 = vpop.permute.xlu1 %2470 }
0x190b   :  { %2890 = vmatmul.msk.f32.gmra.mxu0 %vm584_vm0, %v2471_v44 }
0x190c   :  { %v2519_v45 = vpop.f32.mrf.mxu0 }
0x190d   :  { %v2520_v51 = vadd.f32 %v5307_v31, %v2519_v45 }
0x190e   :  { %v2555_v1 = vpop.xlane.xlu0 %2554 }
0x190f   :  { %v2545_v52 = vsel %vm2542_vm5, %v2520_v51, -1e+30  ;;  %v5359_v14 = vsub.f32 %v2544_v39, %v2555_v1 }
0x1911   :  { %v2581_v22 = vmul.f32 1.442695, %v5359_v14 }
0x1913   :  { %2891 = vmatmul.msk.f32.gmra.mxu0 %vm584_vm0, %v2473_v46  ;;  %3056 = vpow2.f32 %v2581_v22 }
0x1914   :  { %v2522_v2 = vpop.f32.mrf.mxu0 }
0x1915   :  { %v2523_v30 = vadd.f32 %v5307_v31, %v2522_v2 }
0x1917   :  { %v2546_v47 = vsel %vm2542_vm5, %v2523_v30, -1e+30 }
0x1918   :  { %2558 = vmax.xlane.f32.xlu2 %v2546_v47 }
0x1919   :  { %v5374_v32 = vpop.eup %3056 }
0x191b   :  { %2892 = vmatmul.msk.f32.gmra.mxu0 %vm584_vm0, %v2475_v33 }
0x191c   :  { %v2525_v48 = vpop.f32.mrf.mxu0 }
0x191d   :  { %v2526_v49 = vadd.f32 %v5307_v31, %v2525_v48 }
0x191f   :  { %v2547_v50 = vsel %vm2542_vm5, %v2526_v49, -1e+30 }
0x1920   :  { %2560 = vmax.xlane.f32.xlu2 %v2547_v50 }
0x192f   :  { %2556 = vmax.xlane.f32.xlu1 %v2545_v52 }
0x1977   :  { %v2477_v54 = vpop.permute.xlu1 %2476 }
0x1978   :  { %2893 = vmatmul.msk.f32.gmra.mxu0 %vm584_vm0, %v2477_v54 }
0x1988   :  { %v2528_v63 = vpop.f32.mrf.mxu0 }
0x1989   :  { %v2529_v59 = vadd.f32 %v5307_v31, %v2528_v63 }
0x198b   :  { %v2548_v60 = vsel %vm2542_vm5, %v2529_v59, -1e+30  ;;  %v2559_v55 = vpop.xlane.xlu2 %2558 }
0x198c   :  { %2562 = vmax.xlane.f32.xlu0 %v2548_v60  ;;  %v5361_v21 = vsub.f32 %v2546_v47, %v2559_v55 }
0x198e   :  { %v2585_v27 = vmul.f32 1.442695, %v5361_v21 }
0x1990   :  { %v2531_v57 = vpop.f32.mrf.mxu0  ;;  %3058 = vpow2.f32 %v2585_v27 }
0x1991   :  { %v2532_v12 = vadd.f32 %v5307_v31, %v2531_v57 }
0x1993   :  { %v2549_v25 = vsel %vm2542_vm5, %v2532_v12, -1e+30  ;;  %v2561_v29 = vpop.xlane.xlu2 %2560 }
0x1994   :  { %2564 = vmax.xlane.f32.xlu1 %v2549_v25  ;;  %v5371_v35 = vsub.f32 %v2547_v50, %v2561_v29 }
0x1996   :  { %v2587_v28 = vmul.f32 1.442695, %v5371_v35  ;;  %v5376_v34 = vpop.eup %3058 }
0x1998   :  { %v2534_v5 = vpop.f32.mrf.mxu0  ;;  %3060 = vpow2.f32 %v2587_v28 }
0x1999   :  { %v2535_v26 = vadd.f32 %v5307_v31, %v2534_v5 }
0x199b   :  { %v2550_v37 = vsel %vm2542_vm5, %v2535_v26, -1e+30 }
0x199c   :  { %2566 = vmax.xlane.f32.xlu2 %v2550_v37  ;;  %2597 = vadd.xlane.f32.xlu1 %v5366_v36 }
0x199e   :  { %v5380_v19 = vpop.eup %3060 }
0x19a2   :  { %v2557_v17 = vpop.xlane.xlu1 %2556 }
0x19a3   :  { %v5383_v23 = vsub.f32 %v2545_v52, %v2557_v17 }
0x19a4   :  { %2599 = vadd.xlane.f32.xlu2 %v5374_v32  ;;  %2603 = vadd.xlane.f32.xlu1 %v5376_v34 }
0x19a5   :  { %v2583_v41 = vmul.f32 1.442695, %v5383_v23 }
0x19a7   :  { %3062 = vpow2.f32 %v2583_v41 }
0x19ac   :  { %2605 = vadd.xlane.f32.xlu2 %v5380_v19 }
0x19ad   :  { %v5392_v13 = vpop.eup %3062 }
0x19f5   :  { %v2537_v6 = vpop.f32.mrf.mxu0 }
0x19f6   :  { %v2538_v62 = vadd.f32 %v5307_v31, %v2537_v6 }
0x19f8   :  { %v5389_v20 = vsel %vm2542_vm5, %v2538_v62, -1e+30 }
0x19f9   :  { %2568 = vmax.xlane.f32.xlu0 %v5389_v20 }
0x19ff   :  { %v2563_v0 = vpop.xlane.xlu0 %2562 }
0x1a00   :  { %v5394_v15 = vsub.f32 %v2548_v60, %v2563_v0 }
0x1a01   :  { %2601 = vadd.xlane.f32.xlu0 %v5392_v13 }
0x1a02   :  { %v2589_v42 = vmul.f32 1.442695, %v5394_v15 }
0x1a04   :  { %3064 = vpow2.f32 %v2589_v42 }
0x1a07   :  { %v2565_v53 = vpop.xlane.xlu1 %2564 }
0x1a08   :  { %v5398_v43 = vsub.f32 %v2549_v25, %v2565_v53 }
0x1a0a   :  { %v5400_v31 = vpop.eup %3064  ;;  %v2591_v38 = vmul.f32 1.442695, %v5398_v43 }
0x1a0b   :  { %2607 = vadd.xlane.f32.xlu0 %v5400_v31 }
0x1a0c   :  { %3066 = vpow2.f32 %v2591_v38 }
0x1a0f   :  { %v2567_v7 = vpop.xlane.xlu2 %2566  ;;  %v2598_v4 = vpop.xlane.xlu1 %2597 }
0x1a10   :  { %v5404_v24 = vsub.f32 %v2550_v37, %v2567_v7  ;;  %3068 = vrcp.f32 %v2598_v4  ;;  %v2626_v45 = vand.u32 2147483648, %v2598_v4  ;;  %v2624_v30 = vand.u32 2147483647, %v2598_v4 }
0x1a11   :  { %3070 = vlog2.f32 %v2598_v4  ;;  %vm2620_vm3 = vweird.f32 %v2598_v4 }
0x1a12   :  { %v5406_v8 = vpop.eup %3066  ;;  %v2593_v9 = vmul.f32 1.442695, %v5404_v24  ;;  %v2627_v48 = vor.u32 1.1754944e-38, %v2626_v45  ;;  %vm2625_vm6 = vcmp.eq.f32.partialorder %v2624_v30, 8.507059e+37 }
0x1a13   :  { %2609 = vadd.xlane.f32.xlu1 %v5406_v8 }
0x1a14   :  { %3072 = vpow2.f32 %v2593_v9 }
0x1a16   :  { %v3069_v58 = vpop.eup %3068 }
0x1a17   :  { %v3071_v10 = vpop.eup %3070  ;;  %v2616_v40 = vmul.f32 %v3069_v58, %v2598_v4  ;;  %v2600_v39 = vpop.xlane.xlu2 %2599  ;;  %vm2621_vm0 = vweird.f32 %v3069_v58 }
0x1a18   :  { %v5410_v3 = vpop.xlane.xlu1 %2603  ;;  %v2760_v11 = vmul.f32 0.6931472, %v3071_v10  ;;  %3074 = vrcp.f32 %v2600_v39  ;;  %vm2622_vm4 = vmor %vm2620_vm3, %vm2621_vm0  ;;  %v2638_v57 = vand.u32 2147483647, %v2600_v39  ;;  %v2640_v16 = vand.u32 2147483648, %v2600_v39 }
0x1a19   :  { %v2617_v18 = vsub.f32 1.0, %v2616_v40  ;;  %3076 = vlog2.f32 %v2600_v39  ;;  %vm2634_vm8 = vweird.f32 %v2600_v39  ;;  %v2668_v5 = vand.u32 2147483648, %v5410_v3 }
0x1a1a   :  { %v5412_v44 = vpop.eup %3072  ;;  %v2777_v46 = vsub.f32 %v5353_v61, %v2760_v11  ;;  %3078 = vrcp.f32 %v5410_v3  ;;  %vm2662_vm11 = vweird.f32 %v5410_v3  ;;  %vm2639_vm12 = vcmp.eq.f32.partialorder %v2638_v57, 8.507059e+37 }
0x1a1b   :  { %v2618_v2 = vmul.f32 %v3069_v58, %v2617_v18  ;;  %3080 = vlog2.f32 %v5410_v3  ;;  %2611 = vadd.xlane.f32.xlu2 %v5412_v44  ;;  %v2669_v62 = vor.u32 1.1754944e-38, %v2668_v5 }
0x1a1c   :  { %2786 = vst [vmem:[#allocation4] sm:$0xff] %v2777_v46 }
0x1a1d   :  { %v2619_v47 = vadd.f32 %v3069_v58, %v2618_v2 }
0x1a1e   :  { %v3075_v33 = vpop.eup %3074 }
0x1a1f   :  { %v3077_v49 = vpop.eup %3076  ;;  %v2623_v50 = vsel %vm2622_vm4, %v3069_v58, %v2619_v47  ;;  %v2630_v51 = vmul.f32 %v3075_v33, %v2600_v39  ;;  %v2606_v52 = vpop.xlane.xlu2 %2605  ;;  %vm2635_vm7 = vweird.f32 %v3075_v33 }
0x1a20   :  { %v3079_v54 = vpop.eup %3078  ;;  %v2628_v56 = vsel %vm2625_vm6, %v2627_v48, %v2623_v50  ;;  %v2762_v63 = vmul.f32 0.6931472, %v3077_v49  ;;  %3082 = vrcp.f32 %v2606_v52  ;;  %vm2636_vm10 = vmor %vm2634_vm8, %vm2635_vm7  ;;  %v2682_v7 = vand.u32 2147483648, %v2606_v52 }
0x1a21   :  { %v3081_v59 = vpop.eup %3080  ;;  %v2741_v60 = vmul.f32 %v5366_v36, %v2628_v56  ;;  %v2631_v61 = vsub.f32 1.0, %v2630_v51  ;;  %v2658_v55 = vmul.f32 %v3079_v54, %v5410_v3  ;;  %3084 = vlog2.f32 %v2606_v52 }
0x1a22   :  { %v2778_v1 = vsub.f32 %v5359_v14, %v2762_v63  ;;  %v2766_v12 = vmul.f32 0.6931472, %v3081_v59  ;;  %vm2663_vm9 = vweird.f32 %v3079_v54  ;;  %v2666_v36 = vand.u32 2147483647, %v5410_v3 }
0x1a23   :  { %2750 = vst [vmem:[#allocation6] sm:$0xff] %v2741_v60  ;;  %v2632_v25 = vmul.f32 %v3075_v33, %v2631_v61  ;;  %v2659_v22 = vsub.f32 1.0, %v2658_v55  ;;  %v2641_v14 = vor.u32 1.1754944e-38, %v2640_v16  ;;  %vm2664_vm13 = vmor %vm2662_vm11, %vm2663_vm9  ;;  %v2680_v10 = vand.u32 2147483647, %v2606_v52 }
0x1a24   :  { %2787 = vst [vmem:[#allocation4 + $0x8] sm:$0xff] %v2778_v1  ;;  %v2780_v27 = vsub.f32 %v5361_v21, %v2766_v12  ;;  %vm2667_vm5 = vcmp.eq.f32.partialorder %v2666_v36, 8.507059e+37  ;;  %vm2676_vm15 = vweird.f32 %v2606_v52  ;;  %v2683_v3 = vor.u32 1.1754944e-38, %v2682_v7 }
0x1a25   :  { %v2633_v26 = vadd.f32 %v3075_v33, %v2632_v25  ;;  %v2660_v29 = vmul.f32 %v3079_v54, %v2659_v22  ;;  %vm2681_vm2 = vcmp.eq.f32.partialorder %v2680_v10, 8.507059e+37 }
0x1a26   :  { %v3083_v37 = vpop.eup %3082  ;;  %2789 = vst [vmem:[#allocation4 + $0x18] sm:$0xff] %v2780_v27 }
0x1a27   :  { %v2637_v28 = vsel %vm2636_vm10, %v3075_v33, %v2633_v26  ;;  %v2661_v17 = vadd.f32 %v3079_v54, %v2660_v29  ;;  %v2672_v6 = vmul.f32 %v3083_v37, %v2606_v52  ;;  %v3085_v0 = vpop.eup %3084  ;;  %vm2677_vm14 = vweird.f32 %v3083_v37 }
0x1a28   :  { %v2642_v41 = vsel %vm2639_vm12, %v2641_v14, %v2637_v28  ;;  %v2768_v4 = vmul.f32 0.6931472, %v3085_v0  ;;  %vm2678_vm1 = vmor %vm2676_vm15, %vm2677_vm14 }
0x1a29   :  { %v2742_v21 = vmul.f32 %v5374_v32, %v2642_v41  ;;  %v2665_v42 = vsel %vm2664_vm13, %v3079_v54, %v2661_v17  ;;  %v2673_v53 = vsub.f32 1.0, %v2672_v6 }
0x1a2a   :  { %v2670_v38 = vsel %vm2667_vm5, %v2669_v62, %v2665_v42  ;;  %v2781_v40 = vsub.f32 %v5371_v35, %v2768_v4 }
0x1a2b   :  { %2751 = vst [vmem:[#allocation6 + $0x8] sm:$0xff] %v2742_v21  ;;  %v2744_v9 = vmul.f32 %v5376_v34, %v2670_v38  ;;  %v2674_v58 = vmul.f32 %v3083_v37, %v2673_v53 }
0x1a2c   :  { %2790 = vst [vmem:[#allocation4 + $0x20] sm:$0xff] %v2781_v40 }
0x1a2d   :  { %2753 = vst [vmem:[#allocation6 + $0x18] sm:$0xff] %v2744_v9  ;;  %v2675_v39 = vadd.f32 %v3083_v37, %v2674_v58 }
0x1a2f   :  { %v2679_v32 = vsel %vm2678_vm1, %v3083_v37, %v2675_v39 }
0x1a30   :  { %v2684_v11 = vsel %vm2681_vm2, %v2683_v3, %v2679_v32 }
0x1a31   :  { %v2745_v18 = vmul.f32 %v5380_v19, %v2684_v11 }
0x1a33   :  { %2754 = vst [vmem:[#allocation6 + $0x20] sm:$0xff] %v2745_v18 }
0x1a6c   :  { %v2569_v45 = vpop.xlane.xlu0 %2568 }
0x1a6d   :  { %v5430_v34 = vsub.f32 %v5389_v20, %v2569_v45 }
0x1a6f   :  { %v2595_v46 = vmul.f32 1.442695, %v5430_v34 }
0x1a71   :  { %3086 = vpow2.f32 %v2595_v46 }
0x1a74   :  { %v2602_v35 = vpop.xlane.xlu0 %2601 }
0x1a75   :  { %3088 = vrcp.f32 %v2602_v35  ;;  %v2654_v50 = vand.u32 2147483648, %v2602_v35  ;;  %v2652_v52 = vand.u32 2147483647, %v2602_v35  ;;  %vm2648_vm3 = vweird.f32 %v2602_v35 }
0x1a76   :  { %3090 = vlog2.f32 %v2602_v35 }
0x1a77   :  { %v5433_v2 = vpop.eup %3086  ;;  %v2655_v56 = vor.u32 1.1754944e-38, %v2654_v50  ;;  %vm2653_vm6 = vcmp.eq.f32.partialorder %v2652_v52, 8.507059e+37 }
0x1a78   :  { %2613 = vadd.xlane.f32.xlu0 %v5433_v2 }
0x1a7b   :  { %v3089_v30 = vpop.eup %3088 }
0x1a7c   :  { %v3091_v47 = vpop.eup %3090  ;;  %v2644_v33 = vmul.f32 %v3089_v30, %v2602_v35  ;;  %vm2649_vm0 = vweird.f32 %v3089_v30 }
0x1a7d   :  { %v2764_v48 = vmul.f32 0.6931472, %v3091_v47  ;;  %vm2650_vm4 = vmor %vm2648_vm3, %vm2649_vm0 }
0x1a7e   :  { %v2645_v19 = vsub.f32 1.0, %v2644_v33  ;;  %v2608_v49 = vpop.xlane.xlu0 %2607 }
0x1a7f   :  { %v2779_v20 = vsub.f32 %v5383_v23, %v2764_v48  ;;  %3092 = vrcp.f32 %v2608_v49  ;;  %v2696_v12 = vand.u32 2147483648, %v2608_v49  ;;  %v2694_v5 = vand.u32 2147483647, %v2608_v49 }
0x1a80   :  { %v2646_v51 = vmul.f32 %v3089_v30, %v2645_v19  ;;  %3094 = vlog2.f32 %v2608_v49  ;;  %vm2690_vm8 = vweird.f32 %v2608_v49 }
0x1a81   :  { %2788 = vst [vmem:[#allocation4 + $0x10] sm:$0xff] %v2779_v20  ;;  %v2697_v29 = vor.u32 1.1754944e-38, %v2696_v12  ;;  %vm2695_vm10 = vcmp.eq.f32.partialorder %v2694_v5, 8.507059e+37 }
0x1a82   :  { %v2647_v54 = vadd.f32 %v3089_v30, %v2646_v51 }
0x1a84   :  { %v2651_v63 = vsel %vm2650_vm4, %v3089_v30, %v2647_v54 }
0x1a85   :  { %v3093_v59 = vpop.eup %3092  ;;  %v2656_v60 = vsel %vm2653_vm6, %v2655_v56, %v2651_v63 }
0x1a86   :  { %v3095_v61 = vpop.eup %3094  ;;  %v2743_v55 = vmul.f32 %v5392_v13, %v2656_v60  ;;  %v2686_v57 = vmul.f32 %v3093_v59, %v2608_v49  ;;  %v2610_v16 = vpop.xlane.xlu1 %2609  ;;  %vm2691_vm7 = vweird.f32 %v3093_v59 }
0x1a87   :  { %v2770_v23 = vmul.f32 0.6931472, %v3095_v61  ;;  %3096 = vrcp.f32 %v2610_v16  ;;  %vm2692_vm9 = vmor %vm2690_vm8, %vm2691_vm7  ;;  %v2710_v41 = vand.u32 2147483648, %v2610_v16  ;;  %v2708_v21 = vand.u32 2147483647, %v2610_v16 }
0x1a88   :  { %2752 = vst [vmem:[#allocation6 + $0x10] sm:$0xff] %v2743_v55  ;;  %v2687_v1 = vsub.f32 1.0, %v2686_v57  ;;  %3098 = vlog2.f32 %v2610_v16  ;;  %vm2704_vm12 = vweird.f32 %v2610_v16 }
0x1a89   :  { %v2782_v25 = vsub.f32 %v5394_v15, %v2770_v23  ;;  %v2711_v38 = vor.u32 1.1754944e-38, %v2710_v41  ;;  %vm2709_vm5 = vcmp.eq.f32.partialorder %v2708_v21, 8.507059e+37 }
0x1a8a   :  { %v2688_v22 = vmul.f32 %v3093_v59, %v2687_v1 }
0x1a8b   :  { %2791 = vst [vmem:[#allocation4 + $0x28] sm:$0xff] %v2782_v25 }
0x1a8c   :  { %v2689_v27 = vadd.f32 %v3093_v59, %v2688_v22 }
0x1a8d   :  { %v3097_v26 = vpop.eup %3096 }
0x1a8e   :  { %v3099_v13 = vpop.eup %3098  ;;  %v2693_v36 = vsel %vm2692_vm9, %v3093_v59, %v2689_v27  ;;  %v2700_v37 = vmul.f32 %v3097_v26, %v2610_v16  ;;  %v2612_v14 = vpop.xlane.xlu2 %2611  ;;  %vm2705_vm11 = vweird.f32 %v3097_v26 }
0x1a8f   :  { %v2698_v28 = vsel %vm2695_vm10, %v2697_v29, %v2693_v36  ;;  %v2772_v17 = vmul.f32 0.6931472, %v3099_v13  ;;  %3100 = vrcp.f32 %v2612_v14  ;;  %vm2706_vm13 = vmor %vm2704_vm12, %vm2705_vm11  ;;  %v2724_v40 = vand.u32 2147483648, %v2612_v14 }
0x1a90   :  { %v2746_v6 = vmul.f32 %v5400_v31, %v2698_v28  ;;  %v2701_v15 = vsub.f32 1.0, %v2700_v37  ;;  %3102 = vlog2.f32 %v2612_v14  ;;  %v2722_v3 = vand.u32 2147483647, %v2612_v14 }
0x1a91   :  { %v2783_v62 = vsub.f32 %v5398_v43, %v2772_v17  ;;  %vm2718_vm15 = vweird.f32 %v2612_v14  ;;  %v2725_v18 = vor.u32 1.1754944e-38, %v2724_v40 }
0x1a92   :  { %2755 = vst [vmem:[#allocation6 + $0x28] sm:$0xff] %v2746_v6  ;;  %v2702_v0 = vmul.f32 %v3097_v26, %v2701_v15  ;;  %vm2723_vm2 = vcmp.eq.f32.partialorder %v2722_v3, 8.507059e+37 }
0x1a93   :  { %2792 = vst [vmem:[#allocation4 + $0x30] sm:$0xff] %v2783_v62 }
0x1a94   :  { %v2703_v42 = vadd.f32 %v3097_v26, %v2702_v0 }
0x1a95   :  { %v3101_v53 = vpop.eup %3100 }
0x1a96   :  { %v2707_v7 = vsel %vm2706_vm13, %v3097_v26, %v2703_v42  ;;  %v2714_v4 = vmul.f32 %v3101_v53, %v2612_v14  ;;  %v3103_v9 = vpop.eup %3102  ;;  %vm2719_vm14 = vweird.f32 %v3101_v53 }
0x1a97   :  { %v2712_v31 = vsel %vm2709_vm5, %v2711_v38, %v2707_v7  ;;  %v2774_v43 = vmul.f32 0.6931472, %v3103_v9  ;;  %vm2720_vm1 = vmor %vm2718_vm15, %vm2719_vm14 }
0x1a98   :  { %v2747_v58 = vmul.f32 %v5406_v8, %v2712_v31  ;;  %v2715_v10 = vsub.f32 1.0, %v2714_v4 }
0x1a99   :  { %v2784_v32 = vsub.f32 %v5404_v24, %v2774_v43 }
0x1a9a   :  { %2756 = vst [vmem:[#allocation6 + $0x30] sm:$0xff] %v2747_v58  ;;  %v2716_v39 = vmul.f32 %v3101_v53, %v2715_v10 }
0x1a9b   :  { %2793 = vst [vmem:[#allocation4 + $0x38] sm:$0xff] %v2784_v32 }
0x1a9c   :  { %v2717_v11 = vadd.f32 %v3101_v53, %v2716_v39 }
0x1a9e   :  { %v2721_v45 = vsel %vm2720_vm1, %v3101_v53, %v2717_v11 }
0x1a9f   :  { %v2726_v46 = vsel %vm2723_vm2, %v2725_v18, %v2721_v45 }
0x1aa0   :  { %v2748_v35 = vmul.f32 %v5412_v44, %v2726_v46 }
0x1aa2   :  { %2757 = vst [vmem:[#allocation6 + $0x38] sm:$0xff] %v2748_v35 }
0x1aeb   :  { %v2614_v8 = vpop.xlane.xlu0 %2613 }
0x1aec   :  { %3104 = vrcp.f32 %v2614_v8  ;;  %v2738_v19 = vand.u32 2147483648, %v2614_v8  ;;  %v2736_v50 = vand.u32 2147483647, %v2614_v8  ;;  %vm2732_vm3 = vweird.f32 %v2614_v8 }
0x1aed   :  { %3106 = vlog2.f32 %v2614_v8 }
0x1aee   :  { %v2739_v51 = vor.u32 1.1754944e-38, %v2738_v19  ;;  %vm2737_vm6 = vcmp.eq.f32.partialorder %v2736_v50, 8.507059e+37 }
0x1af2   :  { %v3105_v30 = vpop.eup %3104 }
0x1af3   :  { %v3107_v24 = vpop.eup %3106  ;;  %v2728_v47 = vmul.f32 %v3105_v30, %v2614_v8  ;;  %vm2733_vm0 = vweird.f32 %v3105_v30 }
0x1af4   :  { %v2776_v33 = vmul.f32 0.6931472, %v3107_v24  ;;  %vm2734_vm4 = vmor %vm2732_vm3, %vm2733_vm0 }
0x1af5   :  { %v2729_v48 = vsub.f32 1.0, %v2728_v47 }
0x1af6   :  { %v2785_v44 = vsub.f32 %v5430_v34, %v2776_v33 }
0x1af7   :  { %v2730_v49 = vmul.f32 %v3105_v30, %v2729_v48 }
0x1af8   :  { %2794 = vst [vmem:[#allocation4 + $0x40] sm:$0xff] %v2785_v44 }
0x1af9   :  { %v2731_v20 = vadd.f32 %v3105_v30, %v2730_v49  ;;  %2807 = dma.vmem_to_hbm [thread:$0]  %s2800_s4, 1152, %s2802_s26, [#allocation5], %s3167_s27, %s3167_s27, %s3168_s28  }
0x1afb   :  { %v2735_v52 = vsel %vm2734_vm4, %v3105_v30, %v2731_v20 }
0x1afc   :  { %v2740_v34 = vsel %vm2737_vm6, %v2739_v51, %v2735_v52 }
0x1afd   :  { %v2749_v54 = vmul.f32 %v5433_v2, %v2740_v34 }
0x1aff   :  { %2758 = vst [vmem:[#allocation6 + $0x40] sm:$0xff] %v2749_v54 }
0x1b00   :  { %2820 = dma.vmem_to_hbm [thread:$0]  %s2813_s29, 1152, %s2815_s14, [#allocation7], %s3167_s27, %s3167_s27, %s3168_s28  }
0x1b01   :  { %3159 = dma.done.wait [#allocation5], 1152  }
0x1b02   :  { %3160 = vsyncadd [#allocation5], 4294966144 }
0x1b03   :  { %3161 = dma.done.wait [#allocation7], 1152  }
0x1b04   :  { %3162 = vsyncadd [#allocation7], 4294966144 }
0x1b05   :  { %2829 = vsyncpa [#allocation5], 1 }
0x1b06   :  { %2830 = vsyncpa [#allocation7], 1 }
0x1b07   :  { %2831 = vsyncmov [#allocation3] }
0x1b0a   :  { %s2832_s15 = vpop.sfrf %2831 }
0x1b0b   :  { %p2894_p0 = scmp.ne.s32.totalorder %s2832_s15, 0 }
0x1b0d   :  { %2836 = shalt.err (%p2894_p0)  }

</bundles_post_ra>
